<compile_context>
chip_gen: v7x
topology: tpu7x:2x2x1
jax: 0.10.0
libtpu: 0.0.40
codegen_flags: <defaults>
</compile_context>

<pallas_src>
import functools

import jax
import jax.numpy as jnp
from jax import lax
from jax.experimental import pallas as pl
from jax.experimental.pallas import tpu as pltpu


def _round_up(x, m):
    return ((x + m - 1) // m) * m


def _sigmoid_via_tanh(x):
    # sigmoid(x) = 0.5 * tanh(0.5 x) + 0.5  -> single EUP push per gate.
    return 0.5 * jnp.tanh(0.5 * x) + 0.5


def _recurrence_vmem_bytes(block_t, block_b, hp, stream_isz, w_isz):
    """Rough per-kernel VMEM footprint (double-buffered pipeline + scratch)."""
    xproj = 2 * block_t * block_b * 4 * hp * stream_isz     # input stream
    outs = 2 * 2 * block_t * block_b * hp * 4               # h/c outputs
    wgt = 2 * hp * 4 * hp * w_isz                           # resident W_hh
    carry = 2 * block_b * hp * 4                            # h/c carries
    stage = 2 * block_t * block_b * hp * 4                  # staging buffers
    lens = 2 * block_b * 4
    return xproj + outs + wgt + carry + stage + lens


# --------------------------------------------------------------------------
# Pallas kernel: sequential LSTM recurrence (input projection pre-computed)
# --------------------------------------------------------------------------
def _lstm_recurrence_kernel(xproj_ref, len_ref, whh_ref,
                            h_out_ref, c_out_ref,
                            h_carry, c_carry, h_stage, c_stage,
                            *, block_t, hidden_pad, unroll):
    """One grid step = `block_t` timesteps for one batch tile.

    xproj_ref : (block_t, Bt, 4*Hp)  stream dtype  x @ W_ih^T + (b_ih + b_hh)
    len_ref   : (Bt, 1)              int32         sequence lengths (resident)
    whh_ref   : (Hp, 4*Hp)           f32/bf16      recurrent weights (resident)
    h_out_ref / c_out_ref : (Bt, block_t, Hp) f32  per-step states, BATCH-major
    h_carry / c_carry     : (Bt, Hp) f32           carries across time blocks
    h_stage / c_stage     : (block_t, Bt, Hp) f32  time-major staging buffers
    """
    t_blk = pl.program_id(1)
    Hp = hidden_pad

    # The (h, c) carry in scratch is only valid because the time axis is the
    # innermost grid axis and is marked "arbitrary" (sequential); the batch
    # axis is the only one that may be sharded across TensorCores.
    @pl.when(t_blk == 0)
    def _():
        h_carry[...] = jnp.zeros_like(h_carry)
        c_carry[...] = jnp.zeros_like(c_carry)

    lengths = len_ref[...]            # (Bt, 1) int32, resident in VMEM
    w_hh = whh_ref[...]               # (Hp, 4Hp), resident in VMEM
    t0 = t_blk * block_t

    def step(i, carry):
        h_prev, c_prev = carry
        # Only the recurrent matmul remains on the sequential critical path.
        gates = xproj_ref[i].astype(jnp.float32) + jnp.dot(
            h_prev.astype(w_hh.dtype), w_hh,
            preferred_element_type=jnp.float32)
        # Lane-aligned gate blocks (each Hp = multiple of 128 wide).
        i_g = _sigmoid_via_tanh(gates[:, 0 * Hp:1 * Hp])
        f_g = _sigmoid_via_tanh(gates[:, 1 * Hp:2 * Hp])
        g_g = jnp.tanh(gates[:, 2 * Hp:3 * Hp])
        o_g = _sigmoid_via_tanh(gates[:, 3 * Hp:4 * Hp])

        c_new = f_g * c_prev + i_g * g_g
        h_new = o_g * jnp.tanh(c_new)

        # Freeze the state once t >= length (single vselect, no float blend).
        valid = (t0 + i) < lengths                     # (Bt, 1) bool
        h_upd = jnp.where(valid, h_new, h_prev)
        c_upd = jnp.where(valid, c_new, c_prev)

        # Dense, lane-aligned stores into the time-major staging buffers
        # (dynamic index only on the leading dim).
        h_stage[i] = h_upd
        c_stage[i] = c_upd
        return (h_upd, c_upd)

    h, c = lax.fori_loop(0, block_t, step, (h_carry[...], c_carry[...]),
                         unroll=unroll)
    h_carry[...] = h
    c_carry[...] = c

    # Static-index copy of the time-major staging buffers into the batch-major
    # output block: removes the (T,B,H)->(B,T,H) HBM transposes the wrapper
    # would otherwise pay, at the cost of sublane-masked (but lane-dense) vst.
    for i in range(block_t):
        h_out_ref[:, i, :] = h_stage[i]
        c_out_ref[:, i, :] = c_stage[i]


def lstm_recurrence_pallas(x_proj_tm, lengths_col, w_hh_p, *,
                           block_t, block_b, hidden_pad, unroll,
                           vmem_limit_bytes):
    """x_proj_tm: (Tp, Bp, 4*Hp), lengths_col: (Bp, 1) int32,
    w_hh_p: (Hp, 4*Hp).  Returns (h_seq, c_seq), each (Bp, Tp, Hp) f32
    (batch-major, so the wrapper does no output transposes)."""
    Tp, Bp, G = x_proj_tm.shape
    Hp = hidden_pad
    assert G == 4 * Hp
    assert Tp % block_t == 0 and Bp % block_b == 0
    assert block_b % 8 == 0 and block_t % 8 == 0

    kernel = functools.partial(_lstm_recurrence_kernel,
                               block_t=block_t, hidden_pad=Hp, unroll=unroll)

    grid_spec = pltpu.PrefetchScalarGridSpec(
        num_scalar_prefetch=0,
        grid=(Bp // block_b, Tp // block_t),           # (batch tiles, time tiles)
        in_specs=[
            # time-major input stream; per-step reads are dense (leading dim)
            pl.BlockSpec((block_t, block_b, 4 * Hp), lambda b, t: (t, b, 0)),
            pl.BlockSpec((block_b, 1), lambda b, t: (b, 0)),    # lengths
            pl.BlockSpec((Hp, 4 * Hp), lambda b, t: (0, 0)),    # W_hh resident
        ],
        out_specs=[
            # batch-major outputs: wrapper slices directly, no transposes
            pl.BlockSpec((block_b, block_t, Hp), lambda b, t: (b, t, 0)),
            pl.BlockSpec((block_b, block_t, Hp), lambda b, t: (b, t, 0)),
        ],
        scratch_shapes=[
            pltpu.VMEM((block_b, Hp), jnp.float32),              # h carry
            pltpu.VMEM((block_b, Hp), jnp.float32),              # c carry
            pltpu.VMEM((block_t, block_b, Hp), jnp.float32),     # h staging
            pltpu.VMEM((block_t, block_b, Hp), jnp.float32),     # c staging
        ],
    )

    out_shape = (
        jax.ShapeDtypeStruct((Bp, Tp, Hp), jnp.float32),
        jax.ShapeDtypeStruct((Bp, Tp, Hp), jnp.float32),
    )

    return pl.pallas_call(
        kernel,
        out_shape=out_shape,
        grid_spec=grid_spec,
        compiler_params=pltpu.CompilerParams(
            # batch axis may shard across TCs (v7x); time axis is the
            # recurrence and MUST stay sequential ("arbitrary").
            dimension_semantics=("parallel", "arbitrary"),
            vmem_limit_bytes=vmem_limit_bytes),
    )(x_proj_tm, lengths_col, w_hh_p)


# --------------------------------------------------------------------------
# Full EncoderorthoRNN.forward equivalent
# --------------------------------------------------------------------------
def encoder_forward(seq, lengths, params, *, block_t=None, block_b=None,
                    matmul_dtype=jnp.bfloat16, stream_dtype=jnp.bfloat16,
                    unroll=None, vmem_budget_bytes=48 * 2**20):
    """seq: (B, T) int32 token ids; lengths: (B,) int32.

    Returns dict with hidden (B,T,H), cell_state (B,T,H), last_hidden (B,H),
    last_cell (B,H), embedding (B,T,E).
    """
    emb_table = params["embedding"]                    # (V, E), row 0 zeroed
    embedding = emb_table[seq]                         # (B, T, E)  -- glue
    B, T, E = embedding.shape
    H = params["w_hh"].shape[1]

    Hp = _round_up(H, 128)                             # lane-aligned gates
    stream_isz = jnp.dtype(stream_dtype).itemsize
    w_isz = jnp.dtype(matmul_dtype).itemsize

    # ---- tile selection ----------------------------------------------------
    if block_b is None:
        # Single batch tile by default (best MXU row fill on v5e/v6e); pass
        # block_b ~= Bp/2 explicitly on v7x to use both TensorCores.
        block_b = _round_up(min(max(B, 8), 256), 8)
    assert block_b % 8 == 0, "block_b must be a multiple of 8 sublanes"
    Bp = _round_up(max(B, block_b), block_b)

    if block_t is None:
        block_t = min(32, _round_up(T, 8))
    assert block_t % 8 == 0, "block_t must be a multiple of 8"
    # Shrink block_t until the pipeline + scratch fit the VMEM budget
    # (48 MiB default keeps headroom on v7x's 64 MiB VMEM).
    while (block_t > 8 and
           _recurrence_vmem_bytes(block_t, block_b, Hp, stream_isz, w_isz)
           > vmem_budget_bytes):
        block_t = max(8, ((block_t // 2) // 8) * 8)
    Tp = _round_up(T, block_t)

    if unroll is None:
        # Full unroll for small gate tiles; cap at 4 once (block_b, 4Hp)
        # exceeds the vreg file to avoid spill-dominated inner loops.
        unroll = block_t if block_b * 4 * Hp <= 32 * 1024 else min(block_t, 4)

    vmem_limit = min(
        int(_recurrence_vmem_bytes(block_t, block_b, Hp, stream_isz, w_isz)
            * 1.25) + (2 << 20),
        64 * 2**20)

    # ---- pad weights to gate blocks [i | f | g | o], each Hp wide ----------
    w_ih = params["w_ih"].reshape(4, H, E)             # torch (4H, E)
    w_ih = jnp.pad(w_ih, ((0, 0), (0, Hp - H), (0, 0)))
    w_ih = w_ih.reshape(4 * Hp, E).T                   # (E, 4Hp)
    w_hh = params["w_hh"].reshape(4, H, H)             # torch (4H, H)
    w_hh = jnp.pad(w_hh, ((0, 0), (0, Hp - H), (0, Hp - H)))
    w_hh = w_hh.reshape(4 * Hp, Hp).T                  # (Hp, 4Hp)
    bias = (params["b_ih"] + params["b_hh"]).reshape(4, H)
    bias = jnp.pad(bias, ((0, 0), (0, Hp - H))).reshape(4 * Hp)

    # ---- hoisted input projection: one large matmul, produced TIME-MAJOR ---
    emb_p = jnp.pad(embedding, ((0, Bp - B), (0, Tp - T), (0, 0)))
    x_proj_tm = jnp.einsum(
        "bte,eg->tbg",
        emb_p.astype(matmul_dtype), w_ih.astype(matmul_dtype),
        preferred_element_type=jnp.float32)            # (Tp, Bp, 4Hp) f32
    x_proj_tm = (x_proj_tm + bias[None, None, :]).astype(stream_dtype)

    lengths_col = jnp.pad(lengths.astype(jnp.int32), (0, Bp - B)).reshape(Bp, 1)

    h_seq_p, c_seq_p = lstm_recurrence_pallas(
        x_proj_tm, lengths_col, w_hh.astype(matmul_dtype),
        block_t=block_t, block_b=block_b, hidden_pad=Hp, unroll=unroll,
        vmem_limit_bytes=vmem_limit)                   # each (Bp, Tp, Hp)

    h_seq = h_seq_p[:B, :T, :H]                        # (B, T, H), no transpose
    c_seq = c_seq_p[:B, :T, :H]
    # States freeze once t >= length, so the final timestep already holds each
    # example's last hidden / cell state (no per-step "last" stores needed).
    last_h = h_seq_p[:B, Tp - 1, :H]
    last_c = c_seq_p[:B, Tp - 1, :H]

    return {
        "hidden": h_seq,
        "cell_state": c_seq,
        "last_hidden": last_h,
        "last_cell": last_c,
        "embedding": embedding,
    }


# --------------------------------------------------------------------------
# Pure-JAX reference (lax.scan) mirroring torch.nn.LSTMCell semantics
# --------------------------------------------------------------------------
def _reference_forward(seq, lengths, params):
    emb_table = params["embedding"]
    x = emb_table[seq]                                 # (B, T, E)
    B, T, E = x.shape
    H = params["w_hh"].shape[1]
    w_ih_t = params["w_ih"].T
    w_hh_t = params["w_hh"].T
    b = params["b_ih"] + params["b_hh"]

    def step(carry, inp):
        h, c = carry
        x_t, m_t = inp
        gates = x_t @ w_ih_t + h @ w_hh_t + b
        i = jax.nn.sigmoid(gates[:, 0 * H:1 * H])
        f = jax.nn.sigmoid(gates[:, 1 * H:2 * H])
        g = jnp.tanh(gates[:, 2 * H:3 * H])
        o = jax.nn.sigmoid(gates[:, 3 * H:4 * H])
        c_new = f * c + i * g
        h_new = o * jnp.tanh(c_new)
        h_upd = m_t * h_new + (1.0 - m_t) * h
        c_upd = m_t * c_new + (1.0 - m_t) * c
        return (h_upd, c_upd), (h_upd, c_upd)

    x_tm = jnp.transpose(x, (1, 0, 2))
    mask_tm = (jnp.arange(T)[:, None] < lengths[None, :]).astype(
        jnp.float32)[:, :, None]
    init = (jnp.zeros((B, H), jnp.float32), jnp.zeros((B, H), jnp.float32))
    (last_h, last_c), (h_seq, c_seq) = lax.scan(step, init, (x_tm, mask_tm))
    return (jnp.transpose(h_seq, (1, 0, 2)),
            jnp.transpose(c_seq, (1, 0, 2)), last_h, last_c)


def make_params(key, vocab_size, embed_size, hidden_size):
    k_emb, k1, k2, k3, k4 = jax.random.split(key, 5)
    bound = 1.0 / jnp.sqrt(hidden_size)
    emb = jax.random.normal(k_emb, (vocab_size, embed_size), jnp.float32)
    emb = emb.at[0].set(0.0)                           # padding_idx=0
    u = lambda k, shp: jax.random.uniform(k, shp, jnp.float32, -bound, bound)
    return {
        "embedding": emb,
        "w_ih": u(k1, (4 * hidden_size, embed_size)),
        "w_hh": u(k2, (4 * hidden_size, hidden_size)),
        "b_ih": u(k3, (4 * hidden_size,)),
        "b_hh": u(k4, (4 * hidden_size,)),
    }


if __name__ == "__main__":
    vocab_size, embed_size, hidden_size = 50, 32, 32
    B, T = 2, 12

    key = jax.random.PRNGKey(0)
    k_p, k_seq = jax.random.split(key)
    params = make_params(k_p, vocab_size, embed_size, hidden_size)

    seq = jax.random.randint(k_seq, (B, T), 1, vocab_size, dtype=jnp.int32)
    lengths = jnp.array([T, 5], dtype=jnp.int32)
    # zero out padded token positions (padding_idx = 0)
    seq = jnp.where(jnp.arange(T)[None, :] < lengths[:, None], seq, 0)

    ref_h, ref_c, ref_lh, ref_lc = _reference_forward(seq, lengths, params)

    # Full-precision path: block_t=8 -> Tp=16, 2 time blocks, exercising the
    # (h, c) carry across grid steps and the time-padding/freeze semantics.
    fwd_f32 = jax.jit(functools.partial(
        encoder_forward, block_t=8, block_b=8,
        matmul_dtype=jnp.float32, stream_dtype=jnp.float32))
    out = jax.block_until_ready(fwd_f32(seq, lengths, params))
    assert out["hidden"].shape == (B, T, hidden_size)
    assert out["cell_state"].shape == (B, T, hidden_size)
    assert out["last_hidden"].shape == (B, hidden_size)
    assert jnp.allclose(out["hidden"], ref_h, atol=1e-4, rtol=1e-4)
    assert jnp.allclose(out["cell_state"], ref_c, atol=1e-4, rtol=1e-4)
    assert jnp.allclose(out["last_hidden"], ref_lh, atol=1e-4, rtol=1e-4)
    assert jnp.allclose(out["last_cell"], ref_lc, atol=1e-4, rtol=1e-4)
    assert jnp.allclose(out["embedding"], params["embedding"][seq])

    # Default (performance) path: auto tile selection, bf16 W_hh / x_proj
    # stream, f32 gate math and carries.
    fwd_bf16 = jax.jit(encoder_forward)
    out16 = jax.block_until_ready(fwd_bf16(seq, lengths, params))
    assert jnp.allclose(out16["hidden"], ref_h, atol=5e-2, rtol=5e-2)
    assert jnp.allclose(out16["cell_state"], ref_c, atol=5e-2, rtol=5e-2)
    assert jnp.allclose(out16["last_hidden"], ref_lh, atol=5e-2, rtol=5e-2)
    assert jnp.allclose(out16["last_cell"], ref_lc, atol=5e-2, rtol=5e-2)

    print("KERNEL_OK")
</pallas_src>

<mosaic_0001>
module attributes {stable_mosaic.version = 11 : i64} {
  func.func @_lstm_recurrence_kernel(%arg0: i32, %arg1: i32, %arg2: memref<8x8x512xf32, #tpu.memory_space<vmem>>, %arg3: memref<8x1xi32, #tpu.memory_space<vmem>>, %arg4: memref<128x512xf32, #tpu.memory_space<vmem>>, %arg5: memref<8x8x128xf32, #tpu.memory_space<vmem>>, %arg6: memref<8x8x128xf32, #tpu.memory_space<vmem>>, %arg7: memref<8x128xf32, #tpu.memory_space<vmem>>, %arg8: memref<8x128xf32, #tpu.memory_space<vmem>>, %arg9: memref<8x8x128xf32, #tpu.memory_space<vmem>>, %arg10: memref<8x8x128xf32, #tpu.memory_space<vmem>>) attributes {dimension_semantics = [#tpu.dimension_semantics<parallel>, #tpu.dimension_semantics<arbitrary>], iteration_bounds = array<i64: 1, 2>, scalar_prefetch = 0 : i64, scratch_operands = 4 : i64, tpu.core_type = #tpu.core_type<tc>, window_params = [{transform_indices = @transform_0, window_bounds = array<i64: 8, 8, 512>}, {transform_indices = @transform_1, window_bounds = array<i64: 8, 1>}, {pipeline_mode = #tpu.pipeline_mode<synchronous>, transform_indices = @transform_2, window_bounds = array<i64: 128, 512>}, {transform_indices = @transform_3, window_bounds = array<i64: 8, 8, 128>}, {transform_indices = @transform_4, window_bounds = array<i64: 8, 8, 128>}]} {
    %c0_i32 = arith.constant 0 : i32
    %0 = arith.cmpi eq, %arg1, %c0_i32 : i32
    %1 = arith.extui %0 : i1 to i32
    %c0_i32_0 = arith.constant 0 : i32
    %2 = arith.cmpi ne, %1, %c0_i32_0 : i32
    scf.if %2 {
      %cst_230 = arith.constant 0.000000e+00 : f32
      %514 = vector.broadcast %cst_230 : f32 to vector<8x128xf32>
      %c0_231 = arith.constant 0 : index
      %c0_232 = arith.constant 0 : index
      %515 = vector.load %arg7[%c0_231, %c0_232] : memref<8x128xf32, #tpu.memory_space<vmem>>, vector<8x128xf32>
      tpu.vector_store %arg7[%c0_231, %c0_232], %514 {strides = array<i32>} : memref<8x128xf32, #tpu.memory_space<vmem>>, vector<8x128xf32>,
      %cst_233 = arith.constant 0.000000e+00 : f32
      %516 = vector.broadcast %cst_233 : f32 to vector<8x128xf32>
      %c0_234 = arith.constant 0 : index
      %c0_235 = arith.constant 0 : index
      %517 = vector.load %arg8[%c0_234, %c0_235] : memref<8x128xf32, #tpu.memory_space<vmem>>, vector<8x128xf32>
      tpu.vector_store %arg8[%c0_234, %c0_235], %516 {strides = array<i32>} : memref<8x128xf32, #tpu.memory_space<vmem>>, vector<8x128xf32>,
    } else {
    }
    %c0 = arith.constant 0 : index
    %c0_1 = arith.constant 0 : index
    %3 = vector.load %arg3[%c0, %c0_1] : memref<8x1xi32, #tpu.memory_space<vmem>>, vector<8x1xi32>
    %c0_2 = arith.constant 0 : index
    %c0_3 = arith.constant 0 : index
    %4 = vector.load %arg4[%c0_2, %c0_3] : memref<128x512xf32, #tpu.memory_space<vmem>>, vector<128x512xf32>
    %c8_i32 = arith.constant 8 : i32
    %5 = arith.muli %arg1, %c8_i32 : i32
    %c0_4 = arith.constant 0 : index
    %c0_5 = arith.constant 0 : index
    %6 = vector.load %arg7[%c0_4, %c0_5] : memref<8x128xf32, #tpu.memory_space<vmem>>, vector<8x128xf32>
    %c0_6 = arith.constant 0 : index
    %c0_7 = arith.constant 0 : index
    %7 = vector.load %arg8[%c0_6, %c0_7] : memref<8x128xf32, #tpu.memory_space<vmem>>, vector<8x128xf32>
    %c0_i32_8 = arith.constant 0 : i32
    %8 = arith.index_cast %c0_i32_8 : i32 to index
    %c0_9 = arith.constant 0 : index
    %c0_10 = arith.constant 0 : index
    %9 = vector.load %arg2[%8, %c0_9, %c0_10] : memref<8x8x512xf32, #tpu.memory_space<vmem>>, vector<1x8x512xf32>
    %10 = vector.shape_cast %9 : vector<1x8x512xf32> to vector<8x512xf32>
    %cst = arith.constant dense<0.000000e+00> : vector<8x512xf32>
    %11 = tpu.matmul %6, %4, %cst {dimension_numbers = #tpu.dot_dimension_numbers<[1], [0], [0], [1], [0, 0, 1, 1], [], []>} : vector<8x128xf32>, vector<128x512xf32>, vector<8x512xf32> -> vector<8x512xf32>
    %12 = arith.addf %10, %11 : vector<8x512xf32>
    %13 = vector.extract_strided_slice %12 {offsets = [0, 0], sizes = [8, 128], strides = [1, 1]} : vector<8x512xf32> to vector<8x128xf32>
    %cst_11 = arith.constant 5.000000e-01 : f32
    %14 = vector.broadcast %cst_11 : f32 to vector<8x128xf32>
    %15 = arith.mulf %14, %13 : vector<8x128xf32>
    %16 = math.tanh %15 : vector<8x128xf32>
    %cst_12 = arith.constant 5.000000e-01 : f32
    %17 = vector.broadcast %cst_12 : f32 to vector<8x128xf32>
    %18 = arith.mulf %17, %16 : vector<8x128xf32>
    %cst_13 = arith.constant 5.000000e-01 : f32
    %19 = vector.broadcast %cst_13 : f32 to vector<8x128xf32>
    %20 = arith.addf %18, %19 : vector<8x128xf32>
    %21 = vector.extract_strided_slice %12 {offsets = [0, 128], sizes = [8, 128], strides = [1, 1]} : vector<8x512xf32> to vector<8x128xf32>
    %cst_14 = arith.constant 5.000000e-01 : f32
    %22 = vector.broadcast %cst_14 : f32 to vector<8x128xf32>
    %23 = arith.mulf %22, %21 : vector<8x128xf32>
    %24 = math.tanh %23 : vector<8x128xf32>
    %cst_15 = arith.constant 5.000000e-01 : f32
    %25 = vector.broadcast %cst_15 : f32 to vector<8x128xf32>
    %26 = arith.mulf %25, %24 : vector<8x128xf32>
    %cst_16 = arith.constant 5.000000e-01 : f32
    %27 = vector.broadcast %cst_16 : f32 to vector<8x128xf32>
    %28 = arith.addf %26, %27 : vector<8x128xf32>
    %29 = vector.extract_strided_slice %12 {offsets = [0, 256], sizes = [8, 128], strides = [1, 1]} : vector<8x512xf32> to vector<8x128xf32>
    %30 = math.tanh %29 : vector<8x128xf32>
    %31 = vector.extract_strided_slice %12 {offsets = [0, 384], sizes = [8, 128], strides = [1, 1]} : vector<8x512xf32> to vector<8x128xf32>
    %cst_17 = arith.constant 5.000000e-01 : f32
    %32 = vector.broadcast %cst_17 : f32 to vector<8x128xf32>
    %33 = arith.mulf %32, %31 : vector<8x128xf32>
    %34 = math.tanh %33 : vector<8x128xf32>
    %cst_18 = arith.constant 5.000000e-01 : f32
    %35 = vector.broadcast %cst_18 : f32 to vector<8x128xf32>
    %36 = arith.mulf %35, %34 : vector<8x128xf32>
    %cst_19 = arith.constant 5.000000e-01 : f32
    %37 = vector.broadcast %cst_19 : f32 to vector<8x128xf32>
    %38 = arith.addf %36, %37 : vector<8x128xf32>
    %39 = arith.mulf %28, %7 : vector<8x128xf32>
    %40 = arith.mulf %20, %30 : vector<8x128xf32>
    %41 = arith.addf %39, %40 : vector<8x128xf32>
    %42 = math.tanh %41 : vector<8x128xf32>
    %43 = arith.mulf %38, %42 : vector<8x128xf32>
    %44 = arith.addi %5, %c0_i32_8 : i32
    %45 = vector.broadcast %44 : i32 to vector<8x1xi32>
    %46 = arith.cmpi slt, %45, %3 : vector<8x1xi32>
    %47 = vector.shape_cast %46 : vector<8x1xi1> to vector<8x1xi1>
    %48 = vector.broadcast %47 : vector<8x1xi1> to vector<8x128xi1>
    %49 = arith.select %48, %43, %6 : vector<8x128xi1>, vector<8x128xf32>
    %50 = vector.shape_cast %46 : vector<8x1xi1> to vector<8x1xi1>
    %51 = vector.broadcast %50 : vector<8x1xi1> to vector<8x128xi1>
    %52 = arith.select %51, %41, %7 : vector<8x128xi1>, vector<8x128xf32>
    %53 = arith.index_cast %c0_i32_8 : i32 to index
    %c0_20 = arith.constant 0 : index
    %c0_21 = arith.constant 0 : index
    %54 = vector.load %arg9[%53, %c0_20, %c0_21] : memref<8x8x128xf32, #tpu.memory_space<vmem>>, vector<1x8x128xf32>
    %55 = vector.shape_cast %54 : vector<1x8x128xf32> to vector<8x128xf32>
    %56 = vector.shape_cast %49 : vector<8x128xf32> to vector<1x8x128xf32>
    tpu.vector_store %arg9[%53, %c0_20, %c0_21], %56 {strides = array<i32>} : memref<8x8x128xf32, #tpu.memory_space<vmem>>, vector<1x8x128xf32>,
    %57 = arith.index_cast %c0_i32_8 : i32 to index
    %c0_22 = arith.constant 0 : index
    %c0_23 = arith.constant 0 : index
    %58 = vector.load %arg10[%57, %c0_22, %c0_23] : memref<8x8x128xf32, #tpu.memory_space<vmem>>, vector<1x8x128xf32>
    %59 = vector.shape_cast %58 : vector<1x8x128xf32> to vector<8x128xf32>
    %60 = vector.shape_cast %52 : vector<8x128xf32> to vector<1x8x128xf32>
    tpu.vector_store %arg10[%57, %c0_22, %c0_23], %60 {strides = array<i32>} : memref<8x8x128xf32, #tpu.memory_space<vmem>>, vector<1x8x128xf32>,
    %c1_i32 = arith.constant 1 : i32
    %61 = arith.index_cast %c1_i32 : i32 to index
    %c0_24 = arith.constant 0 : index
    %c0_25 = arith.constant 0 : index
    %62 = vector.load %arg2[%61, %c0_24, %c0_25] : memref<8x8x512xf32, #tpu.memory_space<vmem>>, vector<1x8x512xf32>
    %63 = vector.shape_cast %62 : vector<1x8x512xf32> to vector<8x512xf32>
    %cst_26 = arith.constant dense<0.000000e+00> : vector<8x512xf32>
    %64 = tpu.matmul %49, %4, %cst_26 {dimension_numbers = #tpu.dot_dimension_numbers<[1], [0], [0], [1], [0, 0, 1, 1], [], []>} : vector<8x128xf32>, vector<128x512xf32>, vector<8x512xf32> -> vector<8x512xf32>
    %65 = arith.addf %63, %64 : vector<8x512xf32>
    %66 = vector.extract_strided_slice %65 {offsets = [0, 0], sizes = [8, 128], strides = [1, 1]} : vector<8x512xf32> to vector<8x128xf32>
    %cst_27 = arith.constant 5.000000e-01 : f32
    %67 = vector.broadcast %cst_27 : f32 to vector<8x128xf32>
    %68 = arith.mulf %67, %66 : vector<8x128xf32>
    %69 = math.tanh %68 : vector<8x128xf32>
    %cst_28 = arith.constant 5.000000e-01 : f32
    %70 = vector.broadcast %cst_28 : f32 to vector<8x128xf32>
    %71 = arith.mulf %70, %69 : vector<8x128xf32>
    %cst_29 = arith.constant 5.000000e-01 : f32
    %72 = vector.broadcast %cst_29 : f32 to vector<8x128xf32>
    %73 = arith.addf %71, %72 : vector<8x128xf32>
    %74 = vector.extract_strided_slice %65 {offsets = [0, 128], sizes = [8, 128], strides = [1, 1]} : vector<8x512xf32> to vector<8x128xf32>
    %cst_30 = arith.constant 5.000000e-01 : f32
    %75 = vector.broadcast %cst_30 : f32 to vector<8x128xf32>
    %76 = arith.mulf %75, %74 : vector<8x128xf32>
    %77 = math.tanh %76 : vector<8x128xf32>
    %cst_31 = arith.constant 5.000000e-01 : f32
    %78 = vector.broadcast %cst_31 : f32 to vector<8x128xf32>
    %79 = arith.mulf %78, %77 : vector<8x128xf32>
    %cst_32 = arith.constant 5.000000e-01 : f32
    %80 = vector.broadcast %cst_32 : f32 to vector<8x128xf32>
    %81 = arith.addf %79, %80 : vector<8x128xf32>
    %82 = vector.extract_strided_slice %65 {offsets = [0, 256], sizes = [8, 128], strides = [1, 1]} : vector<8x512xf32> to vector<8x128xf32>
    %83 = math.tanh %82 : vector<8x128xf32>
    %84 = vector.extract_strided_slice %65 {offsets = [0, 384], sizes = [8, 128], strides = [1, 1]} : vector<8x512xf32> to vector<8x128xf32>
    %cst_33 = arith.constant 5.000000e-01 : f32
    %85 = vector.broadcast %cst_33 : f32 to vector<8x128xf32>
    %86 = arith.mulf %85, %84 : vector<8x128xf32>
    %87 = math.tanh %86 : vector<8x128xf32>
    %cst_34 = arith.constant 5.000000e-01 : f32
    %88 = vector.broadcast %cst_34 : f32 to vector<8x128xf32>
    %89 = arith.mulf %88, %87 : vector<8x128xf32>
    %cst_35 = arith.constant 5.000000e-01 : f32
    %90 = vector.broadcast %cst_35 : f32 to vector<8x128xf32>
    %91 = arith.addf %89, %90 : vector<8x128xf32>
    %92 = arith.mulf %81, %52 : vector<8x128xf32>
    %93 = arith.mulf %73, %83 : vector<8x128xf32>
    %94 = arith.addf %92, %93 : vector<8x128xf32>
    %95 = math.tanh %94 : vector<8x128xf32>
    %96 = arith.mulf %91, %95 : vector<8x128xf32>
    %97 = arith.addi %5, %c1_i32 : i32
    %98 = vector.broadcast %97 : i32 to vector<8x1xi32>
    %99 = arith.cmpi slt, %98, %3 : vector<8x1xi32>
    %100 = vector.shape_cast %99 : vector<8x1xi1> to vector<8x1xi1>
    %101 = vector.broadcast %100 : vector<8x1xi1> to vector<8x128xi1>
    %102 = arith.select %101, %96, %49 : vector<8x128xi1>, vector<8x128xf32>
    %103 = vector.shape_cast %99 : vector<8x1xi1> to vector<8x1xi1>
    %104 = vector.broadcast %103 : vector<8x1xi1> to vector<8x128xi1>
    %105 = arith.select %104, %94, %52 : vector<8x128xi1>, vector<8x128xf32>
    %106 = arith.index_cast %c1_i32 : i32 to index
    %c0_36 = arith.constant 0 : index
    %c0_37 = arith.constant 0 : index
    %107 = vector.load %arg9[%106, %c0_36, %c0_37] : memref<8x8x128xf32, #tpu.memory_space<vmem>>, vector<1x8x128xf32>
    %108 = vector.shape_cast %107 : vector<1x8x128xf32> to vector<8x128xf32>
    %109 = vector.shape_cast %102 : vector<8x128xf32> to vector<1x8x128xf32>
    tpu.vector_store %arg9[%106, %c0_36, %c0_37], %109 {strides = array<i32>} : memref<8x8x128xf32, #tpu.memory_space<vmem>>, vector<1x8x128xf32>,
    %110 = arith.index_cast %c1_i32 : i32 to index
    %c0_38 = arith.constant 0 : index
    %c0_39 = arith.constant 0 : index
    %111 = vector.load %arg10[%110, %c0_38, %c0_39] : memref<8x8x128xf32, #tpu.memory_space<vmem>>, vector<1x8x128xf32>
    %112 = vector.shape_cast %111 : vector<1x8x128xf32> to vector<8x128xf32>
    %113 = vector.shape_cast %105 : vector<8x128xf32> to vector<1x8x128xf32>
    tpu.vector_store %arg10[%110, %c0_38, %c0_39], %113 {strides = array<i32>} : memref<8x8x128xf32, #tpu.memory_space<vmem>>, vector<1x8x128xf32>,
    %c2_i32 = arith.constant 2 : i32
    %114 = arith.index_cast %c2_i32 : i32 to index
    %c0_40 = arith.constant 0 : index
    %c0_41 = arith.constant 0 : index
    %115 = vector.load %arg2[%114, %c0_40, %c0_41] : memref<8x8x512xf32, #tpu.memory_space<vmem>>, vector<1x8x512xf32>
    %116 = vector.shape_cast %115 : vector<1x8x512xf32> to vector<8x512xf32>
    %cst_42 = arith.constant dense<0.000000e+00> : vector<8x512xf32>
    %117 = tpu.matmul %102, %4, %cst_42 {dimension_numbers = #tpu.dot_dimension_numbers<[1], [0], [0], [1], [0, 0, 1, 1], [], []>} : vector<8x128xf32>, vector<128x512xf32>, vector<8x512xf32> -> vector<8x512xf32>
    %118 = arith.addf %116, %117 : vector<8x512xf32>
    %119 = vector.extract_strided_slice %118 {offsets = [0, 0], sizes = [8, 128], strides = [1, 1]} : vector<8x512xf32> to vector<8x128xf32>
    %cst_43 = arith.constant 5.000000e-01 : f32
    %120 = vector.broadcast %cst_43 : f32 to vector<8x128xf32>
    %121 = arith.mulf %120, %119 : vector<8x128xf32>
    %122 = math.tanh %121 : vector<8x128xf32>
    %cst_44 = arith.constant 5.000000e-01 : f32
    %123 = vector.broadcast %cst_44 : f32 to vector<8x128xf32>
    %124 = arith.mulf %123, %122 : vector<8x128xf32>
    %cst_45 = arith.constant 5.000000e-01 : f32
    %125 = vector.broadcast %cst_45 : f32 to vector<8x128xf32>
    %126 = arith.addf %124, %125 : vector<8x128xf32>
    %127 = vector.extract_strided_slice %118 {offsets = [0, 128], sizes = [8, 128], strides = [1, 1]} : vector<8x512xf32> to vector<8x128xf32>
    %cst_46 = arith.constant 5.000000e-01 : f32
    %128 = vector.broadcast %cst_46 : f32 to vector<8x128xf32>
    %129 = arith.mulf %128, %127 : vector<8x128xf32>
    %130 = math.tanh %129 : vector<8x128xf32>
    %cst_47 = arith.constant 5.000000e-01 : f32
    %131 = vector.broadcast %cst_47 : f32 to vector<8x128xf32>
    %132 = arith.mulf %131, %130 : vector<8x128xf32>
    %cst_48 = arith.constant 5.000000e-01 : f32
    %133 = vector.broadcast %cst_48 : f32 to vector<8x128xf32>
    %134 = arith.addf %132, %133 : vector<8x128xf32>
    %135 = vector.extract_strided_slice %118 {offsets = [0, 256], sizes = [8, 128], strides = [1, 1]} : vector<8x512xf32> to vector<8x128xf32>
    %136 = math.tanh %135 : vector<8x128xf32>
    %137 = vector.extract_strided_slice %118 {offsets = [0, 384], sizes = [8, 128], strides = [1, 1]} : vector<8x512xf32> to vector<8x128xf32>
    %cst_49 = arith.constant 5.000000e-01 : f32
    %138 = vector.broadcast %cst_49 : f32 to vector<8x128xf32>
    %139 = arith.mulf %138, %137 : vector<8x128xf32>
    %140 = math.tanh %139 : vector<8x128xf32>
    %cst_50 = arith.constant 5.000000e-01 : f32
    %141 = vector.broadcast %cst_50 : f32 to vector<8x128xf32>
    %142 = arith.mulf %141, %140 : vector<8x128xf32>
    %cst_51 = arith.constant 5.000000e-01 : f32
    %143 = vector.broadcast %cst_51 : f32 to vector<8x128xf32>
    %144 = arith.addf %142, %143 : vector<8x128xf32>
    %145 = arith.mulf %134, %105 : vector<8x128xf32>
    %146 = arith.mulf %126, %136 : vector<8x128xf32>
    %147 = arith.addf %145, %146 : vector<8x128xf32>
    %148 = math.tanh %147 : vector<8x128xf32>
    %149 = arith.mulf %144, %148 : vector<8x128xf32>
    %150 = arith.addi %5, %c2_i32 : i32
    %151 = vector.broadcast %150 : i32 to vector<8x1xi32>
    %152 = arith.cmpi slt, %151, %3 : vector<8x1xi32>
    %153 = vector.shape_cast %152 : vector<8x1xi1> to vector<8x1xi1>
    %154 = vector.broadcast %153 : vector<8x1xi1> to vector<8x128xi1>
    %155 = arith.select %154, %149, %102 : vector<8x128xi1>, vector<8x128xf32>
    %156 = vector.shape_cast %152 : vector<8x1xi1> to vector<8x1xi1>
    %157 = vector.broadcast %156 : vector<8x1xi1> to vector<8x128xi1>
    %158 = arith.select %157, %147, %105 : vector<8x128xi1>, vector<8x128xf32>
    %159 = arith.index_cast %c2_i32 : i32 to index
    %c0_52 = arith.constant 0 : index
    %c0_53 = arith.constant 0 : index
    %160 = vector.load %arg9[%159, %c0_52, %c0_53] : memref<8x8x128xf32, #tpu.memory_space<vmem>>, vector<1x8x128xf32>
    %161 = vector.shape_cast %160 : vector<1x8x128xf32> to vector<8x128xf32>
    %162 = vector.shape_cast %155 : vector<8x128xf32> to vector<1x8x128xf32>
    tpu.vector_store %arg9[%159, %c0_52, %c0_53], %162 {strides = array<i32>} : memref<8x8x128xf32, #tpu.memory_space<vmem>>, vector<1x8x128xf32>,
    %163 = arith.index_cast %c2_i32 : i32 to index
    %c0_54 = arith.constant 0 : index
    %c0_55 = arith.constant 0 : index
    %164 = vector.load %arg10[%163, %c0_54, %c0_55] : memref<8x8x128xf32, #tpu.memory_space<vmem>>, vector<1x8x128xf32>
    %165 = vector.shape_cast %164 : vector<1x8x128xf32> to vector<8x128xf32>
    %166 = vector.shape_cast %158 : vector<8x128xf32> to vector<1x8x128xf32>
    tpu.vector_store %arg10[%163, %c0_54, %c0_55], %166 {strides = array<i32>} : memref<8x8x128xf32, #tpu.memory_space<vmem>>, vector<1x8x128xf32>,
    %c3_i32 = arith.constant 3 : i32
    %167 = arith.index_cast %c3_i32 : i32 to index
    %c0_56 = arith.constant 0 : index
    %c0_57 = arith.constant 0 : index
    %168 = vector.load %arg2[%167, %c0_56, %c0_57] : memref<8x8x512xf32, #tpu.memory_space<vmem>>, vector<1x8x512xf32>
    %169 = vector.shape_cast %168 : vector<1x8x512xf32> to vector<8x512xf32>
    %cst_58 = arith.constant dense<0.000000e+00> : vector<8x512xf32>
    %170 = tpu.matmul %155, %4, %cst_58 {dimension_numbers = #tpu.dot_dimension_numbers<[1], [0], [0], [1], [0, 0, 1, 1], [], []>} : vector<8x128xf32>, vector<128x512xf32>, vector<8x512xf32> -> vector<8x512xf32>
    %171 = arith.addf %169, %170 : vector<8x512xf32>
    %172 = vector.extract_strided_slice %171 {offsets = [0, 0], sizes = [8, 128], strides = [1, 1]} : vector<8x512xf32> to vector<8x128xf32>
    %cst_59 = arith.constant 5.000000e-01 : f32
    %173 = vector.broadcast %cst_59 : f32 to vector<8x128xf32>
    %174 = arith.mulf %173, %172 : vector<8x128xf32>
    %175 = math.tanh %174 : vector<8x128xf32>
    %cst_60 = arith.constant 5.000000e-01 : f32
    %176 = vector.broadcast %cst_60 : f32 to vector<8x128xf32>
    %177 = arith.mulf %176, %175 : vector<8x128xf32>
    %cst_61 = arith.constant 5.000000e-01 : f32
    %178 = vector.broadcast %cst_61 : f32 to vector<8x128xf32>
    %179 = arith.addf %177, %178 : vector<8x128xf32>
    %180 = vector.extract_strided_slice %171 {offsets = [0, 128], sizes = [8, 128], strides = [1, 1]} : vector<8x512xf32> to vector<8x128xf32>
    %cst_62 = arith.constant 5.000000e-01 : f32
    %181 = vector.broadcast %cst_62 : f32 to vector<8x128xf32>
    %182 = arith.mulf %181, %180 : vector<8x128xf32>
    %183 = math.tanh %182 : vector<8x128xf32>
    %cst_63 = arith.constant 5.000000e-01 : f32
    %184 = vector.broadcast %cst_63 : f32 to vector<8x128xf32>
    %185 = arith.mulf %184, %183 : vector<8x128xf32>
    %cst_64 = arith.constant 5.000000e-01 : f32
    %186 = vector.broadcast %cst_64 : f32 to vector<8x128xf32>
    %187 = arith.addf %185, %186 : vector<8x128xf32>
    %188 = vector.extract_strided_slice %171 {offsets = [0, 256], sizes = [8, 128], strides = [1, 1]} : vector<8x512xf32> to vector<8x128xf32>
    %189 = math.tanh %188 : vector<8x128xf32>
    %190 = vector.extract_strided_slice %171 {offsets = [0, 384], sizes = [8, 128], strides = [1, 1]} : vector<8x512xf32> to vector<8x128xf32>
    %cst_65 = arith.constant 5.000000e-01 : f32
    %191 = vector.broadcast %cst_65 : f32 to vector<8x128xf32>
    %192 = arith.mulf %191, %190 : vector<8x128xf32>
    %193 = math.tanh %192 : vector<8x128xf32>
    %cst_66 = arith.constant 5.000000e-01 : f32
    %194 = vector.broadcast %cst_66 : f32 to vector<8x128xf32>
    %195 = arith.mulf %194, %193 : vector<8x128xf32>
    %cst_67 = arith.constant 5.000000e-01 : f32
    %196 = vector.broadcast %cst_67 : f32 to vector<8x128xf32>
    %197 = arith.addf %195, %196 : vector<8x128xf32>
    %198 = arith.mulf %187, %158 : vector<8x128xf32>
    %199 = arith.mulf %179, %189 : vector<8x128xf32>
    %200 = arith.addf %198, %199 : vector<8x128xf32>
    %201 = math.tanh %200 : vector<8x128xf32>
    %202 = arith.mulf %197, %201 : vector<8x128xf32>
    %203 = arith.addi %5, %c3_i32 : i32
    %204 = vector.broadcast %203 : i32 to vector<8x1xi32>
    %205 = arith.cmpi slt, %204, %3 : vector<8x1xi32>
    %206 = vector.shape_cast %205 : vector<8x1xi1> to vector<8x1xi1>
    %207 = vector.broadcast %206 : vector<8x1xi1> to vector<8x128xi1>
    %208 = arith.select %207, %202, %155 : vector<8x128xi1>, vector<8x128xf32>
    %209 = vector.shape_cast %205 : vector<8x1xi1> to vector<8x1xi1>
    %210 = vector.broadcast %209 : vector<8x1xi1> to vector<8x128xi1>
    %211 = arith.select %210, %200, %158 : vector<8x128xi1>, vector<8x128xf32>
    %212 = arith.index_cast %c3_i32 : i32 to index
    %c0_68 = arith.constant 0 : index
    %c0_69 = arith.constant 0 : index
    %213 = vector.load %arg9[%212, %c0_68, %c0_69] : memref<8x8x128xf32, #tpu.memory_space<vmem>>, vector<1x8x128xf32>
    %214 = vector.shape_cast %213 : vector<1x8x128xf32> to vector<8x128xf32>
    %215 = vector.shape_cast %208 : vector<8x128xf32> to vector<1x8x128xf32>
    tpu.vector_store %arg9[%212, %c0_68, %c0_69], %215 {strides = array<i32>} : memref<8x8x128xf32, #tpu.memory_space<vmem>>, vector<1x8x128xf32>,
    %216 = arith.index_cast %c3_i32 : i32 to index
    %c0_70 = arith.constant 0 : index
    %c0_71 = arith.constant 0 : index
    %217 = vector.load %arg10[%216, %c0_70, %c0_71] : memref<8x8x128xf32, #tpu.memory_space<vmem>>, vector<1x8x128xf32>
    %218 = vector.shape_cast %217 : vector<1x8x128xf32> to vector<8x128xf32>
    %219 = vector.shape_cast %211 : vector<8x128xf32> to vector<1x8x128xf32>
    tpu.vector_store %arg10[%216, %c0_70, %c0_71], %219 {strides = array<i32>} : memref<8x8x128xf32, #tpu.memory_space<vmem>>, vector<1x8x128xf32>,
    %c4_i32 = arith.constant 4 : i32
    %220 = arith.index_cast %c4_i32 : i32 to index
    %c0_72 = arith.constant 0 : index
    %c0_73 = arith.constant 0 : index
    %221 = vector.load %arg2[%220, %c0_72, %c0_73] : memref<8x8x512xf32, #tpu.memory_space<vmem>>, vector<1x8x512xf32>
    %222 = vector.shape_cast %221 : vector<1x8x512xf32> to vector<8x512xf32>
    %cst_74 = arith.constant dense<0.000000e+00> : vector<8x512xf32>
    %223 = tpu.matmul %208, %4, %cst_74 {dimension_numbers = #tpu.dot_dimension_numbers<[1], [0], [0], [1], [0, 0, 1, 1], [], []>} : vector<8x128xf32>, vector<128x512xf32>, vector<8x512xf32> -> vector<8x512xf32>
    %224 = arith.addf %222, %223 : vector<8x512xf32>
    %225 = vector.extract_strided_slice %224 {offsets = [0, 0], sizes = [8, 128], strides = [1, 1]} : vector<8x512xf32> to vector<8x128xf32>
    %cst_75 = arith.constant 5.000000e-01 : f32
    %226 = vector.broadcast %cst_75 : f32 to vector<8x128xf32>
    %227 = arith.mulf %226, %225 : vector<8x128xf32>
    %228 = math.tanh %227 : vector<8x128xf32>
    %cst_76 = arith.constant 5.000000e-01 : f32
    %229 = vector.broadcast %cst_76 : f32 to vector<8x128xf32>
    %230 = arith.mulf %229, %228 : vector<8x128xf32>
    %cst_77 = arith.constant 5.000000e-01 : f32
    %231 = vector.broadcast %cst_77 : f32 to vector<8x128xf32>
    %232 = arith.addf %230, %231 : vector<8x128xf32>
    %233 = vector.extract_strided_slice %224 {offsets = [0, 128], sizes = [8, 128], strides = [1, 1]} : vector<8x512xf32> to vector<8x128xf32>
    %cst_78 = arith.constant 5.000000e-01 : f32
    %234 = vector.broadcast %cst_78 : f32 to vector<8x128xf32>
    %235 = arith.mulf %234, %233 : vector<8x128xf32>
    %236 = math.tanh %235 : vector<8x128xf32>
    %cst_79 = arith.constant 5.000000e-01 : f32
    %237 = vector.broadcast %cst_79 : f32 to vector<8x128xf32>
    %238 = arith.mulf %237, %236 : vector<8x128xf32>
    %cst_80 = arith.constant 5.000000e-01 : f32
    %239 = vector.broadcast %cst_80 : f32 to vector<8x128xf32>
    %240 = arith.addf %238, %239 : vector<8x128xf32>
    %241 = vector.extract_strided_slice %224 {offsets = [0, 256], sizes = [8, 128], strides = [1, 1]} : vector<8x512xf32> to vector<8x128xf32>
    %242 = math.tanh %241 : vector<8x128xf32>
    %243 = vector.extract_strided_slice %224 {offsets = [0, 384], sizes = [8, 128], strides = [1, 1]} : vector<8x512xf32> to vector<8x128xf32>
    %cst_81 = arith.constant 5.000000e-01 : f32
    %244 = vector.broadcast %cst_81 : f32 to vector<8x128xf32>
    %245 = arith.mulf %244, %243 : vector<8x128xf32>
    %246 = math.tanh %245 : vector<8x128xf32>
    %cst_82 = arith.constant 5.000000e-01 : f32
    %247 = vector.broadcast %cst_82 : f32 to vector<8x128xf32>
    %248 = arith.mulf %247, %246 : vector<8x128xf32>
    %cst_83 = arith.constant 5.000000e-01 : f32
    %249 = vector.broadcast %cst_83 : f32 to vector<8x128xf32>
    %250 = arith.addf %248, %249 : vector<8x128xf32>
    %251 = arith.mulf %240, %211 : vector<8x128xf32>
    %252 = arith.mulf %232, %242 : vector<8x128xf32>
    %253 = arith.addf %251, %252 : vector<8x128xf32>
    %254 = math.tanh %253 : vector<8x128xf32>
    %255 = arith.mulf %250, %254 : vector<8x128xf32>
    %256 = arith.addi %5, %c4_i32 : i32
    %257 = vector.broadcast %256 : i32 to vector<8x1xi32>
    %258 = arith.cmpi slt, %257, %3 : vector<8x1xi32>
    %259 = vector.shape_cast %258 : vector<8x1xi1> to vector<8x1xi1>
    %260 = vector.broadcast %259 : vector<8x1xi1> to vector<8x128xi1>
    %261 = arith.select %260, %255, %208 : vector<8x128xi1>, vector<8x128xf32>
    %262 = vector.shape_cast %258 : vector<8x1xi1> to vector<8x1xi1>
    %263 = vector.broadcast %262 : vector<8x1xi1> to vector<8x128xi1>
    %264 = arith.select %263, %253, %211 : vector<8x128xi1>, vector<8x128xf32>
    %265 = arith.index_cast %c4_i32 : i32 to index
    %c0_84 = arith.constant 0 : index
    %c0_85 = arith.constant 0 : index
    %266 = vector.load %arg9[%265, %c0_84, %c0_85] : memref<8x8x128xf32, #tpu.memory_space<vmem>>, vector<1x8x128xf32>
    %267 = vector.shape_cast %266 : vector<1x8x128xf32> to vector<8x128xf32>
    %268 = vector.shape_cast %261 : vector<8x128xf32> to vector<1x8x128xf32>
    tpu.vector_store %arg9[%265, %c0_84, %c0_85], %268 {strides = array<i32>} : memref<8x8x128xf32, #tpu.memory_space<vmem>>, vector<1x8x128xf32>,
    %269 = arith.index_cast %c4_i32 : i32 to index
    %c0_86 = arith.constant 0 : index
    %c0_87 = arith.constant 0 : index
    %270 = vector.load %arg10[%269, %c0_86, %c0_87] : memref<8x8x128xf32, #tpu.memory_space<vmem>>, vector<1x8x128xf32>
    %271 = vector.shape_cast %270 : vector<1x8x128xf32> to vector<8x128xf32>
    %272 = vector.shape_cast %264 : vector<8x128xf32> to vector<1x8x128xf32>
    tpu.vector_store %arg10[%269, %c0_86, %c0_87], %272 {strides = array<i32>} : memref<8x8x128xf32, #tpu.memory_space<vmem>>, vector<1x8x128xf32>,
    %c5_i32 = arith.constant 5 : i32
    %273 = arith.index_cast %c5_i32 : i32 to index
    %c0_88 = arith.constant 0 : index
    %c0_89 = arith.constant 0 : index
    %274 = vector.load %arg2[%273, %c0_88, %c0_89] : memref<8x8x512xf32, #tpu.memory_space<vmem>>, vector<1x8x512xf32>
    %275 = vector.shape_cast %274 : vector<1x8x512xf32> to vector<8x512xf32>
    %cst_90 = arith.constant dense<0.000000e+00> : vector<8x512xf32>
    %276 = tpu.matmul %261, %4, %cst_90 {dimension_numbers = #tpu.dot_dimension_numbers<[1], [0], [0], [1], [0, 0, 1, 1], [], []>} : vector<8x128xf32>, vector<128x512xf32>, vector<8x512xf32> -> vector<8x512xf32>
    %277 = arith.addf %275, %276 : vector<8x512xf32>
    %278 = vector.extract_strided_slice %277 {offsets = [0, 0], sizes = [8, 128], strides = [1, 1]} : vector<8x512xf32> to vector<8x128xf32>
    %cst_91 = arith.constant 5.000000e-01 : f32
    %279 = vector.broadcast %cst_91 : f32 to vector<8x128xf32>
    %280 = arith.mulf %279, %278 : vector<8x128xf32>
    %281 = math.tanh %280 : vector<8x128xf32>
    %cst_92 = arith.constant 5.000000e-01 : f32
    %282 = vector.broadcast %cst_92 : f32 to vector<8x128xf32>
    %283 = arith.mulf %282, %281 : vector<8x128xf32>
    %cst_93 = arith.constant 5.000000e-01 : f32
    %284 = vector.broadcast %cst_93 : f32 to vector<8x128xf32>
    %285 = arith.addf %283, %284 : vector<8x128xf32>
    %286 = vector.extract_strided_slice %277 {offsets = [0, 128], sizes = [8, 128], strides = [1, 1]} : vector<8x512xf32> to vector<8x128xf32>
    %cst_94 = arith.constant 5.000000e-01 : f32
    %287 = vector.broadcast %cst_94 : f32 to vector<8x128xf32>
    %288 = arith.mulf %287, %286 : vector<8x128xf32>
    %289 = math.tanh %288 : vector<8x128xf32>
    %cst_95 = arith.constant 5.000000e-01 : f32
    %290 = vector.broadcast %cst_95 : f32 to vector<8x128xf32>
    %291 = arith.mulf %290, %289 : vector<8x128xf32>
    %cst_96 = arith.constant 5.000000e-01 : f32
    %292 = vector.broadcast %cst_96 : f32 to vector<8x128xf32>
    %293 = arith.addf %291, %292 : vector<8x128xf32>
    %294 = vector.extract_strided_slice %277 {offsets = [0, 256], sizes = [8, 128], strides = [1, 1]} : vector<8x512xf32> to vector<8x128xf32>
    %295 = math.tanh %294 : vector<8x128xf32>
    %296 = vector.extract_strided_slice %277 {offsets = [0, 384], sizes = [8, 128], strides = [1, 1]} : vector<8x512xf32> to vector<8x128xf32>
    %cst_97 = arith.constant 5.000000e-01 : f32
    %297 = vector.broadcast %cst_97 : f32 to vector<8x128xf32>
    %298 = arith.mulf %297, %296 : vector<8x128xf32>
    %299 = math.tanh %298 : vector<8x128xf32>
    %cst_98 = arith.constant 5.000000e-01 : f32
    %300 = vector.broadcast %cst_98 : f32 to vector<8x128xf32>
    %301 = arith.mulf %300, %299 : vector<8x128xf32>
    %cst_99 = arith.constant 5.000000e-01 : f32
    %302 = vector.broadcast %cst_99 : f32 to vector<8x128xf32>
    %303 = arith.addf %301, %302 : vector<8x128xf32>
    %304 = arith.mulf %293, %264 : vector<8x128xf32>
    %305 = arith.mulf %285, %295 : vector<8x128xf32>
    %306 = arith.addf %304, %305 : vector<8x128xf32>
    %307 = math.tanh %306 : vector<8x128xf32>
    %308 = arith.mulf %303, %307 : vector<8x128xf32>
    %309 = arith.addi %5, %c5_i32 : i32
    %310 = vector.broadcast %309 : i32 to vector<8x1xi32>
    %311 = arith.cmpi slt, %310, %3 : vector<8x1xi32>
    %312 = vector.shape_cast %311 : vector<8x1xi1> to vector<8x1xi1>
    %313 = vector.broadcast %312 : vector<8x1xi1> to vector<8x128xi1>
    %314 = arith.select %313, %308, %261 : vector<8x128xi1>, vector<8x128xf32>
    %315 = vector.shape_cast %311 : vector<8x1xi1> to vector<8x1xi1>
    %316 = vector.broadcast %315 : vector<8x1xi1> to vector<8x128xi1>
    %317 = arith.select %316, %306, %264 : vector<8x128xi1>, vector<8x128xf32>
    %318 = arith.index_cast %c5_i32 : i32 to index
    %c0_100 = arith.constant 0 : index
    %c0_101 = arith.constant 0 : index
    %319 = vector.load %arg9[%318, %c0_100, %c0_101] : memref<8x8x128xf32, #tpu.memory_space<vmem>>, vector<1x8x128xf32>
    %320 = vector.shape_cast %319 : vector<1x8x128xf32> to vector<8x128xf32>
    %321 = vector.shape_cast %314 : vector<8x128xf32> to vector<1x8x128xf32>
    tpu.vector_store %arg9[%318, %c0_100, %c0_101], %321 {strides = array<i32>} : memref<8x8x128xf32, #tpu.memory_space<vmem>>, vector<1x8x128xf32>,
    %322 = arith.index_cast %c5_i32 : i32 to index
    %c0_102 = arith.constant 0 : index
    %c0_103 = arith.constant 0 : index
    %323 = vector.load %arg10[%322, %c0_102, %c0_103] : memref<8x8x128xf32, #tpu.memory_space<vmem>>, vector<1x8x128xf32>
    %324 = vector.shape_cast %323 : vector<1x8x128xf32> to vector<8x128xf32>
    %325 = vector.shape_cast %317 : vector<8x128xf32> to vector<1x8x128xf32>
    tpu.vector_store %arg10[%322, %c0_102, %c0_103], %325 {strides = array<i32>} : memref<8x8x128xf32, #tpu.memory_space<vmem>>, vector<1x8x128xf32>,
    %c6_i32 = arith.constant 6 : i32
    %326 = arith.index_cast %c6_i32 : i32 to index
    %c0_104 = arith.constant 0 : index
    %c0_105 = arith.constant 0 : index
    %327 = vector.load %arg2[%326, %c0_104, %c0_105] : memref<8x8x512xf32, #tpu.memory_space<vmem>>, vector<1x8x512xf32>
    %328 = vector.shape_cast %327 : vector<1x8x512xf32> to vector<8x512xf32>
    %cst_106 = arith.constant dense<0.000000e+00> : vector<8x512xf32>
    %329 = tpu.matmul %314, %4, %cst_106 {dimension_numbers = #tpu.dot_dimension_numbers<[1], [0], [0], [1], [0, 0, 1, 1], [], []>} : vector<8x128xf32>, vector<128x512xf32>, vector<8x512xf32> -> vector<8x512xf32>
    %330 = arith.addf %328, %329 : vector<8x512xf32>
    %331 = vector.extract_strided_slice %330 {offsets = [0, 0], sizes = [8, 128], strides = [1, 1]} : vector<8x512xf32> to vector<8x128xf32>
    %cst_107 = arith.constant 5.000000e-01 : f32
    %332 = vector.broadcast %cst_107 : f32 to vector<8x128xf32>
    %333 = arith.mulf %332, %331 : vector<8x128xf32>
    %334 = math.tanh %333 : vector<8x128xf32>
    %cst_108 = arith.constant 5.000000e-01 : f32
    %335 = vector.broadcast %cst_108 : f32 to vector<8x128xf32>
    %336 = arith.mulf %335, %334 : vector<8x128xf32>
    %cst_109 = arith.constant 5.000000e-01 : f32
    %337 = vector.broadcast %cst_109 : f32 to vector<8x128xf32>
    %338 = arith.addf %336, %337 : vector<8x128xf32>
    %339 = vector.extract_strided_slice %330 {offsets = [0, 128], sizes = [8, 128], strides = [1, 1]} : vector<8x512xf32> to vector<8x128xf32>
    %cst_110 = arith.constant 5.000000e-01 : f32
    %340 = vector.broadcast %cst_110 : f32 to vector<8x128xf32>
    %341 = arith.mulf %340, %339 : vector<8x128xf32>
    %342 = math.tanh %341 : vector<8x128xf32>
    %cst_111 = arith.constant 5.000000e-01 : f32
    %343 = vector.broadcast %cst_111 : f32 to vector<8x128xf32>
    %344 = arith.mulf %343, %342 : vector<8x128xf32>
    %cst_112 = arith.constant 5.000000e-01 : f32
    %345 = vector.broadcast %cst_112 : f32 to vector<8x128xf32>
    %346 = arith.addf %344, %345 : vector<8x128xf32>
    %347 = vector.extract_strided_slice %330 {offsets = [0, 256], sizes = [8, 128], strides = [1, 1]} : vector<8x512xf32> to vector<8x128xf32>
    %348 = math.tanh %347 : vector<8x128xf32>
    %349 = vector.extract_strided_slice %330 {offsets = [0, 384], sizes = [8, 128], strides = [1, 1]} : vector<8x512xf32> to vector<8x128xf32>
    %cst_113 = arith.constant 5.000000e-01 : f32
    %350 = vector.broadcast %cst_113 : f32 to vector<8x128xf32>
    %351 = arith.mulf %350, %349 : vector<8x128xf32>
    %352 = math.tanh %351 : vector<8x128xf32>
    %cst_114 = arith.constant 5.000000e-01 : f32
    %353 = vector.broadcast %cst_114 : f32 to vector<8x128xf32>
    %354 = arith.mulf %353, %352 : vector<8x128xf32>
    %cst_115 = arith.constant 5.000000e-01 : f32
    %355 = vector.broadcast %cst_115 : f32 to vector<8x128xf32>
    %356 = arith.addf %354, %355 : vector<8x128xf32>
    %357 = arith.mulf %346, %317 : vector<8x128xf32>
    %358 = arith.mulf %338, %348 : vector<8x128xf32>
    %359 = arith.addf %357, %358 : vector<8x128xf32>
    %360 = math.tanh %359 : vector<8x128xf32>
    %361 = arith.mulf %356, %360 : vector<8x128xf32>
    %362 = arith.addi %5, %c6_i32 : i32
    %363 = vector.broadcast %362 : i32 to vector<8x1xi32>
    %364 = arith.cmpi slt, %363, %3 : vector<8x1xi32>
    %365 = vector.shape_cast %364 : vector<8x1xi1> to vector<8x1xi1>
    %366 = vector.broadcast %365 : vector<8x1xi1> to vector<8x128xi1>
    %367 = arith.select %366, %361, %314 : vector<8x128xi1>, vector<8x128xf32>
    %368 = vector.shape_cast %364 : vector<8x1xi1> to vector<8x1xi1>
    %369 = vector.broadcast %368 : vector<8x1xi1> to vector<8x128xi1>
    %370 = arith.select %369, %359, %317 : vector<8x128xi1>, vector<8x128xf32>
    %371 = arith.index_cast %c6_i32 : i32 to index
    %c0_116 = arith.constant 0 : index
    %c0_117 = arith.constant 0 : index
    %372 = vector.load %arg9[%371, %c0_116, %c0_117] : memref<8x8x128xf32, #tpu.memory_space<vmem>>, vector<1x8x128xf32>
    %373 = vector.shape_cast %372 : vector<1x8x128xf32> to vector<8x128xf32>
    %374 = vector.shape_cast %367 : vector<8x128xf32> to vector<1x8x128xf32>
    tpu.vector_store %arg9[%371, %c0_116, %c0_117], %374 {strides = array<i32>} : memref<8x8x128xf32, #tpu.memory_space<vmem>>, vector<1x8x128xf32>,
    %375 = arith.index_cast %c6_i32 : i32 to index
    %c0_118 = arith.constant 0 : index
    %c0_119 = arith.constant 0 : index
    %376 = vector.load %arg10[%375, %c0_118, %c0_119] : memref<8x8x128xf32, #tpu.memory_space<vmem>>, vector<1x8x128xf32>
    %377 = vector.shape_cast %376 : vector<1x8x128xf32> to vector<8x128xf32>
    %378 = vector.shape_cast %370 : vector<8x128xf32> to vector<1x8x128xf32>
    tpu.vector_store %arg10[%375, %c0_118, %c0_119], %378 {strides = array<i32>} : memref<8x8x128xf32, #tpu.memory_space<vmem>>, vector<1x8x128xf32>,
    %c7_i32 = arith.constant 7 : i32
    %379 = arith.index_cast %c7_i32 : i32 to index
    %c0_120 = arith.constant 0 : index
    %c0_121 = arith.constant 0 : index
    %380 = vector.load %arg2[%379, %c0_120, %c0_121] : memref<8x8x512xf32, #tpu.memory_space<vmem>>, vector<1x8x512xf32>
    %381 = vector.shape_cast %380 : vector<1x8x512xf32> to vector<8x512xf32>
    %cst_122 = arith.constant dense<0.000000e+00> : vector<8x512xf32>
    %382 = tpu.matmul %367, %4, %cst_122 {dimension_numbers = #tpu.dot_dimension_numbers<[1], [0], [0], [1], [0, 0, 1, 1], [], []>} : vector<8x128xf32>, vector<128x512xf32>, vector<8x512xf32> -> vector<8x512xf32>
    %383 = arith.addf %381, %382 : vector<8x512xf32>
    %384 = vector.extract_strided_slice %383 {offsets = [0, 0], sizes = [8, 128], strides = [1, 1]} : vector<8x512xf32> to vector<8x128xf32>
    %cst_123 = arith.constant 5.000000e-01 : f32
    %385 = vector.broadcast %cst_123 : f32 to vector<8x128xf32>
    %386 = arith.mulf %385, %384 : vector<8x128xf32>
    %387 = math.tanh %386 : vector<8x128xf32>
    %cst_124 = arith.constant 5.000000e-01 : f32
    %388 = vector.broadcast %cst_124 : f32 to vector<8x128xf32>
    %389 = arith.mulf %388, %387 : vector<8x128xf32>
    %cst_125 = arith.constant 5.000000e-01 : f32
    %390 = vector.broadcast %cst_125 : f32 to vector<8x128xf32>
    %391 = arith.addf %389, %390 : vector<8x128xf32>
    %392 = vector.extract_strided_slice %383 {offsets = [0, 128], sizes = [8, 128], strides = [1, 1]} : vector<8x512xf32> to vector<8x128xf32>
    %cst_126 = arith.constant 5.000000e-01 : f32
    %393 = vector.broadcast %cst_126 : f32 to vector<8x128xf32>
    %394 = arith.mulf %393, %392 : vector<8x128xf32>
    %395 = math.tanh %394 : vector<8x128xf32>
    %cst_127 = arith.constant 5.000000e-01 : f32
    %396 = vector.broadcast %cst_127 : f32 to vector<8x128xf32>
    %397 = arith.mulf %396, %395 : vector<8x128xf32>
    %cst_128 = arith.constant 5.000000e-01 : f32
    %398 = vector.broadcast %cst_128 : f32 to vector<8x128xf32>
    %399 = arith.addf %397, %398 : vector<8x128xf32>
    %400 = vector.extract_strided_slice %383 {offsets = [0, 256], sizes = [8, 128], strides = [1, 1]} : vector<8x512xf32> to vector<8x128xf32>
    %401 = math.tanh %400 : vector<8x128xf32>
    %402 = vector.extract_strided_slice %383 {offsets = [0, 384], sizes = [8, 128], strides = [1, 1]} : vector<8x512xf32> to vector<8x128xf32>
    %cst_129 = arith.constant 5.000000e-01 : f32
    %403 = vector.broadcast %cst_129 : f32 to vector<8x128xf32>
    %404 = arith.mulf %403, %402 : vector<8x128xf32>
    %405 = math.tanh %404 : vector<8x128xf32>
    %cst_130 = arith.constant 5.000000e-01 : f32
    %406 = vector.broadcast %cst_130 : f32 to vector<8x128xf32>
    %407 = arith.mulf %406, %405 : vector<8x128xf32>
    %cst_131 = arith.constant 5.000000e-01 : f32
    %408 = vector.broadcast %cst_131 : f32 to vector<8x128xf32>
    %409 = arith.addf %407, %408 : vector<8x128xf32>
    %410 = arith.mulf %399, %370 : vector<8x128xf32>
    %411 = arith.mulf %391, %401 : vector<8x128xf32>
    %412 = arith.addf %410, %411 : vector<8x128xf32>
    %413 = math.tanh %412 : vector<8x128xf32>
    %414 = arith.mulf %409, %413 : vector<8x128xf32>
    %415 = arith.addi %5, %c7_i32 : i32
    %416 = vector.broadcast %415 : i32 to vector<8x1xi32>
    %417 = arith.cmpi slt, %416, %3 : vector<8x1xi32>
    %418 = vector.shape_cast %417 : vector<8x1xi1> to vector<8x1xi1>
    %419 = vector.broadcast %418 : vector<8x1xi1> to vector<8x128xi1>
    %420 = arith.select %419, %414, %367 : vector<8x128xi1>, vector<8x128xf32>
    %421 = vector.shape_cast %417 : vector<8x1xi1> to vector<8x1xi1>
    %422 = vector.broadcast %421 : vector<8x1xi1> to vector<8x128xi1>
    %423 = arith.select %422, %412, %370 : vector<8x128xi1>, vector<8x128xf32>
    %424 = arith.index_cast %c7_i32 : i32 to index
    %c0_132 = arith.constant 0 : index
    %c0_133 = arith.constant 0 : index
    %425 = vector.load %arg9[%424, %c0_132, %c0_133] : memref<8x8x128xf32, #tpu.memory_space<vmem>>, vector<1x8x128xf32>
    %426 = vector.shape_cast %425 : vector<1x8x128xf32> to vector<8x128xf32>
    %427 = vector.shape_cast %420 : vector<8x128xf32> to vector<1x8x128xf32>
    tpu.vector_store %arg9[%424, %c0_132, %c0_133], %427 {strides = array<i32>} : memref<8x8x128xf32, #tpu.memory_space<vmem>>, vector<1x8x128xf32>,
    %428 = arith.index_cast %c7_i32 : i32 to index
    %c0_134 = arith.constant 0 : index
    %c0_135 = arith.constant 0 : index
    %429 = vector.load %arg10[%428, %c0_134, %c0_135] : memref<8x8x128xf32, #tpu.memory_space<vmem>>, vector<1x8x128xf32>
    %430 = vector.shape_cast %429 : vector<1x8x128xf32> to vector<8x128xf32>
    %431 = vector.shape_cast %423 : vector<8x128xf32> to vector<1x8x128xf32>
    tpu.vector_store %arg10[%428, %c0_134, %c0_135], %431 {strides = array<i32>} : memref<8x8x128xf32, #tpu.memory_space<vmem>>, vector<1x8x128xf32>,
    %c8_i32_136 = arith.constant 8 : i32
    %c0_137 = arith.constant 0 : index
    %c0_138 = arith.constant 0 : index
    %432 = vector.load %arg7[%c0_137, %c0_138] : memref<8x128xf32, #tpu.memory_space<vmem>>, vector<8x128xf32>
    tpu.vector_store %arg7[%c0_137, %c0_138], %420 {strides = array<i32>} : memref<8x128xf32, #tpu.memory_space<vmem>>, vector<8x128xf32>,
    %c0_139 = arith.constant 0 : index
    %c0_140 = arith.constant 0 : index
    %433 = vector.load %arg8[%c0_139, %c0_140] : memref<8x128xf32, #tpu.memory_space<vmem>>, vector<8x128xf32>
    tpu.vector_store %arg8[%c0_139, %c0_140], %423 {strides = array<i32>} : memref<8x128xf32, #tpu.memory_space<vmem>>, vector<8x128xf32>,
    %c0_141 = arith.constant 0 : index
    %c0_142 = arith.constant 0 : index
    %c0_143 = arith.constant 0 : index
    %434 = vector.load %arg9[%c0_141, %c0_142, %c0_143] : memref<8x8x128xf32, #tpu.memory_space<vmem>>, vector<1x8x128xf32>
    %435 = vector.shape_cast %434 : vector<1x8x128xf32> to vector<8x128xf32>
    %c0_144 = arith.constant 0 : index
    %c0_145 = arith.constant 0 : index
    %c0_146 = arith.constant 0 : index
    %436 = vector.load %arg5[%c0_144, %c0_145, %c0_146] : memref<8x8x128xf32, #tpu.memory_space<vmem>>, vector<8x1x128xf32>
    %437 = vector.shape_cast %436 : vector<8x1x128xf32> to vector<8x128xf32>
    %438 = vector.shape_cast %435 : vector<8x128xf32> to vector<8x1x128xf32>
    tpu.vector_store %arg5[%c0_144, %c0_145, %c0_146], %438 {strides = array<i32>} : memref<8x8x128xf32, #tpu.memory_space<vmem>>, vector<8x1x128xf32>,
    %c0_147 = arith.constant 0 : index
    %c0_148 = arith.constant 0 : index
    %c0_149 = arith.constant 0 : index
    %439 = vector.load %arg10[%c0_147, %c0_148, %c0_149] : memref<8x8x128xf32, #tpu.memory_space<vmem>>, vector<1x8x128xf32>
    %440 = vector.shape_cast %439 : vector<1x8x128xf32> to vector<8x128xf32>
    %c0_150 = arith.constant 0 : index
    %c0_151 = arith.constant 0 : index
    %c0_152 = arith.constant 0 : index
    %441 = vector.load %arg6[%c0_150, %c0_151, %c0_152] : memref<8x8x128xf32, #tpu.memory_space<vmem>>, vector<8x1x128xf32>
    %442 = vector.shape_cast %441 : vector<8x1x128xf32> to vector<8x128xf32>
    %443 = vector.shape_cast %440 : vector<8x128xf32> to vector<8x1x128xf32>
    tpu.vector_store %arg6[%c0_150, %c0_151, %c0_152], %443 {strides = array<i32>} : memref<8x8x128xf32, #tpu.memory_space<vmem>>, vector<8x1x128xf32>,
    %c1 = arith.constant 1 : index
    %c0_153 = arith.constant 0 : index
    %c0_154 = arith.constant 0 : index
    %444 = vector.load %arg9[%c1, %c0_153, %c0_154] : memref<8x8x128xf32, #tpu.memory_space<vmem>>, vector<1x8x128xf32>
    %445 = vector.shape_cast %444 : vector<1x8x128xf32> to vector<8x128xf32>
    %c0_155 = arith.constant 0 : index
    %c1_156 = arith.constant 1 : index
    %c0_157 = arith.constant 0 : index
    %446 = vector.load %arg5[%c0_155, %c1_156, %c0_157] : memref<8x8x128xf32, #tpu.memory_space<vmem>>, vector<8x1x128xf32>
    %447 = vector.shape_cast %446 : vector<8x1x128xf32> to vector<8x128xf32>
    %448 = vector.shape_cast %445 : vector<8x128xf32> to vector<8x1x128xf32>
    tpu.vector_store %arg5[%c0_155, %c1_156, %c0_157], %448 {strides = array<i32>} : memref<8x8x128xf32, #tpu.memory_space<vmem>>, vector<8x1x128xf32>,
    %c1_158 = arith.constant 1 : index
    %c0_159 = arith.constant 0 : index
    %c0_160 = arith.constant 0 : index
    %449 = vector.load %arg10[%c1_158, %c0_159, %c0_160] : memref<8x8x128xf32, #tpu.memory_space<vmem>>, vector<1x8x128xf32>
    %450 = vector.shape_cast %449 : vector<1x8x128xf32> to vector<8x128xf32>
    %c0_161 = arith.constant 0 : index
    %c1_162 = arith.constant 1 : index
    %c0_163 = arith.constant 0 : index
    %451 = vector.load %arg6[%c0_161, %c1_162, %c0_163] : memref<8x8x128xf32, #tpu.memory_space<vmem>>, vector<8x1x128xf32>
    %452 = vector.shape_cast %451 : vector<8x1x128xf32> to vector<8x128xf32>
    %453 = vector.shape_cast %450 : vector<8x128xf32> to vector<8x1x128xf32>
    tpu.vector_store %arg6[%c0_161, %c1_162, %c0_163], %453 {strides = array<i32>} : memref<8x8x128xf32, #tpu.memory_space<vmem>>, vector<8x1x128xf32>,
    %c2 = arith.constant 2 : index
    %c0_164 = arith.constant 0 : index
    %c0_165 = arith.constant 0 : index
    %454 = vector.load %arg9[%c2, %c0_164, %c0_165] : memref<8x8x128xf32, #tpu.memory_space<vmem>>, vector<1x8x128xf32>
    %455 = vector.shape_cast %454 : vector<1x8x128xf32> to vector<8x128xf32>
    %c0_166 = arith.constant 0 : index
    %c2_167 = arith.constant 2 : index
    %c0_168 = arith.constant 0 : index
    %456 = vector.load %arg5[%c0_166, %c2_167, %c0_168] : memref<8x8x128xf32, #tpu.memory_space<vmem>>, vector<8x1x128xf32>
    %457 = vector.shape_cast %456 : vector<8x1x128xf32> to vector<8x128xf32>
    %458 = vector.shape_cast %455 : vector<8x128xf32> to vector<8x1x128xf32>
    tpu.vector_store %arg5[%c0_166, %c2_167, %c0_168], %458 {strides = array<i32>} : memref<8x8x128xf32, #tpu.memory_space<vmem>>, vector<8x1x128xf32>,
    %c2_169 = arith.constant 2 : index
    %c0_170 = arith.constant 0 : index
    %c0_171 = arith.constant 0 : index
    %459 = vector.load %arg10[%c2_169, %c0_170, %c0_171] : memref<8x8x128xf32, #tpu.memory_space<vmem>>, vector<1x8x128xf32>
    %460 = vector.shape_cast %459 : vector<1x8x128xf32> to vector<8x128xf32>
    %c0_172 = arith.constant 0 : index
    %c2_173 = arith.constant 2 : index
    %c0_174 = arith.constant 0 : index
    %461 = vector.load %arg6[%c0_172, %c2_173, %c0_174] : memref<8x8x128xf32, #tpu.memory_space<vmem>>, vector<8x1x128xf32>
    %462 = vector.shape_cast %461 : vector<8x1x128xf32> to vector<8x128xf32>
    %463 = vector.shape_cast %460 : vector<8x128xf32> to vector<8x1x128xf32>
    tpu.vector_store %arg6[%c0_172, %c2_173, %c0_174], %463 {strides = array<i32>} : memref<8x8x128xf32, #tpu.memory_space<vmem>>, vector<8x1x128xf32>,
    %c3 = arith.constant 3 : index
    %c0_175 = arith.constant 0 : index
    %c0_176 = arith.constant 0 : index
    %464 = vector.load %arg9[%c3, %c0_175, %c0_176] : memref<8x8x128xf32, #tpu.memory_space<vmem>>, vector<1x8x128xf32>
    %465 = vector.shape_cast %464 : vector<1x8x128xf32> to vector<8x128xf32>
    %c0_177 = arith.constant 0 : index
    %c3_178 = arith.constant 3 : index
    %c0_179 = arith.constant 0 : index
    %466 = vector.load %arg5[%c0_177, %c3_178, %c0_179] : memref<8x8x128xf32, #tpu.memory_space<vmem>>, vector<8x1x128xf32>
    %467 = vector.shape_cast %466 : vector<8x1x128xf32> to vector<8x128xf32>
    %468 = vector.shape_cast %465 : vector<8x128xf32> to vector<8x1x128xf32>
    tpu.vector_store %arg5[%c0_177, %c3_178, %c0_179], %468 {strides = array<i32>} : memref<8x8x128xf32, #tpu.memory_space<vmem>>, vector<8x1x128xf32>,
    %c3_180 = arith.constant 3 : index
    %c0_181 = arith.constant 0 : index
    %c0_182 = arith.constant 0 : index
    %469 = vector.load %arg10[%c3_180, %c0_181, %c0_182] : memref<8x8x128xf32, #tpu.memory_space<vmem>>, vector<1x8x128xf32>
    %470 = vector.shape_cast %469 : vector<1x8x128xf32> to vector<8x128xf32>
    %c0_183 = arith.constant 0 : index
    %c3_184 = arith.constant 3 : index
    %c0_185 = arith.constant 0 : index
    %471 = vector.load %arg6[%c0_183, %c3_184, %c0_185] : memref<8x8x128xf32, #tpu.memory_space<vmem>>, vector<8x1x128xf32>
    %472 = vector.shape_cast %471 : vector<8x1x128xf32> to vector<8x128xf32>
    %473 = vector.shape_cast %470 : vector<8x128xf32> to vector<8x1x128xf32>
    tpu.vector_store %arg6[%c0_183, %c3_184, %c0_185], %473 {strides = array<i32>} : memref<8x8x128xf32, #tpu.memory_space<vmem>>, vector<8x1x128xf32>,
    %c4 = arith.constant 4 : index
    %c0_186 = arith.constant 0 : index
    %c0_187 = arith.constant 0 : index
    %474 = vector.load %arg9[%c4, %c0_186, %c0_187] : memref<8x8x128xf32, #tpu.memory_space<vmem>>, vector<1x8x128xf32>
    %475 = vector.shape_cast %474 : vector<1x8x128xf32> to vector<8x128xf32>
    %c0_188 = arith.constant 0 : index
    %c4_189 = arith.constant 4 : index
    %c0_190 = arith.constant 0 : index
    %476 = vector.load %arg5[%c0_188, %c4_189, %c0_190] : memref<8x8x128xf32, #tpu.memory_space<vmem>>, vector<8x1x128xf32>
    %477 = vector.shape_cast %476 : vector<8x1x128xf32> to vector<8x128xf32>
    %478 = vector.shape_cast %475 : vector<8x128xf32> to vector<8x1x128xf32>
    tpu.vector_store %arg5[%c0_188, %c4_189, %c0_190], %478 {strides = array<i32>} : memref<8x8x128xf32, #tpu.memory_space<vmem>>, vector<8x1x128xf32>,
    %c4_191 = arith.constant 4 : index
    %c0_192 = arith.constant 0 : index
    %c0_193 = arith.constant 0 : index
    %479 = vector.load %arg10[%c4_191, %c0_192, %c0_193] : memref<8x8x128xf32, #tpu.memory_space<vmem>>, vector<1x8x128xf32>
    %480 = vector.shape_cast %479 : vector<1x8x128xf32> to vector<8x128xf32>
    %c0_194 = arith.constant 0 : index
    %c4_195 = arith.constant 4 : index
    %c0_196 = arith.constant 0 : index
    %481 = vector.load %arg6[%c0_194, %c4_195, %c0_196] : memref<8x8x128xf32, #tpu.memory_space<vmem>>, vector<8x1x128xf32>
    %482 = vector.shape_cast %481 : vector<8x1x128xf32> to vector<8x128xf32>
    %483 = vector.shape_cast %480 : vector<8x128xf32> to vector<8x1x128xf32>
    tpu.vector_store %arg6[%c0_194, %c4_195, %c0_196], %483 {strides = array<i32>} : memref<8x8x128xf32, #tpu.memory_space<vmem>>, vector<8x1x128xf32>,
    %c5 = arith.constant 5 : index
    %c0_197 = arith.constant 0 : index
    %c0_198 = arith.constant 0 : index
    %484 = vector.load %arg9[%c5, %c0_197, %c0_198] : memref<8x8x128xf32, #tpu.memory_space<vmem>>, vector<1x8x128xf32>
    %485 = vector.shape_cast %484 : vector<1x8x128xf32> to vector<8x128xf32>
    %c0_199 = arith.constant 0 : index
    %c5_200 = arith.constant 5 : index
    %c0_201 = arith.constant 0 : index
    %486 = vector.load %arg5[%c0_199, %c5_200, %c0_201] : memref<8x8x128xf32, #tpu.memory_space<vmem>>, vector<8x1x128xf32>
    %487 = vector.shape_cast %486 : vector<8x1x128xf32> to vector<8x128xf32>
    %488 = vector.shape_cast %485 : vector<8x128xf32> to vector<8x1x128xf32>
    tpu.vector_store %arg5[%c0_199, %c5_200, %c0_201], %488 {strides = array<i32>} : memref<8x8x128xf32, #tpu.memory_space<vmem>>, vector<8x1x128xf32>,
    %c5_202 = arith.constant 5 : index
    %c0_203 = arith.constant 0 : index
    %c0_204 = arith.constant 0 : index
    %489 = vector.load %arg10[%c5_202, %c0_203, %c0_204] : memref<8x8x128xf32, #tpu.memory_space<vmem>>, vector<1x8x128xf32>
    %490 = vector.shape_cast %489 : vector<1x8x128xf32> to vector<8x128xf32>
    %c0_205 = arith.constant 0 : index
    %c5_206 = arith.constant 5 : index
    %c0_207 = arith.constant 0 : index
    %491 = vector.load %arg6[%c0_205, %c5_206, %c0_207] : memref<8x8x128xf32, #tpu.memory_space<vmem>>, vector<8x1x128xf32>
    %492 = vector.shape_cast %491 : vector<8x1x128xf32> to vector<8x128xf32>
    %493 = vector.shape_cast %490 : vector<8x128xf32> to vector<8x1x128xf32>
    tpu.vector_store %arg6[%c0_205, %c5_206, %c0_207], %493 {strides = array<i32>} : memref<8x8x128xf32, #tpu.memory_space<vmem>>, vector<8x1x128xf32>,
    %c6 = arith.constant 6 : index
    %c0_208 = arith.constant 0 : index
    %c0_209 = arith.constant 0 : index
    %494 = vector.load %arg9[%c6, %c0_208, %c0_209] : memref<8x8x128xf32, #tpu.memory_space<vmem>>, vector<1x8x128xf32>
    %495 = vector.shape_cast %494 : vector<1x8x128xf32> to vector<8x128xf32>
    %c0_210 = arith.constant 0 : index
    %c6_211 = arith.constant 6 : index
    %c0_212 = arith.constant 0 : index
    %496 = vector.load %arg5[%c0_210, %c6_211, %c0_212] : memref<8x8x128xf32, #tpu.memory_space<vmem>>, vector<8x1x128xf32>
    %497 = vector.shape_cast %496 : vector<8x1x128xf32> to vector<8x128xf32>
    %498 = vector.shape_cast %495 : vector<8x128xf32> to vector<8x1x128xf32>
    tpu.vector_store %arg5[%c0_210, %c6_211, %c0_212], %498 {strides = array<i32>} : memref<8x8x128xf32, #tpu.memory_space<vmem>>, vector<8x1x128xf32>,
    %c6_213 = arith.constant 6 : index
    %c0_214 = arith.constant 0 : index
    %c0_215 = arith.constant 0 : index
    %499 = vector.load %arg10[%c6_213, %c0_214, %c0_215] : memref<8x8x128xf32, #tpu.memory_space<vmem>>, vector<1x8x128xf32>
    %500 = vector.shape_cast %499 : vector<1x8x128xf32> to vector<8x128xf32>
    %c0_216 = arith.constant 0 : index
    %c6_217 = arith.constant 6 : index
    %c0_218 = arith.constant 0 : index
    %501 = vector.load %arg6[%c0_216, %c6_217, %c0_218] : memref<8x8x128xf32, #tpu.memory_space<vmem>>, vector<8x1x128xf32>
    %502 = vector.shape_cast %501 : vector<8x1x128xf32> to vector<8x128xf32>
    %503 = vector.shape_cast %500 : vector<8x128xf32> to vector<8x1x128xf32>
    tpu.vector_store %arg6[%c0_216, %c6_217, %c0_218], %503 {strides = array<i32>} : memref<8x8x128xf32, #tpu.memory_space<vmem>>, vector<8x1x128xf32>,
    %c7 = arith.constant 7 : index
    %c0_219 = arith.constant 0 : index
    %c0_220 = arith.constant 0 : index
    %504 = vector.load %arg9[%c7, %c0_219, %c0_220] : memref<8x8x128xf32, #tpu.memory_space<vmem>>, vector<1x8x128xf32>
    %505 = vector.shape_cast %504 : vector<1x8x128xf32> to vector<8x128xf32>
    %c0_221 = arith.constant 0 : index
    %c7_222 = arith.constant 7 : index
    %c0_223 = arith.constant 0 : index
    %506 = vector.load %arg5[%c0_221, %c7_222, %c0_223] : memref<8x8x128xf32, #tpu.memory_space<vmem>>, vector<8x1x128xf32>
    %507 = vector.shape_cast %506 : vector<8x1x128xf32> to vector<8x128xf32>
    %508 = vector.shape_cast %505 : vector<8x128xf32> to vector<8x1x128xf32>
    tpu.vector_store %arg5[%c0_221, %c7_222, %c0_223], %508 {strides = array<i32>} : memref<8x8x128xf32, #tpu.memory_space<vmem>>, vector<8x1x128xf32>,
    %c7_224 = arith.constant 7 : index
    %c0_225 = arith.constant 0 : index
    %c0_226 = arith.constant 0 : index
    %509 = vector.load %arg10[%c7_224, %c0_225, %c0_226] : memref<8x8x128xf32, #tpu.memory_space<vmem>>, vector<1x8x128xf32>
    %510 = vector.shape_cast %509 : vector<1x8x128xf32> to vector<8x128xf32>
    %c0_227 = arith.constant 0 : index
    %c7_228 = arith.constant 7 : index
    %c0_229 = arith.constant 0 : index
    %511 = vector.load %arg6[%c0_227, %c7_228, %c0_229] : memref<8x8x128xf32, #tpu.memory_space<vmem>>, vector<8x1x128xf32>
    %512 = vector.shape_cast %511 : vector<8x1x128xf32> to vector<8x128xf32>
    %513 = vector.shape_cast %510 : vector<8x128xf32> to vector<8x1x128xf32>
    tpu.vector_store %arg6[%c0_227, %c7_228, %c0_229], %513 {strides = array<i32>} : memref<8x8x128xf32, #tpu.memory_space<vmem>>, vector<8x1x128xf32>,
    return
  }
  func.func @transform_0(%arg0: i32, %arg1: i32) -> (i32, i32, i32) {
    %c0_i32 = arith.constant 0 : i32
    %c0_i32_0 = arith.constant 0 : i32
    return %arg1, %arg0, %c0_i32 : i32, i32, i32
  }
  func.func @transform_1(%arg0: i32, %arg1: i32) -> (i32, i32) {
    %c0_i32 = arith.constant 0 : i32
    %c0_i32_0 = arith.constant 0 : i32
    return %arg0, %c0_i32 : i32, i32
  }
  func.func @transform_2(%arg0: i32, %arg1: i32) -> (i32, i32) {
    %c0_i32 = arith.constant 0 : i32
    %c0_i32_0 = arith.constant 0 : i32
    %c0_i32_1 = arith.constant 0 : i32
    return %c0_i32, %c0_i32_0 : i32, i32
  }
  func.func @transform_3(%arg0: i32, %arg1: i32) -> (i32, i32, i32) {
    %c0_i32 = arith.constant 0 : i32
    %c0_i32_0 = arith.constant 0 : i32
    return %arg0, %arg1, %c0_i32 : i32, i32, i32
  }
  func.func @transform_4(%arg0: i32, %arg1: i32) -> (i32, i32, i32) {
    %c0_i32 = arith.constant 0 : i32
    %c0_i32_0 = arith.constant 0 : i32
    return %arg0, %arg1, %c0_i32 : i32, i32, i32
  }
}

</mosaic_0001>

<bundles_post_ra>
// kernel: encoder_forward.1
= control target key start
LH: loop header
LB: loop body
LE: loop exit
PB: predicated region body
PF: predicated region fallthrough
CT: control target
= control target key end

     0   :  { %s3939_s15 = smov 0   ;;  %s3941_s16 = smov 0   ;;  %s4978_s0 = inlined_call_operand.vmem [shape: f32[16,8,512], index: 0, kind: input, shape index: {}]   ;;  %s4979_s1 = inlined_call_operand.vmem [shape: s32[8,1], index: 1, kind: input, shape index: {}]   ;;  %s4980_s2 = inlined_call_operand.vmem [shape: f32[128,512], index: 2, kind: input, shape index: {}]   ;;  %s4981_s3 = inlined_call_operand.vmem [shape: f32[8,16,128], index: 3, kind: output, shape index: {0}]   ;;  %s4982_s4 = inlined_call_operand.vmem [shape: f32[8,16,128], index: 4, kind: output, shape index: {1}]  }
   0x1   :  { %s3943_s17 = smov 0   ;;  %s3945_s18 = smov 0  }
   0x2   :  { %s3947_s19 = smov 0  }
   0x3 LB: > { %s3120_s20 = sadd.s32 4294967295, %s3908_s19   ;;  %s24_s21 = sadd.s32 1, %s3904_s18  ;;  %s3908_s19 = sphi %s3947_s19, %s15_s19   ;;  %s3904_s18 = sphi %s3945_s18, %s4987_s18   ;;  %s3900_s17 = sphi %s3943_s17, %s4986_s17   ;;  %s3896_s16 = sphi %s3941_s16, %s4985_s16   ;;  %s3892_s15 = sphi %s3939_s15, %s4984_s15  }
   0x4   : > { %p25_p0 = scmp.ge.s32.totalorder %s24_s21, 2  ;;  %s111_s22 = sadd.s32 1, %s3896_s16 }
   0x5   : > { %p121_p1 = scmp.ne.s32.totalorder %s3896_s16, %s3892_s15  ;;  %p122_p2 = scmp.eq.s32.totalorder %s3120_s20, 1 }
   0x6   : > { %s4989_s21 = smov (%p25_p0, %s24_s21), 0  ;;  %p3125_p4 = scmp.ge.s32.totalorder %s3908_s19, 1 }
   0x7   : > { %p3966_p3 = por %p122_p2, %p121_p1  ;;  %s107_s24 = ssub.s32 %s3904_s18, %s4989_s21 }
   0x8   : > { %p198_p5 = scmp.lt.s32.totalorder %s3908_s19, 3  ;;  %p109_p6 = scmp.eq.s32.totalorder %s107_s24, 0 }
   0xa   : > { %p199_p7 = pnand %p3125_p4, %p198_p5 }
   0xb   : > { %s3975_s25 = scalar_select %p109_p6, %s3896_s16, %s111_s22  }
   0xc   : > { %202 = sbr.rel (%p199_p7) target bundleno = 2089 (0x829), region = 32  ;;  %s227_s26 = sand.u32 (!%p199_p7), 1, %s3892_s15  }
   0xd   : > { %s3977_s27 = sshll.u32 (!%p199_p7), %s3900_s17, 3  ;;  %s3126_s28 = sshll.u32 (!%p199_p7), %s227_s26, 6 }
   0xe   : > { %p237_p8 = scmp.lt.s32.totalorder (!%p199_p7), %s3977_s27, 15  ;;  %s3986_s8 = scalar_lea.vmem (!%p199_p7), [#allocation6], %s3126_s28 }
   0xf   : > { %s3988_s9 = scalar_lea.vmem (!%p199_p7), [#allocation7], %s3126_s28  ;;  %p3131_p9 = scmp.ne.s32.totalorder (!%p199_p7), %s3900_s17, 0 }
  0x13   : > { %s238_s29 = scalar_select %p237_p8, %s3977_s27, 15 }
  0x14   : > { %256 = sbr.rel (%p3131_p9) target bundleno = 27 (0x1b), region = 36  ;;  %v3910_v0 = vmov (!%p3131_p9), 0.0  }
  0x15   : > { %s3231_s30 = sshll.u32 %s238_s29, 5  ;;  %257 = vst [vmem:[#allocation2] sm:$0xff] (!%p3131_p9), %v3910_v0  ;;  %258 = vst [vmem:[#allocation3] sm:$0xff] (!%p3131_p9), %v3910_v0 }
  0x16   : > { %s3984_s7 = scalar_lea.vmem %s4978_s0, %s3231_s30 }
  0x1b PF: > { %v261_v1 = vld [vmem:[%s4980_s2 + $0x8] sm:$0xff]  ;;  %v260_v3 = vld [vmem:[%s4980_s2] sm:$0xff]  ;;  %v3911_v8 = vmov 0.0   ;;  %v263_v13 = vld [vmem:[%s4980_s2 + $0x18] sm:$0xff]  ;;  %v3912_v14 = vmov 0   ;;  %s675_s29 = sadd.s32 1, %s3977_s27  ;;  %s2876_s26 = scalar_lea.vmem (%p3966_p3), %s4981_s3, %s3977_s27 }
  0x1c   : > { %v265_v2 = vld [vmem:[%s4980_s2 + $0x28] sm:$0xff]  ;;  %v264_v5 = vld [vmem:[%s4980_s2 + $0x20] sm:$0xff]  ;;  %395 = vmatprep.mubr.f32.mxu0 %v3911_v8  ;;  %466 = vmatprep.mubr.f32.mxu1 %v3911_v8  ;;  %v267_v15 = vld [vmem:[%s4980_s2 + $0x38] sm:$0xff]  ;;  %s1224_s10 = sadd.s32 4, %s3977_s27  ;;  %s858_s15 = sadd.s32 2, %s3977_s27 }
  0x1d   : > { %v3999_v4 = vpack.c.bf16 %v265_v2, %v261_v1  ;;  %v269_v6 = vld [vmem:[%s4980_s2 + $0x48] sm:$0xff]  ;;  %v4012_v9 = vpack.c.bf16 %v264_v5, %v260_v3  ;;  %v268_v11 = vld [vmem:[%s4980_s2 + $0x40] sm:$0xff]  ;;  %3788 = vset.pattern.permute.xlu0 %v3912_v14  ;;  %3789 = vset.pattern.permute.xlu1 %v3912_v14  ;;  %v262_v16 = vld [vmem:[%s4980_s2 + $0x10] sm:$0xff]  ;;  %v4040_v19 = vpack.c.bf16 %v267_v15, %v263_v13  ;;  %v495_v13 = vstv %s3977_s27  ;;  %s1041_s17 = sadd.s32 3, %s3977_s27  ;;  %s1407_s20 = sadd.s32 5, %s3977_s27 }
  0x1e   : > { %v273_v7 = vld [vmem:[%s4980_s2 + $0x68] sm:$0xff]  ;;  %v272_v12 = vld [vmem:[%s4980_s2 + $0x60] sm:$0xff]  ;;  %v266_v17 = vld [vmem:[%s4980_s2 + $0x30] sm:$0xff]  ;;  %s1773_s22 = sadd.s32 7, %s3977_s27 }
  0x1f   : > { %v4014_v10 = vpack.c.bf16 %v273_v7, %v269_v6  ;;  %3233 = vmatprep.subr.bf16.mxu0 %v3999_v4  ;;  %v4038_v18 = vpack.c.bf16 %v272_v12, %v268_v11  ;;  %v4042_v20 = vpack.c.bf16 %v266_v17, %v262_v16  ;;  %v277_v21 = vld [vmem:[%s4980_s2 + $0x88] sm:$0xff]  ;;  %v276_v23 = vld [vmem:[%s4980_s2 + $0x80] sm:$0xff]  ;;  %v271_v26 = vld [vmem:[%s4980_s2 + $0x58] sm:$0xff]  ;;  %3265 = vmatprep.subr.bf16.mxu1 %v4040_v19 }
  0x20   : > { %3235 = vmatpush1.bf16.msra.mxu0 %v4012_v9  ;;  %v281_v22 = vld [vmem:[%s4980_s2 + $0xa8] sm:$0xff]  ;;  %v280_v25 = vld [vmem:[%s4980_s2 + $0xa0] sm:$0xff]  ;;  %v275_v27 = vld [vmem:[%s4980_s2 + $0x78] sm:$0xff] }
  0x21   : > { %3237 = vmatprep.subr.bf16.mxu0 %v4014_v10  ;;  %v4054_v24 = vpack.c.bf16 %v281_v22, %v277_v21  ;;  %v4066_v28 = vpack.c.bf16 %v275_v27, %v271_v26  ;;  %v270_v29 = vld [vmem:[%s4980_s2 + $0x50] sm:$0xff]  ;;  %v285_v31 = vld [vmem:[%s4980_s2 + $0xc8] sm:$0xff]  ;;  %3267 = vmatpush1.bf16.msra.mxu1 %v4042_v20  ;;  %v4084_v34 = vpack.c.bf16 %v280_v25, %v276_v23  ;;  %v279_v35 = vld [vmem:[%s4980_s2 + $0x98] sm:$0xff]  ;;  %v676_v23 = vstv %s675_s29  ;;  %s1590_s29 = sadd.s32 6, %s3977_s27 }
  0x22   : > { %v274_v30 = vld [vmem:[%s4980_s2 + $0x70] sm:$0xff]  ;;  %v289_v33 = vld [vmem:[%s4980_s2 + $0xe8] sm:$0xff]  ;;  %v283_v36 = vld [vmem:[%s4980_s2 + $0xb8] sm:$0xff] }
  0x23   : > { %v4078_v32 = vpack.c.bf16 %v274_v30, %v270_v29  ;;  %3269 = vmatprep.subr.bf16.mxu1 %v4066_v28  ;;  %v278_v37 = vld [vmem:[%s4980_s2 + $0x90] sm:$0xff]  ;;  %v4097_v38 = vpack.c.bf16 %v289_v33, %v285_v31  ;;  %v284_v39 = vld [vmem:[%s4980_s2 + $0xc0] sm:$0xff]  ;;  %v4105_v41 = vpack.c.bf16 %v283_v36, %v279_v35  ;;  %v293_v43 = vld [vmem:[%s4980_s2 + $0x108] sm:$0xff] }
  0x24   : > { %3239 = vmatpush1.bf16.msra.mxu0 %v4038_v18  ;;  %v288_v40 = vld [vmem:[%s4980_s2 + $0xe0] sm:$0xff]  ;;  %v282_v42 = vld [vmem:[%s4980_s2 + $0xb0] sm:$0xff]  ;;  %v297_v44 = vld [vmem:[%s4980_s2 + $0x128] sm:$0xff] }
  0x25   : > { %3241 = vmatprep.subr.bf16.mxu0 %v4054_v24  ;;  %v287_v45 = vld [vmem:[%s4980_s2 + $0xd8] sm:$0xff]  ;;  %3271 = vmatpush1.bf16.msra.mxu1 %v4078_v32  ;;  %v4120_v46 = vpack.c.bf16 %v282_v42, %v278_v37  ;;  %v4126_v48 = vpack.c.bf16 %v288_v40, %v284_v39  ;;  %v292_v49 = vld [vmem:[%s4980_s2 + $0x100] sm:$0xff]  ;;  %v286_v51 = vld [vmem:[%s4980_s2 + $0xd0] sm:$0xff]  ;;  %v4141_v53 = vpack.c.bf16 %v297_v44, %v293_v43  ;;  %v1225_v43 = vstv %s1224_s10 }
  0x26   : > { %v291_v47 = vld [vmem:[%s4980_s2 + $0xf8] sm:$0xff]  ;;  %3273 = vmatprep.subr.bf16.mxu1 %v4105_v41  ;;  %v290_v52 = vld [vmem:[%s4980_s2 + $0xf0] sm:$0xff]  ;;  %v296_v54 = vld [vmem:[%s4980_s2 + $0x120] sm:$0xff] }
  0x27   : > { %v4132_v50 = vpack.c.bf16 %v291_v47, %v287_v45  ;;  %v295_v55 = vld [vmem:[%s4980_s2 + $0x118] sm:$0xff]  ;;  %v301_v57 = vld [vmem:[%s4980_s2 + $0x148] sm:$0xff]  ;;  %v4159_v59 = vpack.c.bf16 %v290_v52, %v286_v51  ;;  %v4162_v60 = vpack.c.bf16 %v296_v54, %v292_v49  ;;  %v300_v61 = vld [vmem:[%s4980_s2 + $0x140] sm:$0xff] }
  0x28   : > { %3243 = vmatpush1.bf16.msra.mxu0 %v4084_v34  ;;  %v299_v56 = vld [vmem:[%s4980_s2 + $0x138] sm:$0xff]  ;;  %v305_v58 = vld [vmem:[%s4980_s2 + $0x168] sm:$0xff]  ;;  %v294_v63 = vld [vmem:[%s4980_s2 + $0x110] sm:$0xff] }
  0x29   : > { %3245 = vmatprep.subr.bf16.mxu0 %v4097_v38  ;;  %3275 = vmatpush1.bf16.msra.mxu1 %v4120_v46  ;;  %v4168_v62 = vpack.c.bf16 %v299_v56, %v295_v55  ;;  %v298_v0 = vld [vmem:[%s4980_s2 + $0x130] sm:$0xff]  ;;  %v4177_v1 = vpack.c.bf16 %v305_v58, %v301_v57  ;;  %v304_v2 = vld [vmem:[%s4980_s2 + $0x160] sm:$0xff]  ;;  %v303_v3 = vld [vmem:[%s4980_s2 + $0x158] sm:$0xff]  ;;  %v1591_v58 = vstv %s1590_s29 }
  0x2a   : > { %3277 = vmatprep.subr.bf16.mxu1 %v4132_v50  ;;  %v307_v5 = vld [vmem:[%s4980_s2 + $0x178] sm:$0xff]  ;;  %v309_v6 = vld [vmem:[%s4980_s2 + $0x188] sm:$0xff]  ;;  %v4196_v11 = vpack.c.bf16 %v298_v0, %v294_v63  ;;  %v308_v12 = vld [vmem:[%s4980_s2 + $0x180] sm:$0xff]  ;;  %v4203_v15 = vpack.c.bf16 %v304_v2, %v300_v61 }
  0x2b   : > { %v313_v7 = vld [vmem:[%s4980_s2 + $0x1a8] sm:$0xff]  ;;  %v312_v16 = vld [vmem:[%s4980_s2 + $0x1a0] sm:$0xff]  ;;  %v4209_v17 = vpack.c.bf16 %v307_v5, %v303_v3  ;;  %v302_v21 = vld [vmem:[%s4980_s2 + $0x150] sm:$0xff] }
  0x2c   : > { %3247 = vmatpush1.bf16.msra.mxu0 %v4126_v48  ;;  %v306_v22 = vld [vmem:[%s4980_s2 + $0x170] sm:$0xff]  ;;  %v4218_v25 = vpack.c.bf16 %v313_v7, %v309_v6  ;;  %v311_v26 = vld [vmem:[%s4980_s2 + $0x198] sm:$0xff]  ;;  %v4229_v29 = vld [vmem:[%s4979_s1] sm:$0xff]  ;;  %v4245_v36 = vpack.c.bf16 %v312_v16, %v308_v12 }
  0x2d   : > { %3249 = vmatprep.subr.bf16.mxu0 %v4141_v53  ;;  %3279 = vmatpush1.bf16.msra.mxu1 %v4159_v59  ;;  %v315_v27 = vld [vmem:[%s4980_s2 + $0x1b8] sm:$0xff]  ;;  %v317_v30 = vld [vmem:[%s4980_s2 + $0x1c8] sm:$0xff]  ;;  %vm496_vm0 = vcmp.lt.s32.totalorder %v495_v13, %v4229_v29  ;;  %v4240_v33 = vpack.c.bf16 %v306_v22, %v302_v21  ;;  %vm677_vm1 = vcmp.lt.s32.totalorder %v676_v23, %v4229_v29  ;;  %v316_v37 = vld [vmem:[%s4980_s2 + $0x1c0] sm:$0xff] }
  0x2e   : > { %3281 = vmatprep.subr.bf16.mxu1 %v4168_v62  ;;  %v321_v31 = vld [vmem:[%s4980_s2 + $0x1e8] sm:$0xff]  ;;  %v497_v35 = vsel %vm496_vm0, 1, %v3912_v14  ;;  %v4251_v39 = vpack.c.bf16 %v315_v27, %v311_v26  ;;  %v310_v40 = vld [vmem:[%s4980_s2 + $0x190] sm:$0xff]  ;;  %v320_v45 = vld [vmem:[%s4980_s2 + $0x1e0] sm:$0xff]  ;;  %v678_v51 = vsel %vm677_vm1, 1, %v3912_v14  ;;  %vm1226_vm2 = vcmp.lt.s32.totalorder %v1225_v43, %v4229_v29 }
  0x2f   : > { %v314_v42 = vld [vmem:[%s4980_s2 + $0x1b0] sm:$0xff]  ;;  %v4260_v44 = vpack.c.bf16 %v321_v31, %v317_v30  ;;  %v319_v47 = vld [vmem:[%s4980_s2 + $0x1d8] sm:$0xff]  ;;  %499 = vperm.xlu0 %3788, %v497_v35   ;;  %v4280_v54 = vpack.c.bf16 %v320_v45, %v316_v37  ;;  %v1227_v61 = vsel %vm1226_vm2, 1, %v3912_v14  ;;  %vm1592_vm3 = vcmp.lt.s32.totalorder %v1591_v58, %v4229_v29  ;;  %v4298_v0 = vld [vmem:[#allocation2] sm:$0xff] }
  0x30   : > { %3251 = vmatpush1.bf16.msra.mxu0 %v4162_v60  ;;  %v323_v49 = vld [vmem:[%s4980_s2 + $0x1f8] sm:$0xff]  ;;  %v4276_v52 = vpack.c.bf16 %v314_v42, %v310_v40  ;;  %v318_v56 = vld [vmem:[%s4980_s2 + $0x1d0] sm:$0xff]  ;;  %v1593_v2 = vsel %vm1592_vm3, 1, %v3912_v14  ;;  %v327_v3 = vld [vmem:[%s3984_s7] sm:$0xff]  ;;  %v3913_v37 = vmov 1966171168   ;;  %v1795_v42 = vlaneseq }
  0x31   : > { %3253 = vmatprep.subr.bf16.mxu0 %v4177_v1  ;;  %3283 = vmatpush1.bf16.msra.mxu1 %v4196_v11  ;;  %v4283_v55 = vpack.c.bf16 %v323_v49, %v319_v47  ;;  %v322_v57 = vld [vmem:[%s4980_s2 + $0x1f0] sm:$0xff]  ;;  %v328_v5 = vld [vmem:[%s3984_s7 + $0x8] sm:$0xff]  ;;  %v330_v30 = vld [vmem:[%s3984_s7 + $0x18] sm:$0xff]  ;;  %v1793_v40 = vunpack.c.l.s4 %v3913_v37 }
  0x32   : > { %3285 = vmatprep.subr.bf16.mxu1 %v4209_v17  ;;  %v4294_v63 = vpack.c.bf16 %v322_v57, %v318_v56  ;;  %v329_v13 = vld [vmem:[%s3984_s7 + $0x10] sm:$0xff]  ;;  %v326_v57 = vld [vmem:[#allocation3] sm:$0xff] }
  0x33   : > { %680 = vperm.xlu0 %3788, %v678_v51   ;;  %v1794_v58 = vunpack.c.0.s8 %v1793_v40 }
  0x34   : > { %3255 = vmatpush1.bf16.msra.mxu0 %v4203_v15 }
  0x35   : > { %3257 = vmatprep.subr.bf16.mxu0 %v4218_v25  ;;  %3287 = vmatpush1.bf16.msra.mxu1 %v4240_v33 }
  0x36   : > { %3289 = vmatprep.subr.bf16.mxu1 %v4251_v39 }
  0x37   : > { %1229 = vperm.xlu0 %3788, %v1227_v61   ;;  %v1796_v61 = vshrl.u32 %v1795_v42, 7 }
  0x38   : > { %3259 = vmatpush1.bf16.msra.mxu0 %v4245_v36 }
  0x39   : > { %3261 = vmatprep.subr.bf16.mxu0 %v4260_v44  ;;  %3291 = vmatpush1.bf16.msra.mxu1 %v4276_v52 }
  0x3a   : > { %3293 = vmatprep.subr.bf16.mxu1 %v4283_v55 }
  0x3b   : > { %1595 = vperm.xlu0 %3788, %v1593_v2  }
  0x3c   : > { %3263 = vmatpush1.bf16.msra.mxu0 %v4280_v54 }
  0x3d   : > { %3297 = vmatprep.subr.bf16.mxu0 %v3999_v4  ;;  %3295 = vmatpush1.bf16.msra.mxu1 %v4294_v63 }
  0x3e   : > { %3329 = vmatprep.subr.bf16.mxu1 %v4040_v19 }
  0x3f   : > { %396 = vmatmul.mubr.f32.vlgmr.msra.gmra.mrb[0].mxu0 %v4298_v0 }
  0x40   : > { %3299 = vmatpush1.bf16.msra.mxu0 %v4012_v9  ;;  %467 = vmatmul.mubr.f32.vlgmr.msra.gmra.mrb[0].mxu1 %v4298_v0 }
  0x41   : > { %3301 = vmatprep.subr.bf16.mxu0 %v4014_v10  ;;  %575 = vmatprep.mubr.f32.mxu0 %v3911_v8 }
  0x42   : > { %3331 = vmatpush1.bf16.msra.mxu1 %v4042_v20  ;;  %646 = vmatprep.mubr.f32.mxu1 %v3911_v8 }
  0x43   : > { %3333 = vmatprep.subr.bf16.mxu1 %v4066_v28 }
  0x44   : > { %3303 = vmatpush1.bf16.msra.mxu0 %v4038_v18 }
  0x45   : > { %3305 = vmatprep.subr.bf16.mxu0 %v4054_v24 }
  0x46   : > { %3335 = vmatpush1.bf16.msra.mxu1 %v4078_v32 }
  0x47   : > { %3337 = vmatprep.subr.bf16.mxu1 %v4105_v41 }
  0x48   : > { %3307 = vmatpush1.bf16.msra.mxu0 %v4084_v34 }
  0x49   : > { %3309 = vmatprep.subr.bf16.mxu0 %v4097_v38 }
  0x4a   : > { %3339 = vmatpush1.bf16.msra.mxu1 %v4120_v46 }
  0x4b   : > { %3341 = vmatprep.subr.bf16.mxu1 %v4132_v50 }
  0x4c   : > { %3311 = vmatpush1.bf16.msra.mxu0 %v4126_v48 }
  0x4d   : > { %3313 = vmatprep.subr.bf16.mxu0 %v4141_v53 }
  0x4e   : > { %3343 = vmatpush1.bf16.msra.mxu1 %v4159_v59 }
  0x4f   : > { %3345 = vmatprep.subr.bf16.mxu1 %v4168_v62 }
  0x50   : > { %3315 = vmatpush1.bf16.msra.mxu0 %v4162_v60 }
  0x51   : > { %3317 = vmatprep.subr.bf16.mxu0 %v4177_v1 }
  0x52   : > { %3347 = vmatpush1.bf16.msra.mxu1 %v4196_v11 }
  0x53   : > { %3349 = vmatprep.subr.bf16.mxu1 %v4209_v17 }
  0x54   : > { %3319 = vmatpush1.bf16.msra.mxu0 %v4203_v15 }
  0x55   : > { %3321 = vmatprep.subr.bf16.mxu0 %v4218_v25 }
  0x56   : > { %3351 = vmatpush1.bf16.msra.mxu1 %v4240_v33 }
  0x57   : > { %3353 = vmatprep.subr.bf16.mxu1 %v4251_v39 }
  0x58   : > { %3323 = vmatpush1.bf16.msra.mxu0 %v4245_v36 }
  0x59   : > { %3325 = vmatprep.subr.bf16.mxu0 %v4260_v44 }
  0x5a   : > { %3355 = vmatpush1.bf16.msra.mxu1 %v4276_v52 }
  0x5b   : > { %3357 = vmatprep.subr.bf16.mxu1 %v4283_v55 }
  0x5c   : > { %3327 = vmatpush1.bf16.msra.mxu0 %v4280_v54 }
  0x5d   : > { %3361 = vmatprep.subr.bf16.mxu0 %v3999_v4 }
  0x5e   : > { %3359 = vmatpush1.bf16.msra.mxu1 %v4294_v63 }
  0x5f   : > { %3393 = vmatprep.subr.bf16.mxu1 %v4040_v19 }
 0x112   : > { %v397_v6 = vpop.f32.mrb[0].mxu0 }
 0x113   : > { %v473_v7 = vadd.f32 %v397_v6, %v327_v3  ;;  %v399_v12 = vpop.f32.mrb[1].mxu0  ;;  %v468_v22 = vpop.f32.mrb[0].mxu1 }
 0x114   : > { %v474_v16 = vadd.f32 %v399_v12, %v328_v5  ;;  %v475_v26 = vadd.f32 %v468_v22, %v329_v13  ;;  %v470_v27 = vpop.f32.mrb[1].mxu1  ;;  %v500_v3 = vpop.permute.xlu0 %499 }
 0x115   : > { %v477_v21 = vmul.f32 0.5, %v473_v7  ;;  %v476_v31 = vadd.f32 %v470_v27, %v330_v30  ;;  %v4345_v7 = vsub.s32 %v1794_v58, %v1796_v61  ;;  %vm501_vm4 = vcmp.eq.s32.totalorder %v500_v3, 1 }
 0x116   : > { %v481_v23 = vmul.f32 0.5, %v474_v16 }
 0x117   : > { %3790 = vtanh.f32 %v477_v21  ;;  %v486_v35 = vmul.f32 0.5, %v476_v31 }
 0x118   : > { %3792 = vtanh.f32 %v481_v23 }
 0x119   : > { %3794 = vtanh.f32 %v475_v26 }
 0x11a   : > { %3796 = vtanh.f32 %v486_v35 }
 0x121   : > { %v3791_v43 = vpop.eup %3790 }
 0x122   : > { %v3793_v45 = vpop.eup %3792  ;;  %v479_v47 = vmul.f32 0.5, %v3791_v43 }
 0x123   : > { %v3795_v49 = vpop.eup %3794  ;;  %v483_v51 = vmul.f32 0.5, %v3793_v45 }
 0x124   : > { %v480_v56 = vadd.f32 0.5, %v479_v47  ;;  %v3797_v16 = vpop.eup %3796 }
 0x125   : > { %v484_v2 = vadd.f32 0.5, %v483_v51  ;;  %v488_v30 = vmul.f32 0.5, %v3797_v16 }
 0x126   : > { %v491_v5 = vmul.f32 %v3795_v49, %v480_v56 }
 0x127   : > { %v490_v6 = vmul.f32 %v484_v2, %v326_v57  ;;  %v489_v47 = vadd.f32 0.5, %v488_v30  ;;  %v1042_v30 = vstv %s1041_s17 }
 0x128   : > { %vm1043_vm6 = vcmp.lt.s32.totalorder %v1042_v30, %v4229_v29 }
 0x129   : > { %v492_v12 = vadd.f32 %v491_v5, %v490_v6 }
 0x12b   : > { %3798 = vtanh.f32 %v492_v12  ;;  %v4348_v13 = vsel %vm501_vm4, %v492_v12, %v326_v57 }
 0x12c   : > { %v1858_v21 = vcombine.high %v4348_v13, %v4348_v13  ;;  %v1865_v22 = vrot.slane %v4348_v13, %v4345_v7 }
 0x12e   : > { %v1872_v23 = vrot.slane %v1858_v21, %v4345_v7  ;;  %v1873_v26 = vcombine.high %v1865_v22, %v1865_v22  ;;  %v1881_v27 = vrot.slane %v1865_v22, %v4345_v7  ;;  %3165 = vst.sshfl [vmem:[%s3988_s9] sm:$0x1 pattern:$0x73625140] %v1865_v22 }
 0x130   : > { %v1874_v31 = vcombine.high %v1872_v23, %v1872_v23  ;;  %v1888_v35 = vrot.slane %v1872_v23, %v4345_v7  ;;  %v1895_v37 = vrot.slane %v1873_v26, %v4345_v7  ;;  %v1903_v40 = vcombine.high %v1881_v27, %v1881_v27  ;;  %3166 = vst.sshfl [vmem:[%s3988_s9 + $0x8] sm:$0x1 pattern:$0x73625140] %v1873_v26 }
 0x131   : > { %3167 = vst.sshfl [vmem:[%s3988_s9 + $0x20] sm:$0x1 pattern:$0x73625140] %v1872_v23  ;;  %v859_v27 = vstv %s858_s15 }
 0x132   : > { %v1902_v42 = vrot.slane %v1874_v31, %v4345_v7  ;;  %v1904_v43 = vcombine.high %v1888_v35, %v1888_v35  ;;  %v1905_v45 = vcombine.high %v1895_v37, %v1895_v37  ;;  %1917 = vst [vmem:[%s3988_s9 + $0x10] sm:$0x1] %v1903_v40  ;;  %3168 = vst.sshfl [vmem:[%s3988_s9 + $0x28] sm:$0x1 pattern:$0x73625140] %v1874_v31  ;;  %v1408_v35 = vstv %s1407_s20 }
 0x133   : > { %vm860_vm5 = vcmp.lt.s32.totalorder %v859_v27, %v4229_v29  ;;  %v1044_v37 = vsel %vm1043_vm6, 1, %v3912_v14  ;;  %vm1409_vm7 = vcmp.lt.s32.totalorder %v1408_v35, %v4229_v29  ;;  %v1774_v40 = vstv %s1773_s22 }
 0x134   : > { %v1906_v49 = vcombine.high %v1902_v42, %v1902_v42  ;;  %1918 = vst [vmem:[%s3988_s9 + $0x18] sm:$0x1] %v1905_v45  ;;  %1921 = vst [vmem:[%s3988_s9 + $0x30] sm:$0x1] %v1904_v43  ;;  %v861_v31 = vsel %vm860_vm5, 1, %v3912_v14  ;;  %v1410_v42 = vsel %vm1409_vm7, 1, %v3912_v14  ;;  %vm1775_vm8 = vcmp.lt.s32.totalorder %v1774_v40, %v4229_v29 }
 0x135   : > { %v3799_v51 = vpop.eup %3798  ;;  %863 = vperm.xlu1 %3789, %v861_v31   ;;  %v1776_v43 = vsel %vm1775_vm8, 1, %v3912_v14  ;;  %v3133_v45 = vld [vmem:[%s3984_s7 + $0x20] sm:$0xff] }
 0x136   : > { %v494_v56 = vmul.f32 %v3799_v51, %v489_v47  ;;  %1922 = vst [vmem:[%s3988_s9 + $0x38] sm:$0x1] %v1906_v49  ;;  %v3134_v47 = vld [vmem:[%s3984_s7 + $0x28] sm:$0xff] }
 0x138   : > { %v4369_v57 = vsel %vm501_vm4, %v494_v56, %v4298_v0 }
 0x139   : > { %v1791_v58 = vcombine.high %v4369_v57, %v4369_v57  ;;  %v1798_v61 = vrot.slane %v4369_v57, %v4345_v7  ;;  %576 = vmatmul.mubr.f32.vlgmr.msra.gmra.mrb[2].mxu0 %v4369_v57  ;;  %647 = vmatmul.mubr.f32.vlgmr.msra.gmra.mrb[2].mxu1 %v4369_v57 }
 0x13a   : > { %3363 = vmatpush1.bf16.msra.mxu0 %v4012_v9  ;;  %3395 = vmatpush1.bf16.msra.mxu1 %v4042_v20 }
 0x13b   : > { %v1805_v2 = vrot.slane %v1791_v58, %v4345_v7  ;;  %v1806_v0 = vcombine.high %v1798_v61, %v1798_v61  ;;  %v1814_v3 = vrot.slane %v1798_v61, %v4345_v7  ;;  %3161 = vst.sshfl [vmem:[%s3986_s8] sm:$0x1 pattern:$0x73625140] %v1798_v61  ;;  %3365 = vmatprep.subr.bf16.mxu0 %v4014_v10 }
 0x13c   : > { %3397 = vmatprep.subr.bf16.mxu1 %v4066_v28  ;;  %758 = vmatprep.mubr.f32.mxu0 %v3911_v8 }
 0x13d   : > { %829 = vmatprep.mubr.f32.mxu1 %v3911_v8  ;;  %v1807_v5 = vcombine.high %v1805_v2, %v1805_v2  ;;  %v1821_v6 = vrot.slane %v1805_v2, %v4345_v7  ;;  %v1828_v12 = vrot.slane %v1806_v0, %v4345_v7  ;;  %v1836_v16 = vcombine.high %v1814_v3, %v1814_v3 }
 0x13e   : > { %3162 = vst.sshfl [vmem:[%s3986_s8 + $0x8] sm:$0x1 pattern:$0x73625140] %v1806_v0  ;;  %3367 = vmatpush1.bf16.msra.mxu0 %v4038_v18  ;;  %3399 = vmatpush1.bf16.msra.mxu1 %v4078_v32 }
 0x13f   : > { %3163 = vst.sshfl [vmem:[%s3986_s8 + $0x20] sm:$0x1 pattern:$0x73625140] %v1805_v2  ;;  %v1835_v21 = vrot.slane %v1807_v5, %v4345_v7  ;;  %v1837_v22 = vcombine.high %v1821_v6, %v1821_v6  ;;  %v1838_v23 = vcombine.high %v1828_v12, %v1828_v12  ;;  %1850 = vst [vmem:[%s3986_s8 + $0x10] sm:$0x1] %v1836_v16  ;;  %3369 = vmatprep.subr.bf16.mxu0 %v4054_v24 }
 0x140   : > { %3164 = vst.sshfl [vmem:[%s3986_s8 + $0x28] sm:$0x1 pattern:$0x73625140] %v1807_v5  ;;  %3401 = vmatprep.subr.bf16.mxu1 %v4105_v41  ;;  %1046 = vperm.xlu1 %3789, %v1044_v37   ;;  %v3135_v2 = vld [vmem:[%s3984_s7 + $0x30] sm:$0xff]  ;;  %v3136_v12 = vld [vmem:[%s3984_s7 + $0x38] sm:$0xff]  ;;  %v681_v37 = vpop.permute.xlu0 %680 }
 0x141   : > { %v1839_v26 = vcombine.high %v1835_v21, %v1835_v21  ;;  %1851 = vst [vmem:[%s3986_s8 + $0x18] sm:$0x1] %v1838_v23  ;;  %1854 = vst [vmem:[%s3986_s8 + $0x30] sm:$0x1] %v1837_v22  ;;  %vm682_vm9 = vcmp.eq.s32.totalorder %v681_v37, 1 }
 0x142   : > { %3371 = vmatpush1.bf16.msra.mxu0 %v4084_v34  ;;  %3403 = vmatpush1.bf16.msra.mxu1 %v4120_v46 }
 0x143   : > { %1855 = vst [vmem:[%s3986_s8 + $0x38] sm:$0x1] %v1839_v26  ;;  %3373 = vmatprep.subr.bf16.mxu0 %v4097_v38  ;;  %3405 = vmatprep.subr.bf16.mxu1 %v4132_v50 }
 0x144   : > { %1412 = vperm.xlu1 %3789, %v1410_v42  }
 0x146   : > { %3375 = vmatpush1.bf16.msra.mxu0 %v4126_v48  ;;  %3407 = vmatpush1.bf16.msra.mxu1 %v4159_v59 }
 0x147   : > { %3377 = vmatprep.subr.bf16.mxu0 %v4141_v53  ;;  %3409 = vmatprep.subr.bf16.mxu1 %v4168_v62 }
 0x148   : > { %1778 = vperm.xlu1 %3789, %v1776_v43  }
 0x14a   : > { %3379 = vmatpush1.bf16.msra.mxu0 %v4162_v60  ;;  %3411 = vmatpush1.bf16.msra.mxu1 %v4196_v11 }
 0x14b   : > { %3381 = vmatprep.subr.bf16.mxu0 %v4177_v1  ;;  %3413 = vmatprep.subr.bf16.mxu1 %v4209_v17 }
 0x14e   : > { %3383 = vmatpush1.bf16.msra.mxu0 %v4203_v15  ;;  %3415 = vmatpush1.bf16.msra.mxu1 %v4240_v33 }
 0x14f   : > { %3385 = vmatprep.subr.bf16.mxu0 %v4218_v25  ;;  %3417 = vmatprep.subr.bf16.mxu1 %v4251_v39 }
 0x152   : > { %3387 = vmatpush1.bf16.msra.mxu0 %v4245_v36  ;;  %3419 = vmatpush1.bf16.msra.mxu1 %v4276_v52 }
 0x153   : > { %3389 = vmatprep.subr.bf16.mxu0 %v4260_v44  ;;  %3421 = vmatprep.subr.bf16.mxu1 %v4283_v55 }
 0x156   : > { %3391 = vmatpush1.bf16.msra.mxu0 %v4280_v54  ;;  %3423 = vmatpush1.bf16.msra.mxu1 %v4294_v63 }
 0x157   : > { %3425 = vmatprep.subr.bf16.mxu0 %v3999_v4  ;;  %3457 = vmatprep.subr.bf16.mxu1 %v4040_v19 }
 0x20c   : > { %v577_v49 = vpop.f32.mrb[2].mxu0  ;;  %v648_v51 = vpop.f32.mrb[2].mxu1 }
 0x20d   : > { %v653_v56 = vadd.f32 %v3133_v45, %v577_v49  ;;  %v579_v58 = vpop.f32.mrb[3].mxu0  ;;  %v650_v61 = vpop.f32.mrb[3].mxu1  ;;  %v655_v6 = vadd.f32 %v3135_v2, %v648_v51 }
 0x20e   : > { %v654_v0 = vadd.f32 %v3134_v47, %v579_v58  ;;  %v656_v29 = vadd.f32 %v3136_v12, %v650_v61 }
 0x20f   : > { %v657_v3 = vmul.f32 0.5, %v653_v56 }
 0x210   : > { %v661_v5 = vmul.f32 0.5, %v654_v0  ;;  %v666_v16 = vmul.f32 0.5, %v656_v29 }
 0x211   : > { %3800 = vtanh.f32 %v657_v3 }
 0x212   : > { %3802 = vtanh.f32 %v661_v5 }
 0x213   : > { %3804 = vtanh.f32 %v655_v6 }
 0x214   : > { %3806 = vtanh.f32 %v666_v16 }
 0x21b   : > { %v3801_v14 = vpop.eup %3800 }
 0x21c   : > { %v3803_v21 = vpop.eup %3802  ;;  %v659_v22 = vmul.f32 0.5, %v3801_v14 }
 0x21d   : > { %v663_v23 = vmul.f32 0.5, %v3803_v21  ;;  %v3805_v27 = vpop.eup %3804 }
 0x21e   : > { %v660_v26 = vadd.f32 0.5, %v659_v22  ;;  %v3807_v43 = vpop.eup %3806 }
 0x21f   : > { %v664_v30 = vadd.f32 0.5, %v663_v23  ;;  %v668_v58 = vmul.f32 0.5, %v3807_v43 }
 0x220   : > { %v671_v31 = vmul.f32 %v3805_v27, %v660_v26 }
 0x221   : > { %v670_v35 = vmul.f32 %v664_v30, %v4348_v13  ;;  %v669_v12 = vadd.f32 0.5, %v668_v58 }
 0x223   : > { %v672_v40 = vadd.f32 %v671_v31, %v670_v35 }
 0x225   : > { %3808 = vtanh.f32 %v672_v40  ;;  %v4443_v42 = vsel %vm682_vm9, %v672_v40, %v4348_v13 }
 0x226   : > { %v1992_v45 = vcombine.high %v4443_v42, %v4443_v42  ;;  %v1999_v47 = vrot.slane %v4443_v42, %v4345_v7 }
 0x228   : > { %v2006_v49 = vrot.slane %v1992_v45, %v4345_v7  ;;  %v2007_v51 = vcombine.high %v1999_v47, %v1999_v47  ;;  %v2015_v56 = vrot.slane %v1999_v47, %v4345_v7  ;;  %3173 = vst.sshfl [vmem:[%s3988_s9 + $0x1] sm:$0x1 pattern:$0x73625140] %v1999_v47 }
 0x22a   : > { %v2008_v13 = vcombine.high %v2006_v49, %v2006_v49  ;;  %v2022_v61 = vrot.slane %v2006_v49, %v4345_v7  ;;  %v2029_v2 = vrot.slane %v2007_v51, %v4345_v7  ;;  %v2037_v0 = vcombine.high %v2015_v56, %v2015_v56  ;;  %3174 = vst.sshfl [vmem:[%s3988_s9 + $0x9] sm:$0x1 pattern:$0x73625140] %v2007_v51  ;;  %v3138_v51 = vld [vmem:[%s3984_s7 + $0x48] sm:$0xff] }
 0x22b   : > { %3175 = vst.sshfl [vmem:[%s3988_s9 + $0x21] sm:$0x1 pattern:$0x73625140] %v2006_v49  ;;  %v3137_v49 = vld [vmem:[%s3984_s7 + $0x40] sm:$0xff] }
 0x22c   : > { %v2036_v3 = vrot.slane %v2008_v13, %v4345_v7  ;;  %v2038_v5 = vcombine.high %v2022_v61, %v2022_v61  ;;  %v2039_v6 = vcombine.high %v2029_v2, %v2029_v2  ;;  %2051 = vst [vmem:[%s3988_s9 + $0x11] sm:$0x1] %v2037_v0  ;;  %3176 = vst.sshfl [vmem:[%s3988_s9 + $0x29] sm:$0x1 pattern:$0x73625140] %v2008_v13 }
 0x22d   : > { %v3139_v0 = vld [vmem:[%s3984_s7 + $0x50] sm:$0xff] }
 0x22e   : > { %v2040_v29 = vcombine.high %v2036_v3, %v2036_v3  ;;  %2052 = vst [vmem:[%s3988_s9 + $0x19] sm:$0x1] %v2039_v6  ;;  %2055 = vst [vmem:[%s3988_s9 + $0x31] sm:$0x1] %v2038_v5 }
 0x22f   : > { %v3809_v16 = vpop.eup %3808 }
 0x230   : > { %v674_v14 = vmul.f32 %v3809_v16, %v669_v12  ;;  %2056 = vst [vmem:[%s3988_s9 + $0x39] sm:$0x1] %v2040_v29  ;;  %v3140_v29 = vld [vmem:[%s3984_s7 + $0x58] sm:$0xff] }
 0x232   : > { %v4464_v21 = vsel %vm682_vm9, %v674_v14, %v4369_v57 }
 0x233   : > { %759 = vmatmul.mubr.f32.vlgmr.msra.gmra.mrb[4].mxu0 %v4464_v21  ;;  %v1925_v22 = vcombine.high %v4464_v21, %v4464_v21  ;;  %v1932_v23 = vrot.slane %v4464_v21, %v4345_v7  ;;  %830 = vmatmul.mubr.f32.vlgmr.msra.gmra.mrb[4].mxu1 %v4464_v21 }
 0x234   : > { %3427 = vmatpush1.bf16.msra.mxu0 %v4012_v9  ;;  %3459 = vmatpush1.bf16.msra.mxu1 %v4042_v20 }
 0x235   : > { %v1939_v26 = vrot.slane %v1925_v22, %v4345_v7  ;;  %v1940_v57 = vcombine.high %v1932_v23, %v1932_v23  ;;  %v1948_v27 = vrot.slane %v1932_v23, %v4345_v7  ;;  %3169 = vst.sshfl [vmem:[%s3986_s8 + $0x1] sm:$0x1 pattern:$0x73625140] %v1932_v23  ;;  %3429 = vmatprep.subr.bf16.mxu0 %v4014_v10 }
 0x236   : > { %3461 = vmatprep.subr.bf16.mxu1 %v4066_v28  ;;  %941 = vmatprep.mubr.f32.mxu0 %v3911_v8 }
 0x237   : > { %1012 = vmatprep.mubr.f32.mxu1 %v3911_v8  ;;  %v1941_v30 = vcombine.high %v1939_v26, %v1939_v26  ;;  %v1955_v31 = vrot.slane %v1939_v26, %v4345_v7  ;;  %v1962_v35 = vrot.slane %v1940_v57, %v4345_v7  ;;  %v1970_v37 = vcombine.high %v1948_v27, %v1948_v27 }
 0x238   : > { %3170 = vst.sshfl [vmem:[%s3986_s8 + $0x9] sm:$0x1 pattern:$0x73625140] %v1940_v57  ;;  %3431 = vmatpush1.bf16.msra.mxu0 %v4038_v18  ;;  %3463 = vmatpush1.bf16.msra.mxu1 %v4078_v32 }
 0x239   : > { %3171 = vst.sshfl [vmem:[%s3986_s8 + $0x21] sm:$0x1 pattern:$0x73625140] %v1939_v26  ;;  %v1969_v40 = vrot.slane %v1941_v30, %v4345_v7  ;;  %v1971_v43 = vcombine.high %v1955_v31, %v1955_v31  ;;  %v1972_v45 = vcombine.high %v1962_v35, %v1962_v35  ;;  %1984 = vst [vmem:[%s3986_s8 + $0x11] sm:$0x1] %v1970_v37  ;;  %3433 = vmatprep.subr.bf16.mxu0 %v4054_v24  ;;  %v864_v35 = vpop.permute.xlu1 %863 }
 0x23a   : > { %3172 = vst.sshfl [vmem:[%s3986_s8 + $0x29] sm:$0x1 pattern:$0x73625140] %v1941_v30  ;;  %3465 = vmatprep.subr.bf16.mxu1 %v4105_v41  ;;  %vm865_vm10 = vcmp.eq.s32.totalorder %v864_v35, 1 }
 0x23b   : > { %v1973_v47 = vcombine.high %v1969_v40, %v1969_v40  ;;  %1985 = vst [vmem:[%s3986_s8 + $0x19] sm:$0x1] %v1972_v45  ;;  %1988 = vst [vmem:[%s3986_s8 + $0x31] sm:$0x1] %v1971_v43 }
 0x23c   : > { %3435 = vmatpush1.bf16.msra.mxu0 %v4084_v34  ;;  %3467 = vmatpush1.bf16.msra.mxu1 %v4120_v46 }
 0x23d   : > { %1989 = vst [vmem:[%s3986_s8 + $0x39] sm:$0x1] %v1973_v47  ;;  %3437 = vmatprep.subr.bf16.mxu0 %v4097_v38  ;;  %3469 = vmatprep.subr.bf16.mxu1 %v4132_v50 }
 0x240   : > { %3439 = vmatpush1.bf16.msra.mxu0 %v4126_v48  ;;  %3471 = vmatpush1.bf16.msra.mxu1 %v4159_v59 }
 0x241   : > { %3441 = vmatprep.subr.bf16.mxu0 %v4141_v53  ;;  %3473 = vmatprep.subr.bf16.mxu1 %v4168_v62 }
 0x244   : > { %3443 = vmatpush1.bf16.msra.mxu0 %v4162_v60  ;;  %3475 = vmatpush1.bf16.msra.mxu1 %v4196_v11 }
 0x245   : > { %3445 = vmatprep.subr.bf16.mxu0 %v4177_v1  ;;  %3477 = vmatprep.subr.bf16.mxu1 %v4209_v17 }
 0x248   : > { %3447 = vmatpush1.bf16.msra.mxu0 %v4203_v15  ;;  %3479 = vmatpush1.bf16.msra.mxu1 %v4240_v33 }
 0x249   : > { %3449 = vmatprep.subr.bf16.mxu0 %v4218_v25  ;;  %3481 = vmatprep.subr.bf16.mxu1 %v4251_v39 }
 0x24c   : > { %3451 = vmatpush1.bf16.msra.mxu0 %v4245_v36  ;;  %3483 = vmatpush1.bf16.msra.mxu1 %v4276_v52 }
 0x24d   : > { %3453 = vmatprep.subr.bf16.mxu0 %v4260_v44  ;;  %3485 = vmatprep.subr.bf16.mxu1 %v4283_v55 }
 0x250   : > { %3455 = vmatpush1.bf16.msra.mxu0 %v4280_v54  ;;  %3487 = vmatpush1.bf16.msra.mxu1 %v4294_v63 }
 0x251   : > { %3489 = vmatprep.subr.bf16.mxu0 %v3999_v4  ;;  %3521 = vmatprep.subr.bf16.mxu1 %v4040_v19 }
 0x306   : > { %v760_v56 = vpop.f32.mrb[4].mxu0  ;;  %v831_v58 = vpop.f32.mrb[4].mxu1 }
 0x307   : > { %v836_v13 = vadd.f32 %v3137_v49, %v760_v56  ;;  %v762_v61 = vpop.f32.mrb[5].mxu0  ;;  %v833_v2 = vpop.f32.mrb[5].mxu1  ;;  %v838_v12 = vadd.f32 %v3139_v0, %v831_v58 }
 0x308   : > { %v837_v3 = vadd.f32 %v3138_v51, %v762_v61  ;;  %v839_v16 = vadd.f32 %v3140_v29, %v833_v2 }
 0x309   : > { %v840_v5 = vmul.f32 0.5, %v836_v13 }
 0x30a   : > { %v844_v6 = vmul.f32 0.5, %v837_v3  ;;  %v849_v14 = vmul.f32 0.5, %v839_v16 }
 0x30b   : > { %3810 = vtanh.f32 %v840_v5 }
 0x30c   : > { %3812 = vtanh.f32 %v844_v6 }
 0x30d   : > { %3814 = vtanh.f32 %v838_v12 }
 0x30e   : > { %3816 = vtanh.f32 %v849_v14 }
 0x315   : > { %v3811_v22 = vpop.eup %3810 }
 0x316   : > { %v3813_v23 = vpop.eup %3812  ;;  %v842_v26 = vmul.f32 0.5, %v3811_v22 }
 0x317   : > { %v846_v57 = vmul.f32 0.5, %v3813_v23  ;;  %v3815_v30 = vpop.eup %3814 }
 0x318   : > { %v843_v27 = vadd.f32 0.5, %v842_v26  ;;  %v3817_v47 = vpop.eup %3816 }
 0x319   : > { %v847_v31 = vadd.f32 0.5, %v846_v57  ;;  %v851_v61 = vmul.f32 0.5, %v3817_v47 }
 0x31a   : > { %v854_v37 = vmul.f32 %v3815_v30, %v843_v27 }
 0x31b   : > { %v853_v40 = vmul.f32 %v847_v31, %v4443_v42  ;;  %v852_v29 = vadd.f32 0.5, %v851_v61 }
 0x31d   : > { %v855_v43 = vadd.f32 %v854_v37, %v853_v40 }
 0x31f   : > { %3818 = vtanh.f32 %v855_v43  ;;  %v4526_v45 = vsel %vm865_vm10, %v855_v43, %v4443_v42 }
 0x320   : > { %v2126_v49 = vcombine.high %v4526_v45, %v4526_v45  ;;  %v2133_v51 = vrot.slane %v4526_v45, %v4345_v7 }
 0x322   : > { %v2140_v56 = vrot.slane %v2126_v49, %v4345_v7  ;;  %v2141_v58 = vcombine.high %v2133_v51, %v2133_v51  ;;  %v2149_v13 = vrot.slane %v2133_v51, %v4345_v7  ;;  %3181 = vst.sshfl [vmem:[%s3988_s9 + $0x2] sm:$0x1 pattern:$0x73625140] %v2133_v51 }
 0x324   : > { %v2142_v42 = vcombine.high %v2140_v56, %v2140_v56  ;;  %v2156_v2 = vrot.slane %v2140_v56, %v4345_v7  ;;  %v2163_v0 = vrot.slane %v2141_v58, %v4345_v7  ;;  %v2171_v3 = vcombine.high %v2149_v13, %v2149_v13  ;;  %3182 = vst.sshfl [vmem:[%s3988_s9 + $0xa] sm:$0x1 pattern:$0x73625140] %v2141_v58  ;;  %v3142_v58 = vld [vmem:[%s3984_s7 + $0x68] sm:$0xff] }
 0x325   : > { %3183 = vst.sshfl [vmem:[%s3988_s9 + $0x22] sm:$0x1 pattern:$0x73625140] %v2140_v56  ;;  %v3141_v56 = vld [vmem:[%s3984_s7 + $0x60] sm:$0xff] }
 0x326   : > { %v2170_v5 = vrot.slane %v2142_v42, %v4345_v7  ;;  %v2172_v6 = vcombine.high %v2156_v2, %v2156_v2  ;;  %v2173_v12 = vcombine.high %v2163_v0, %v2163_v0  ;;  %2185 = vst [vmem:[%s3988_s9 + $0x12] sm:$0x1] %v2171_v3  ;;  %3184 = vst.sshfl [vmem:[%s3988_s9 + $0x2a] sm:$0x1 pattern:$0x73625140] %v2142_v42 }
 0x327   : > { %v3143_v3 = vld [vmem:[%s3984_s7 + $0x70] sm:$0xff] }
 0x328   : > { %v2174_v16 = vcombine.high %v2170_v5, %v2170_v5  ;;  %2186 = vst [vmem:[%s3988_s9 + $0x1a] sm:$0x1] %v2173_v12  ;;  %2189 = vst [vmem:[%s3988_s9 + $0x32] sm:$0x1] %v2172_v6 }
 0x329   : > { %v3819_v14 = vpop.eup %3818 }
 0x32a   : > { %v857_v22 = vmul.f32 %v3819_v14, %v852_v29  ;;  %2190 = vst [vmem:[%s3988_s9 + $0x3a] sm:$0x1] %v2174_v16  ;;  %v3144_v16 = vld [vmem:[%s3984_s7 + $0x78] sm:$0xff] }
 0x32c   : > { %v4547_v23 = vsel %vm865_vm10, %v857_v22, %v4464_v21 }
 0x32d   : > { %v2059_v26 = vcombine.high %v4547_v23, %v4547_v23  ;;  %v2066_v57 = vrot.slane %v4547_v23, %v4345_v7  ;;  %942 = vmatmul.mubr.f32.vlgmr.msra.gmra.mrb[6].mxu0 %v4547_v23  ;;  %1013 = vmatmul.mubr.f32.vlgmr.msra.gmra.mrb[6].mxu1 %v4547_v23 }
 0x32e   : > { %3491 = vmatpush1.bf16.msra.mxu0 %v4012_v9  ;;  %3523 = vmatpush1.bf16.msra.mxu1 %v4042_v20 }
 0x32f   : > { %v2073_v27 = vrot.slane %v2059_v26, %v4345_v7  ;;  %v2074_v21 = vcombine.high %v2066_v57, %v2066_v57  ;;  %v2082_v30 = vrot.slane %v2066_v57, %v4345_v7  ;;  %3177 = vst.sshfl [vmem:[%s3986_s8 + $0x2] sm:$0x1 pattern:$0x73625140] %v2066_v57  ;;  %3493 = vmatprep.subr.bf16.mxu0 %v4014_v10 }
 0x330   : > { %3525 = vmatprep.subr.bf16.mxu1 %v4066_v28  ;;  %1124 = vmatprep.mubr.f32.mxu0 %v3911_v8 }
 0x331   : > { %1195 = vmatprep.mubr.f32.mxu1 %v3911_v8  ;;  %v2075_v31 = vcombine.high %v2073_v27, %v2073_v27  ;;  %v2089_v35 = vrot.slane %v2073_v27, %v4345_v7  ;;  %v2096_v37 = vrot.slane %v2074_v21, %v4345_v7  ;;  %v2104_v40 = vcombine.high %v2082_v30, %v2082_v30 }
 0x332   : > { %3178 = vst.sshfl [vmem:[%s3986_s8 + $0xa] sm:$0x1 pattern:$0x73625140] %v2074_v21  ;;  %3495 = vmatpush1.bf16.msra.mxu0 %v4038_v18  ;;  %3527 = vmatpush1.bf16.msra.mxu1 %v4078_v32 }
 0x333   : > { %3179 = vst.sshfl [vmem:[%s3986_s8 + $0x22] sm:$0x1 pattern:$0x73625140] %v2073_v27  ;;  %v2103_v43 = vrot.slane %v2075_v31, %v4345_v7  ;;  %v2105_v47 = vcombine.high %v2089_v35, %v2089_v35  ;;  %v2106_v49 = vcombine.high %v2096_v37, %v2096_v37  ;;  %2118 = vst [vmem:[%s3986_s8 + $0x12] sm:$0x1] %v2104_v40  ;;  %3497 = vmatprep.subr.bf16.mxu0 %v4054_v24 }
 0x334   : > { %3180 = vst.sshfl [vmem:[%s3986_s8 + $0x2a] sm:$0x1 pattern:$0x73625140] %v2075_v31  ;;  %3529 = vmatprep.subr.bf16.mxu1 %v4105_v41 }
 0x335   : > { %v2107_v51 = vcombine.high %v2103_v43, %v2103_v43  ;;  %2119 = vst [vmem:[%s3986_s8 + $0x1a] sm:$0x1] %v2106_v49  ;;  %2122 = vst [vmem:[%s3986_s8 + $0x32] sm:$0x1] %v2105_v47  ;;  %v1047_v43 = vpop.permute.xlu1 %1046 }
 0x336   : > { %3499 = vmatpush1.bf16.msra.mxu0 %v4084_v34  ;;  %3531 = vmatpush1.bf16.msra.mxu1 %v4120_v46  ;;  %vm1048_vm11 = vcmp.eq.s32.totalorder %v1047_v43, 1 }
 0x337   : > { %2123 = vst [vmem:[%s3986_s8 + $0x3a] sm:$0x1] %v2107_v51  ;;  %3501 = vmatprep.subr.bf16.mxu0 %v4097_v38  ;;  %3533 = vmatprep.subr.bf16.mxu1 %v4132_v50 }
 0x33a   : > { %3503 = vmatpush1.bf16.msra.mxu0 %v4126_v48  ;;  %3535 = vmatpush1.bf16.msra.mxu1 %v4159_v59 }
 0x33b   : > { %3505 = vmatprep.subr.bf16.mxu0 %v4141_v53  ;;  %3537 = vmatprep.subr.bf16.mxu1 %v4168_v62 }
 0x33e   : > { %3507 = vmatpush1.bf16.msra.mxu0 %v4162_v60  ;;  %3539 = vmatpush1.bf16.msra.mxu1 %v4196_v11 }
 0x33f   : > { %3509 = vmatprep.subr.bf16.mxu0 %v4177_v1  ;;  %3541 = vmatprep.subr.bf16.mxu1 %v4209_v17 }
 0x342   : > { %3511 = vmatpush1.bf16.msra.mxu0 %v4203_v15  ;;  %3543 = vmatpush1.bf16.msra.mxu1 %v4240_v33 }
 0x343   : > { %3513 = vmatprep.subr.bf16.mxu0 %v4218_v25  ;;  %3545 = vmatprep.subr.bf16.mxu1 %v4251_v39 }
 0x346   : > { %3515 = vmatpush1.bf16.msra.mxu0 %v4245_v36  ;;  %3547 = vmatpush1.bf16.msra.mxu1 %v4276_v52 }
 0x347   : > { %3517 = vmatprep.subr.bf16.mxu0 %v4260_v44  ;;  %3549 = vmatprep.subr.bf16.mxu1 %v4283_v55 }
 0x34a   : > { %3519 = vmatpush1.bf16.msra.mxu0 %v4280_v54  ;;  %3551 = vmatpush1.bf16.msra.mxu1 %v4294_v63 }
 0x34b   : > { %3553 = vmatprep.subr.bf16.mxu0 %v3999_v4  ;;  %3585 = vmatprep.subr.bf16.mxu1 %v4040_v19 }
 0x400   : > { %v943_v13 = vpop.f32.mrb[6].mxu0  ;;  %v1014_v61 = vpop.f32.mrb[6].mxu1 }
 0x401   : > { %v1019_v42 = vadd.f32 %v3141_v56, %v943_v13  ;;  %v945_v2 = vpop.f32.mrb[7].mxu0  ;;  %v1016_v0 = vpop.f32.mrb[7].mxu1  ;;  %v1021_v29 = vadd.f32 %v3143_v3, %v1014_v61 }
 0x402   : > { %v1020_v5 = vadd.f32 %v3142_v58, %v945_v2  ;;  %v1022_v14 = vadd.f32 %v3144_v16, %v1016_v0 }
 0x403   : > { %v1023_v6 = vmul.f32 0.5, %v1019_v42 }
 0x404   : > { %v1027_v12 = vmul.f32 0.5, %v1020_v5  ;;  %v1032_v22 = vmul.f32 0.5, %v1022_v14 }
 0x405   : > { %3820 = vtanh.f32 %v1023_v6 }
 0x406   : > { %3822 = vtanh.f32 %v1027_v12 }
 0x407   : > { %3824 = vtanh.f32 %v1021_v29 }
 0x408   : > { %3826 = vtanh.f32 %v1032_v22 }
 0x40f   : > { %v3821_v26 = vpop.eup %3820 }
 0x410   : > { %v3823_v57 = vpop.eup %3822  ;;  %v1025_v27 = vmul.f32 0.5, %v3821_v26 }
 0x411   : > { %v1029_v21 = vmul.f32 0.5, %v3823_v57  ;;  %v3825_v31 = vpop.eup %3824 }
 0x412   : > { %v1026_v30 = vadd.f32 0.5, %v1025_v27  ;;  %v3827_v51 = vpop.eup %3826 }
 0x413   : > { %v1030_v35 = vadd.f32 0.5, %v1029_v21  ;;  %v1034_v2 = vmul.f32 0.5, %v3827_v51 }
 0x414   : > { %v1037_v37 = vmul.f32 %v3825_v31, %v1026_v30 }
 0x415   : > { %v1036_v40 = vmul.f32 %v1030_v35, %v4526_v45  ;;  %v1035_v16 = vadd.f32 0.5, %v1034_v2 }
 0x417   : > { %v1038_v47 = vadd.f32 %v1037_v37, %v1036_v40 }
 0x419   : > { %3828 = vtanh.f32 %v1038_v47  ;;  %v4609_v49 = vsel %vm1048_vm11, %v1038_v47, %v4526_v45 }
 0x41a   : > { %v2260_v56 = vcombine.high %v4609_v49, %v4609_v49  ;;  %v2267_v58 = vrot.slane %v4609_v49, %v4345_v7 }
 0x41c   : > { %v2274_v13 = vrot.slane %v2260_v56, %v4345_v7  ;;  %v2275_v61 = vcombine.high %v2267_v58, %v2267_v58  ;;  %v2283_v42 = vrot.slane %v2267_v58, %v4345_v7  ;;  %3189 = vst.sshfl [vmem:[%s3988_s9 + $0x3] sm:$0x1 pattern:$0x73625140] %v2267_v58 }
 0x41e   : > { %v2276_v45 = vcombine.high %v2274_v13, %v2274_v13  ;;  %v2290_v0 = vrot.slane %v2274_v13, %v4345_v7  ;;  %v2297_v3 = vrot.slane %v2275_v61, %v4345_v7  ;;  %v2305_v5 = vcombine.high %v2283_v42, %v2283_v42  ;;  %3190 = vst.sshfl [vmem:[%s3988_s9 + $0xb] sm:$0x1 pattern:$0x73625140] %v2275_v61  ;;  %v3146_v61 = vld [vmem:[%s3984_s7 + $0x88] sm:$0xff] }
 0x41f   : > { %3191 = vst.sshfl [vmem:[%s3988_s9 + $0x23] sm:$0x1 pattern:$0x73625140] %v2274_v13  ;;  %v3145_v13 = vld [vmem:[%s3984_s7 + $0x80] sm:$0xff] }
 0x420   : > { %v2304_v6 = vrot.slane %v2276_v45, %v4345_v7  ;;  %v2306_v12 = vcombine.high %v2290_v0, %v2290_v0  ;;  %v2307_v29 = vcombine.high %v2297_v3, %v2297_v3  ;;  %2319 = vst [vmem:[%s3988_s9 + $0x13] sm:$0x1] %v2305_v5  ;;  %3192 = vst.sshfl [vmem:[%s3988_s9 + $0x2b] sm:$0x1 pattern:$0x73625140] %v2276_v45 }
 0x421   : > { %v3147_v5 = vld [vmem:[%s3984_s7 + $0x90] sm:$0xff] }
 0x422   : > { %v2308_v14 = vcombine.high %v2304_v6, %v2304_v6  ;;  %2320 = vst [vmem:[%s3988_s9 + $0x1b] sm:$0x1] %v2307_v29  ;;  %2323 = vst [vmem:[%s3988_s9 + $0x33] sm:$0x1] %v2306_v12 }
 0x423   : > { %v3829_v22 = vpop.eup %3828 }
 0x424   : > { %v1040_v26 = vmul.f32 %v3829_v22, %v1035_v16  ;;  %2324 = vst [vmem:[%s3988_s9 + $0x3b] sm:$0x1] %v2308_v14  ;;  %v3148_v14 = vld [vmem:[%s3984_s7 + $0x98] sm:$0xff] }
 0x426   : > { %v4630_v57 = vsel %vm1048_vm11, %v1040_v26, %v4547_v23 }
 0x427   : > { %1125 = vmatmul.mubr.f32.vlgmr.msra.gmra.mrb[8].mxu0 %v4630_v57  ;;  %v2193_v27 = vcombine.high %v4630_v57, %v4630_v57  ;;  %v2200_v21 = vrot.slane %v4630_v57, %v4345_v7  ;;  %1196 = vmatmul.mubr.f32.vlgmr.msra.gmra.mrb[8].mxu1 %v4630_v57 }
 0x428   : > { %3555 = vmatpush1.bf16.msra.mxu0 %v4012_v9  ;;  %3587 = vmatpush1.bf16.msra.mxu1 %v4042_v20 }
 0x429   : > { %v2207_v30 = vrot.slane %v2193_v27, %v4345_v7  ;;  %v2208_v23 = vcombine.high %v2200_v21, %v2200_v21  ;;  %v2216_v31 = vrot.slane %v2200_v21, %v4345_v7  ;;  %3185 = vst.sshfl [vmem:[%s3986_s8 + $0x3] sm:$0x1 pattern:$0x73625140] %v2200_v21  ;;  %3557 = vmatprep.subr.bf16.mxu0 %v4014_v10 }
 0x42a   : > { %3589 = vmatprep.subr.bf16.mxu1 %v4066_v28  ;;  %1307 = vmatprep.mubr.f32.mxu0 %v3911_v8 }
 0x42b   : > { %1378 = vmatprep.mubr.f32.mxu1 %v3911_v8  ;;  %v2209_v35 = vcombine.high %v2207_v30, %v2207_v30  ;;  %v2223_v37 = vrot.slane %v2207_v30, %v4345_v7  ;;  %v2230_v40 = vrot.slane %v2208_v23, %v4345_v7  ;;  %v2238_v43 = vcombine.high %v2216_v31, %v2216_v31 }
 0x42c   : > { %3186 = vst.sshfl [vmem:[%s3986_s8 + $0xb] sm:$0x1 pattern:$0x73625140] %v2208_v23  ;;  %3559 = vmatpush1.bf16.msra.mxu0 %v4038_v18  ;;  %3591 = vmatpush1.bf16.msra.mxu1 %v4078_v32 }
 0x42d   : > { %3187 = vst.sshfl [vmem:[%s3986_s8 + $0x23] sm:$0x1 pattern:$0x73625140] %v2207_v30  ;;  %v2237_v47 = vrot.slane %v2209_v35, %v4345_v7  ;;  %v2239_v51 = vcombine.high %v2223_v37, %v2223_v37  ;;  %v2240_v56 = vcombine.high %v2230_v40, %v2230_v40  ;;  %2252 = vst [vmem:[%s3986_s8 + $0x13] sm:$0x1] %v2238_v43  ;;  %3561 = vmatprep.subr.bf16.mxu0 %v4054_v24 }
 0x42e   : > { %3188 = vst.sshfl [vmem:[%s3986_s8 + $0x2b] sm:$0x1 pattern:$0x73625140] %v2209_v35  ;;  %3593 = vmatprep.subr.bf16.mxu1 %v4105_v41 }
 0x42f   : > { %v2241_v58 = vcombine.high %v2237_v47, %v2237_v47  ;;  %2253 = vst [vmem:[%s3986_s8 + $0x1b] sm:$0x1] %v2240_v56  ;;  %2256 = vst [vmem:[%s3986_s8 + $0x33] sm:$0x1] %v2239_v51  ;;  %v1230_v47 = vpop.permute.xlu0 %1229 }
 0x430   : > { %3563 = vmatpush1.bf16.msra.mxu0 %v4084_v34  ;;  %3595 = vmatpush1.bf16.msra.mxu1 %v4120_v46  ;;  %vm1231_vm12 = vcmp.eq.s32.totalorder %v1230_v47, 1 }
 0x431   : > { %2257 = vst [vmem:[%s3986_s8 + $0x3b] sm:$0x1] %v2241_v58  ;;  %3565 = vmatprep.subr.bf16.mxu0 %v4097_v38  ;;  %3597 = vmatprep.subr.bf16.mxu1 %v4132_v50 }
 0x434   : > { %3567 = vmatpush1.bf16.msra.mxu0 %v4126_v48  ;;  %3599 = vmatpush1.bf16.msra.mxu1 %v4159_v59 }
 0x435   : > { %3569 = vmatprep.subr.bf16.mxu0 %v4141_v53  ;;  %3601 = vmatprep.subr.bf16.mxu1 %v4168_v62 }
 0x438   : > { %3571 = vmatpush1.bf16.msra.mxu0 %v4162_v60  ;;  %3603 = vmatpush1.bf16.msra.mxu1 %v4196_v11 }
 0x439   : > { %3573 = vmatprep.subr.bf16.mxu0 %v4177_v1  ;;  %3605 = vmatprep.subr.bf16.mxu1 %v4209_v17 }
 0x43c   : > { %3575 = vmatpush1.bf16.msra.mxu0 %v4203_v15  ;;  %3607 = vmatpush1.bf16.msra.mxu1 %v4240_v33 }
 0x43d   : > { %3577 = vmatprep.subr.bf16.mxu0 %v4218_v25  ;;  %3609 = vmatprep.subr.bf16.mxu1 %v4251_v39 }
 0x440   : > { %3579 = vmatpush1.bf16.msra.mxu0 %v4245_v36  ;;  %3611 = vmatpush1.bf16.msra.mxu1 %v4276_v52 }
 0x441   : > { %3581 = vmatprep.subr.bf16.mxu0 %v4260_v44  ;;  %3613 = vmatprep.subr.bf16.mxu1 %v4283_v55 }
 0x444   : > { %3583 = vmatpush1.bf16.msra.mxu0 %v4280_v54  ;;  %3615 = vmatpush1.bf16.msra.mxu1 %v4294_v63 }
 0x445   : > { %3617 = vmatprep.subr.bf16.mxu0 %v3999_v4  ;;  %3649 = vmatprep.subr.bf16.mxu1 %v4040_v19 }
 0x4fa   : > { %v1126_v42 = vpop.f32.mrb[8].mxu0  ;;  %v1197_v2 = vpop.f32.mrb[8].mxu1 }
 0x4fb   : > { %v1202_v45 = vadd.f32 %v3145_v13, %v1126_v42  ;;  %v1128_v0 = vpop.f32.mrb[9].mxu0  ;;  %v1199_v3 = vpop.f32.mrb[9].mxu1  ;;  %v1204_v16 = vadd.f32 %v3147_v5, %v1197_v2 }
 0x4fc   : > { %v1203_v6 = vadd.f32 %v3146_v61, %v1128_v0  ;;  %v1205_v22 = vadd.f32 %v3148_v14, %v1199_v3 }
 0x4fd   : > { %v1206_v12 = vmul.f32 0.5, %v1202_v45 }
 0x4fe   : > { %v1210_v29 = vmul.f32 0.5, %v1203_v6  ;;  %v1215_v26 = vmul.f32 0.5, %v1205_v22 }
 0x4ff   : > { %3830 = vtanh.f32 %v1206_v12 }
 0x500   : > { %3832 = vtanh.f32 %v1210_v29 }
 0x501   : > { %3834 = vtanh.f32 %v1204_v16 }
 0x502   : > { %3836 = vtanh.f32 %v1215_v26 }
 0x509   : > { %v3831_v27 = vpop.eup %3830 }
 0x50a   : > { %v3833_v21 = vpop.eup %3832  ;;  %v1208_v30 = vmul.f32 0.5, %v3831_v27 }
 0x50b   : > { %v1212_v23 = vmul.f32 0.5, %v3833_v21  ;;  %v3835_v35 = vpop.eup %3834 }
 0x50c   : > { %v1209_v31 = vadd.f32 0.5, %v1208_v30  ;;  %v3837_v58 = vpop.eup %3836 }
 0x50d   : > { %v1213_v37 = vadd.f32 0.5, %v1212_v23  ;;  %v1217_v0 = vmul.f32 0.5, %v3837_v58 }
 0x50e   : > { %v1220_v40 = vmul.f32 %v3835_v35, %v1209_v31 }
 0x50f   : > { %v1219_v43 = vmul.f32 %v1213_v37, %v4609_v49  ;;  %v1218_v14 = vadd.f32 0.5, %v1217_v0 }
 0x511   : > { %v1221_v51 = vadd.f32 %v1220_v40, %v1219_v43 }
 0x513   : > { %3838 = vtanh.f32 %v1221_v51  ;;  %v4692_v56 = vsel %vm1231_vm12, %v1221_v51, %v4609_v49 }
 0x514   : > { %v2394_v13 = vcombine.high %v4692_v56, %v4692_v56  ;;  %v2401_v61 = vrot.slane %v4692_v56, %v4345_v7 }
 0x516   : > { %v2408_v42 = vrot.slane %v2394_v13, %v4345_v7  ;;  %v2409_v2 = vcombine.high %v2401_v61, %v2401_v61  ;;  %v2417_v45 = vrot.slane %v2401_v61, %v4345_v7  ;;  %3197 = vst.sshfl [vmem:[%s3988_s9 + $0x4] sm:$0x1 pattern:$0x73625140] %v2401_v61 }
 0x518   : > { %v2410_v49 = vcombine.high %v2408_v42, %v2408_v42  ;;  %v2424_v3 = vrot.slane %v2408_v42, %v4345_v7  ;;  %v2431_v5 = vrot.slane %v2409_v2, %v4345_v7  ;;  %v2439_v6 = vcombine.high %v2417_v45, %v2417_v45  ;;  %3198 = vst.sshfl [vmem:[%s3988_s9 + $0xc] sm:$0x1 pattern:$0x73625140] %v2409_v2  ;;  %v3150_v2 = vld [vmem:[%s3984_s7 + $0xa8] sm:$0xff] }
 0x519   : > { %3199 = vst.sshfl [vmem:[%s3988_s9 + $0x24] sm:$0x1 pattern:$0x73625140] %v2408_v42  ;;  %v3149_v42 = vld [vmem:[%s3984_s7 + $0xa0] sm:$0xff] }
 0x51a   : > { %v2438_v12 = vrot.slane %v2410_v49, %v4345_v7  ;;  %v2440_v29 = vcombine.high %v2424_v3, %v2424_v3  ;;  %v2441_v16 = vcombine.high %v2431_v5, %v2431_v5  ;;  %2453 = vst [vmem:[%s3988_s9 + $0x14] sm:$0x1] %v2439_v6  ;;  %3200 = vst.sshfl [vmem:[%s3988_s9 + $0x2c] sm:$0x1 pattern:$0x73625140] %v2410_v49 }
 0x51b   : > { %v3151_v6 = vld [vmem:[%s3984_s7 + $0xb0] sm:$0xff] }
 0x51c   : > { %v2442_v22 = vcombine.high %v2438_v12, %v2438_v12  ;;  %2454 = vst [vmem:[%s3988_s9 + $0x1c] sm:$0x1] %v2441_v16  ;;  %2457 = vst [vmem:[%s3988_s9 + $0x34] sm:$0x1] %v2440_v29 }
 0x51d   : > { %v3839_v26 = vpop.eup %3838 }
 0x51e   : > { %v1223_v27 = vmul.f32 %v3839_v26, %v1218_v14  ;;  %2458 = vst [vmem:[%s3988_s9 + $0x3c] sm:$0x1] %v2442_v22  ;;  %v3152_v22 = vld [vmem:[%s3984_s7 + $0xb8] sm:$0xff] }
 0x520   : > { %v4713_v21 = vsel %vm1231_vm12, %v1223_v27, %v4630_v57 }
 0x521   : > { %1308 = vmatmul.mubr.f32.vlgmr.msra.gmra.mrb[10].mxu0 %v4713_v21  ;;  %v2327_v30 = vcombine.high %v4713_v21, %v4713_v21  ;;  %v2334_v23 = vrot.slane %v4713_v21, %v4345_v7  ;;  %1379 = vmatmul.mubr.f32.vlgmr.msra.gmra.mrb[10].mxu1 %v4713_v21 }
 0x522   : > { %3619 = vmatpush1.bf16.msra.mxu0 %v4012_v9  ;;  %3651 = vmatpush1.bf16.msra.mxu1 %v4042_v20 }
 0x523   : > { %v2341_v31 = vrot.slane %v2327_v30, %v4345_v7  ;;  %v2342_v57 = vcombine.high %v2334_v23, %v2334_v23  ;;  %v2350_v35 = vrot.slane %v2334_v23, %v4345_v7  ;;  %3193 = vst.sshfl [vmem:[%s3986_s8 + $0x4] sm:$0x1 pattern:$0x73625140] %v2334_v23  ;;  %3621 = vmatprep.subr.bf16.mxu0 %v4014_v10 }
 0x524   : > { %3653 = vmatprep.subr.bf16.mxu1 %v4066_v28  ;;  %1490 = vmatprep.mubr.f32.mxu0 %v3911_v8 }
 0x525   : > { %1561 = vmatprep.mubr.f32.mxu1 %v3911_v8  ;;  %v2343_v37 = vcombine.high %v2341_v31, %v2341_v31  ;;  %v2357_v40 = vrot.slane %v2341_v31, %v4345_v7  ;;  %v2364_v43 = vrot.slane %v2342_v57, %v4345_v7  ;;  %v2372_v47 = vcombine.high %v2350_v35, %v2350_v35 }
 0x526   : > { %3194 = vst.sshfl [vmem:[%s3986_s8 + $0xc] sm:$0x1 pattern:$0x73625140] %v2342_v57  ;;  %3623 = vmatpush1.bf16.msra.mxu0 %v4038_v18  ;;  %3655 = vmatpush1.bf16.msra.mxu1 %v4078_v32 }
 0x527   : > { %3195 = vst.sshfl [vmem:[%s3986_s8 + $0x24] sm:$0x1 pattern:$0x73625140] %v2341_v31  ;;  %v2371_v51 = vrot.slane %v2343_v37, %v4345_v7  ;;  %v2373_v58 = vcombine.high %v2357_v40, %v2357_v40  ;;  %v2374_v13 = vcombine.high %v2364_v43, %v2364_v43  ;;  %2386 = vst [vmem:[%s3986_s8 + $0x14] sm:$0x1] %v2372_v47  ;;  %3625 = vmatprep.subr.bf16.mxu0 %v4054_v24  ;;  %v1413_v43 = vpop.permute.xlu1 %1412 }
 0x528   : > { %3196 = vst.sshfl [vmem:[%s3986_s8 + $0x2c] sm:$0x1 pattern:$0x73625140] %v2343_v37  ;;  %3657 = vmatprep.subr.bf16.mxu1 %v4105_v41  ;;  %vm1414_vm13 = vcmp.eq.s32.totalorder %v1413_v43, 1 }
 0x529   : > { %v2375_v61 = vcombine.high %v2371_v51, %v2371_v51  ;;  %2387 = vst [vmem:[%s3986_s8 + $0x1c] sm:$0x1] %v2374_v13  ;;  %2390 = vst [vmem:[%s3986_s8 + $0x34] sm:$0x1] %v2373_v58 }
 0x52a   : > { %3627 = vmatpush1.bf16.msra.mxu0 %v4084_v34  ;;  %3659 = vmatpush1.bf16.msra.mxu1 %v4120_v46 }
 0x52b   : > { %2391 = vst [vmem:[%s3986_s8 + $0x3c] sm:$0x1] %v2375_v61  ;;  %3629 = vmatprep.subr.bf16.mxu0 %v4097_v38  ;;  %3661 = vmatprep.subr.bf16.mxu1 %v4132_v50 }
 0x52e   : > { %3631 = vmatpush1.bf16.msra.mxu0 %v4126_v48  ;;  %3663 = vmatpush1.bf16.msra.mxu1 %v4159_v59 }
 0x52f   : > { %3633 = vmatprep.subr.bf16.mxu0 %v4141_v53  ;;  %3665 = vmatprep.subr.bf16.mxu1 %v4168_v62 }
 0x532   : > { %3635 = vmatpush1.bf16.msra.mxu0 %v4162_v60  ;;  %3667 = vmatpush1.bf16.msra.mxu1 %v4196_v11 }
 0x533   : > { %3637 = vmatprep.subr.bf16.mxu0 %v4177_v1  ;;  %3669 = vmatprep.subr.bf16.mxu1 %v4209_v17 }
 0x536   : > { %3639 = vmatpush1.bf16.msra.mxu0 %v4203_v15  ;;  %3671 = vmatpush1.bf16.msra.mxu1 %v4240_v33 }
 0x537   : > { %3641 = vmatprep.subr.bf16.mxu0 %v4218_v25  ;;  %3673 = vmatprep.subr.bf16.mxu1 %v4251_v39 }
 0x53a   : > { %3643 = vmatpush1.bf16.msra.mxu0 %v4245_v36  ;;  %3675 = vmatpush1.bf16.msra.mxu1 %v4276_v52 }
 0x53b   : > { %3645 = vmatprep.subr.bf16.mxu0 %v4260_v44  ;;  %3677 = vmatprep.subr.bf16.mxu1 %v4283_v55 }
 0x53e   : > { %3647 = vmatpush1.bf16.msra.mxu0 %v4280_v54  ;;  %3679 = vmatpush1.bf16.msra.mxu1 %v4294_v63 }
 0x53f   : > { %3681 = vmatprep.subr.bf16.mxu0 %v3999_v4  ;;  %3713 = vmatprep.subr.bf16.mxu1 %v4040_v19 }
 0x5f4   : > { %v1309_v45 = vpop.f32.mrb[10].mxu0  ;;  %v1380_v0 = vpop.f32.mrb[10].mxu1 }
 0x5f5   : > { %v1385_v49 = vadd.f32 %v3149_v42, %v1309_v45  ;;  %v1311_v3 = vpop.f32.mrb[11].mxu0  ;;  %v1382_v5 = vpop.f32.mrb[11].mxu1  ;;  %v1387_v14 = vadd.f32 %v3151_v6, %v1380_v0 }
 0x5f6   : > { %v1386_v12 = vadd.f32 %v3150_v2, %v1311_v3  ;;  %v1388_v26 = vadd.f32 %v3152_v22, %v1382_v5 }
 0x5f7   : > { %v1389_v29 = vmul.f32 0.5, %v1385_v49 }
 0x5f8   : > { %v1393_v16 = vmul.f32 0.5, %v1386_v12  ;;  %v1398_v4 = vmul.f32 0.5, %v1388_v26 }
 0x5f9   : > { %3840 = vtanh.f32 %v1389_v29 }
 0x5fa   : > { %3842 = vtanh.f32 %v1393_v16 }
 0x5fb   : > { %3844 = vtanh.f32 %v1387_v14 }
 0x5fc   : > { %3846 = vtanh.f32 %v1398_v4 }
 0x603   : > { %v3841_v27 = vpop.eup %3840 }
 0x604   : > { %v3843_v19 = vpop.eup %3842  ;;  %v1391_v30 = vmul.f32 0.5, %v3841_v27 }
 0x605   : > { %v1395_v23 = vmul.f32 0.5, %v3843_v19  ;;  %v3845_v57 = vpop.eup %3844 }
 0x606   : > { %v1392_v31 = vadd.f32 0.5, %v1391_v30  ;;  %v3847_v58 = vpop.eup %3846 }
 0x607   : > { %v1396_v35 = vadd.f32 0.5, %v1395_v23  ;;  %v1400_v0 = vmul.f32 0.5, %v3847_v58 }
 0x608   : > { %v1403_v37 = vmul.f32 %v3845_v57, %v1392_v31 }
 0x609   : > { %v1402_v40 = vmul.f32 %v1396_v35, %v4692_v56  ;;  %v1401_v16 = vadd.f32 0.5, %v1400_v0 }
 0x60b   : > { %v1404_v47 = vadd.f32 %v1403_v37, %v1402_v40 }
 0x60d   : > { %3848 = vtanh.f32 %v1404_v47  ;;  %v4775_v51 = vsel %vm1414_vm13, %v1404_v47, %v4692_v56 }
 0x60e   : > { %v2528_v13 = vcombine.high %v4775_v51, %v4775_v51  ;;  %v2535_v61 = vrot.slane %v4775_v51, %v4345_v7 }
 0x610   : > { %v2542_v42 = vrot.slane %v2528_v13, %v4345_v7  ;;  %v2543_v2 = vcombine.high %v2535_v61, %v2535_v61  ;;  %v2551_v45 = vrot.slane %v2535_v61, %v4345_v7  ;;  %3205 = vst.sshfl [vmem:[%s3988_s9 + $0x5] sm:$0x1 pattern:$0x73625140] %v2535_v61 }
 0x612   : > { %v2544_v56 = vcombine.high %v2542_v42, %v2542_v42  ;;  %v2558_v49 = vrot.slane %v2542_v42, %v4345_v7  ;;  %v2565_v3 = vrot.slane %v2543_v2, %v4345_v7  ;;  %v2573_v5 = vcombine.high %v2551_v45, %v2551_v45  ;;  %3206 = vst.sshfl [vmem:[%s3988_s9 + $0xd] sm:$0x1 pattern:$0x73625140] %v2543_v2 }
 0x613   : > { %3207 = vst.sshfl [vmem:[%s3988_s9 + $0x25] sm:$0x1 pattern:$0x73625140] %v2542_v42 }
 0x614   : > { %v2572_v6 = vrot.slane %v2544_v56, %v4345_v7  ;;  %v2574_v12 = vcombine.high %v2558_v49, %v2558_v49  ;;  %v2575_v29 = vcombine.high %v2565_v3, %v2565_v3  ;;  %2587 = vst [vmem:[%s3988_s9 + $0x15] sm:$0x1] %v2573_v5  ;;  %3208 = vst.sshfl [vmem:[%s3988_s9 + $0x2d] sm:$0x1 pattern:$0x73625140] %v2544_v56 }
 0x616   : > { %v2576_v14 = vcombine.high %v2572_v6, %v2572_v6  ;;  %2588 = vst [vmem:[%s3988_s9 + $0x1d] sm:$0x1] %v2575_v29  ;;  %2591 = vst [vmem:[%s3988_s9 + $0x35] sm:$0x1] %v2574_v12 }
 0x617   : > { %v3849_v22 = vpop.eup %3848 }
 0x618   : > { %v1406_v26 = vmul.f32 %v3849_v22, %v1401_v16  ;;  %2592 = vst [vmem:[%s3988_s9 + $0x3d] sm:$0x1] %v2576_v14 }
 0x61a   : > { %v4796_v4 = vsel %vm1414_vm13, %v1406_v26, %v4713_v21 }
 0x61b   : > { %1491 = vmatmul.mubr.f32.vlgmr.msra.gmra.mrb[12].mxu0 %v4796_v4  ;;  %v2461_v27 = vcombine.high %v4796_v4, %v4796_v4  ;;  %v2468_v19 = vrot.slane %v4796_v4, %v4345_v7  ;;  %1562 = vmatmul.mubr.f32.vlgmr.msra.gmra.mrb[12].mxu1 %v4796_v4 }
 0x61c   : > { %3683 = vmatpush1.bf16.msra.mxu0 %v4012_v9  ;;  %3715 = vmatpush1.bf16.msra.mxu1 %v4042_v20 }
 0x61d   : > { %v2475_v30 = vrot.slane %v2461_v27, %v4345_v7  ;;  %v2476_v21 = vcombine.high %v2468_v19, %v2468_v19  ;;  %v2484_v23 = vrot.slane %v2468_v19, %v4345_v7  ;;  %3201 = vst.sshfl [vmem:[%s3986_s8 + $0x5] sm:$0x1 pattern:$0x73625140] %v2468_v19  ;;  %3685 = vmatprep.subr.bf16.mxu0 %v4014_v10 }
 0x61e   : > { %3717 = vmatprep.subr.bf16.mxu1 %v4066_v28  ;;  %1673 = vmatprep.mubr.f32.mxu0 %v3911_v8 }
 0x61f   : > { %1744 = vmatprep.mubr.f32.mxu1 %v3911_v8  ;;  %v2477_v31 = vcombine.high %v2475_v30, %v2475_v30  ;;  %v2491_v9 = vrot.slane %v2475_v30, %v4345_v7  ;;  %v2498_v20 = vrot.slane %v2476_v21, %v4345_v7  ;;  %v2506_v57 = vcombine.high %v2484_v23, %v2484_v23 }
 0x620   : > { %3202 = vst.sshfl [vmem:[%s3986_s8 + $0xd] sm:$0x1 pattern:$0x73625140] %v2476_v21  ;;  %3687 = vmatpush1.bf16.msra.mxu0 %v4038_v18  ;;  %3719 = vmatpush1.bf16.msra.mxu1 %v4078_v32  ;;  %v3153_v18 = vld [vmem:[%s3984_s7 + $0xc0] sm:$0xff] }
 0x621   : > { %3203 = vst.sshfl [vmem:[%s3986_s8 + $0x25] sm:$0x1 pattern:$0x73625140] %v2475_v30  ;;  %v2505_v10 = vrot.slane %v2477_v31, %v4345_v7  ;;  %v2507_v28 = vcombine.high %v2491_v9, %v2491_v9  ;;  %v2508_v35 = vcombine.high %v2498_v20, %v2498_v20  ;;  %2520 = vst [vmem:[%s3986_s8 + $0x15] sm:$0x1] %v2506_v57  ;;  %3689 = vmatprep.subr.bf16.mxu0 %v4054_v24 }
 0x622   : > { %3204 = vst.sshfl [vmem:[%s3986_s8 + $0x2d] sm:$0x1 pattern:$0x73625140] %v2477_v31  ;;  %3721 = vmatprep.subr.bf16.mxu1 %v4105_v41  ;;  %v3154_v24 = vld [vmem:[%s3984_s7 + $0xc8] sm:$0xff] }
 0x623   : > { %v2509_v8 = vcombine.high %v2505_v10, %v2505_v10  ;;  %2521 = vst [vmem:[%s3986_s8 + $0x1d] sm:$0x1] %v2508_v35  ;;  %2524 = vst [vmem:[%s3986_s8 + $0x35] sm:$0x1] %v2507_v28  ;;  %v3157_v10 = vld [vmem:[%s3984_s7 + $0xe0] sm:$0xff]  ;;  %v3158_v28 = vld [vmem:[%s3984_s7 + $0xe8] sm:$0xff] }
 0x624   : > { %3691 = vmatpush1.bf16.msra.mxu0 %v4084_v34  ;;  %3723 = vmatpush1.bf16.msra.mxu1 %v4120_v46 }
 0x625   : > { %2525 = vst [vmem:[%s3986_s8 + $0x3d] sm:$0x1] %v2509_v8  ;;  %3693 = vmatprep.subr.bf16.mxu0 %v4097_v38  ;;  %3725 = vmatprep.subr.bf16.mxu1 %v4132_v50 }
 0x628   : > { %3695 = vmatpush1.bf16.msra.mxu0 %v4126_v48  ;;  %3727 = vmatpush1.bf16.msra.mxu1 %v4159_v59  ;;  %v3155_v48 = vld [vmem:[%s3984_s7 + $0xd0] sm:$0xff] }
 0x629   : > { %3697 = vmatprep.subr.bf16.mxu0 %v4141_v53  ;;  %3729 = vmatprep.subr.bf16.mxu1 %v4168_v62  ;;  %v3156_v62 = vld [vmem:[%s3984_s7 + $0xd8] sm:$0xff] }
 0x62c   : > { %3699 = vmatpush1.bf16.msra.mxu0 %v4162_v60  ;;  %3731 = vmatpush1.bf16.msra.mxu1 %v4196_v11 }
 0x62d   : > { %3701 = vmatprep.subr.bf16.mxu0 %v4177_v1  ;;  %3733 = vmatprep.subr.bf16.mxu1 %v4209_v17 }
 0x630   : > { %3703 = vmatpush1.bf16.msra.mxu0 %v4203_v15  ;;  %3735 = vmatpush1.bf16.msra.mxu1 %v4240_v33 }
 0x631   : > { %3705 = vmatprep.subr.bf16.mxu0 %v4218_v25  ;;  %3737 = vmatprep.subr.bf16.mxu1 %v4251_v39 }
 0x634   : > { %3707 = vmatpush1.bf16.msra.mxu0 %v4245_v36  ;;  %3739 = vmatpush1.bf16.msra.mxu1 %v4276_v52 }
 0x635   : > { %3709 = vmatprep.subr.bf16.mxu0 %v4260_v44  ;;  %3741 = vmatprep.subr.bf16.mxu1 %v4283_v55 }
 0x638   : > { %3711 = vmatpush1.bf16.msra.mxu0 %v4280_v54  ;;  %3743 = vmatpush1.bf16.msra.mxu1 %v4294_v63  ;;  %v1596_v54 = vpop.permute.xlu0 %1595 }
 0x639   : > { %vm1597_vm14 = vcmp.eq.s32.totalorder %v1596_v54, 1 }
 0x6ee   : > { %v1492_v32 = vpop.f32.mrb[12].mxu0  ;;  %v1563_v34 = vpop.f32.mrb[12].mxu1 }
 0x6ef   : > { %v1568_v38 = vadd.f32 %v3153_v18, %v1492_v32  ;;  %v1494_v41 = vpop.f32.mrb[13].mxu0  ;;  %v1565_v46 = vpop.f32.mrb[13].mxu1  ;;  %v1570_v60 = vadd.f32 %v3155_v48, %v1563_v34  ;;  %v3159_v34 = vld [vmem:[%s3984_s7 + $0xf0] sm:$0xff] }
 0x6f0   : > { %v1569_v50 = vadd.f32 %v3154_v24, %v1494_v41  ;;  %v1571_v1 = vadd.f32 %v3156_v62, %v1565_v46 }
 0x6f1   : > { %v1572_v53 = vmul.f32 0.5, %v1568_v38 }
 0x6f2   : > { %v1576_v59 = vmul.f32 0.5, %v1569_v50  ;;  %v1581_v11 = vmul.f32 0.5, %v1571_v1  ;;  %v3160_v50 = vld [vmem:[%s3984_s7 + $0xf8] sm:$0xff] }
 0x6f3   : > { %3850 = vtanh.f32 %v1572_v53 }
 0x6f4   : > { %3852 = vtanh.f32 %v1576_v59 }
 0x6f5   : > { %3854 = vtanh.f32 %v1570_v60 }
 0x6f6   : > { %3856 = vtanh.f32 %v1581_v11 }
 0x6fd   : > { %v3851_v15 = vpop.eup %3850 }
 0x6fe   : > { %v3853_v17 = vpop.eup %3852  ;;  %v1574_v25 = vmul.f32 0.5, %v3851_v15 }
 0x6ff   : > { %v1578_v33 = vmul.f32 0.5, %v3853_v17  ;;  %v3855_v39 = vpop.eup %3854 }
 0x700   : > { %v1575_v36 = vadd.f32 0.5, %v1574_v25  ;;  %v3857_v40 = vpop.eup %3856 }
 0x701   : > { %v1579_v44 = vadd.f32 0.5, %v1578_v33  ;;  %v1583_v42 = vmul.f32 0.5, %v3857_v40 }
 0x702   : > { %v1586_v52 = vmul.f32 %v3855_v39, %v1575_v36  ;;  %v1779_v36 = vpop.permute.xlu1 %1778 }
 0x703   : > { %v1585_v55 = vmul.f32 %v1579_v44, %v4775_v51  ;;  %v1584_v5 = vadd.f32 0.5, %v1583_v42  ;;  %vm1780_vm15 = vcmp.eq.s32.totalorder %v1779_v36, 1 }
 0x705   : > { %v1587_v63 = vadd.f32 %v1586_v52, %v1585_v55 }
 0x707   : > { %3858 = vtanh.f32 %v1587_v63  ;;  %v4856_v37 = vsel %vm1597_vm14, %v1587_v63, %v4775_v51 }
 0x708   : > { %v2662_v43 = vcombine.high %v4856_v37, %v4856_v37  ;;  %v2669_v47 = vrot.slane %v4856_v37, %v4345_v7 }
 0x70a   : > { %v2676_v58 = vrot.slane %v2662_v43, %v4345_v7  ;;  %v2677_v13 = vcombine.high %v2669_v47, %v2669_v47  ;;  %v2685_v61 = vrot.slane %v2669_v47, %v4345_v7  ;;  %3213 = vst.sshfl [vmem:[%s3988_s9 + $0x6] sm:$0x1 pattern:$0x73625140] %v2669_v47 }
 0x70c   : > { %v2678_v51 = vcombine.high %v2676_v58, %v2676_v58  ;;  %v2692_v2 = vrot.slane %v2676_v58, %v4345_v7  ;;  %v2699_v45 = vrot.slane %v2677_v13, %v4345_v7  ;;  %v2707_v0 = vcombine.high %v2685_v61, %v2685_v61  ;;  %3214 = vst.sshfl [vmem:[%s3988_s9 + $0xe] sm:$0x1 pattern:$0x73625140] %v2677_v13 }
 0x70d   : > { %3215 = vst.sshfl [vmem:[%s3988_s9 + $0x26] sm:$0x1 pattern:$0x73625140] %v2676_v58 }
 0x70e   : > { %v2706_v56 = vrot.slane %v2678_v51, %v4345_v7  ;;  %v2708_v49 = vcombine.high %v2692_v2, %v2692_v2  ;;  %v2709_v3 = vcombine.high %v2699_v45, %v2699_v45  ;;  %2721 = vst [vmem:[%s3988_s9 + $0x16] sm:$0x1] %v2707_v0  ;;  %3216 = vst.sshfl [vmem:[%s3988_s9 + $0x2e] sm:$0x1 pattern:$0x73625140] %v2678_v51 }
 0x710   : > { %v2710_v6 = vcombine.high %v2706_v56, %v2706_v56  ;;  %2722 = vst [vmem:[%s3988_s9 + $0x1e] sm:$0x1] %v2709_v3  ;;  %2725 = vst [vmem:[%s3988_s9 + $0x36] sm:$0x1] %v2708_v49 }
 0x711   : > { %v3859_v12 = vpop.eup %3858 }
 0x712   : > { %v1589_v29 = vmul.f32 %v3859_v12, %v1584_v5  ;;  %2726 = vst [vmem:[%s3988_s9 + $0x3e] sm:$0x1] %v2710_v6 }
 0x714   : > { %v4877_v16 = vsel %vm1597_vm14, %v1589_v29, %v4796_v4 }
 0x715   : > { %1674 = vmatmul.mubr.f32.vlgmr.msra.gmra.mrb[14].mxu0 %v4877_v16  ;;  %v2595_v14 = vcombine.high %v4877_v16, %v4877_v16  ;;  %v2602_v22 = vrot.slane %v4877_v16, %v4345_v7  ;;  %1745 = vmatmul.mubr.f32.vlgmr.msra.gmra.mrb[14].mxu1 %v4877_v16 }
 0x717   : > { %v2609_v26 = vrot.slane %v2595_v14, %v4345_v7  ;;  %v2610_v27 = vcombine.high %v2602_v22, %v2602_v22  ;;  %v2618_v4 = vrot.slane %v2602_v22, %v4345_v7  ;;  %3209 = vst.sshfl [vmem:[%s3986_s8 + $0x6] sm:$0x1 pattern:$0x73625140] %v2602_v22 }
 0x719   : > { %v2611_v19 = vcombine.high %v2609_v26, %v2609_v26  ;;  %v2625_v30 = vrot.slane %v2609_v26, %v4345_v7  ;;  %v2632_v21 = vrot.slane %v2610_v27, %v4345_v7  ;;  %v2640_v23 = vcombine.high %v2618_v4, %v2618_v4  ;;  %3210 = vst.sshfl [vmem:[%s3986_s8 + $0xe] sm:$0x1 pattern:$0x73625140] %v2610_v27 }
 0x71a   : > { %3211 = vst.sshfl [vmem:[%s3986_s8 + $0x26] sm:$0x1 pattern:$0x73625140] %v2609_v26 }
 0x71b   : > { %v2639_v31 = vrot.slane %v2611_v19, %v4345_v7  ;;  %v2641_v9 = vcombine.high %v2625_v30, %v2625_v30  ;;  %v2642_v20 = vcombine.high %v2632_v21, %v2632_v21  ;;  %2654 = vst [vmem:[%s3986_s8 + $0x16] sm:$0x1] %v2640_v23  ;;  %3212 = vst.sshfl [vmem:[%s3986_s8 + $0x2e] sm:$0x1 pattern:$0x73625140] %v2611_v19 }
 0x71d   : > { %v2643_v57 = vcombine.high %v2639_v31, %v2639_v31  ;;  %2655 = vst [vmem:[%s3986_s8 + $0x1e] sm:$0x1] %v2642_v20  ;;  %2658 = vst [vmem:[%s3986_s8 + $0x36] sm:$0x1] %v2641_v9 }
 0x71f   : > { %2659 = vst [vmem:[%s3986_s8 + $0x3e] sm:$0x1] %v2643_v57 }
 0x7e8   : > { %v1675_v35 = vpop.f32.mrb[14].mxu0  ;;  %v1746_v8 = vpop.f32.mrb[14].mxu1 }
 0x7e9   : > { %v1751_v18 = vadd.f32 %v3157_v10, %v1675_v35  ;;  %v1677_v24 = vpop.f32.mrb[15].mxu0  ;;  %v1748_v32 = vpop.f32.mrb[15].mxu1  ;;  %v1753_v48 = vadd.f32 %v3159_v34, %v1746_v8 }
 0x7ea   : > { %v1752_v38 = vadd.f32 %v3158_v28, %v1677_v24  ;;  %v1754_v53 = vadd.f32 %v3160_v50, %v1748_v32 }
 0x7eb   : > { %v1755_v41 = vmul.f32 0.5, %v1751_v18 }
 0x7ec   : > { %v1759_v46 = vmul.f32 0.5, %v1752_v38  ;;  %v1764_v59 = vmul.f32 0.5, %v1754_v53 }
 0x7ed   : > { %3860 = vtanh.f32 %v1755_v41 }
 0x7ee   : > { %3862 = vtanh.f32 %v1759_v46 }
 0x7ef   : > { %3864 = vtanh.f32 %v1753_v48 }
 0x7f0   : > { %3866 = vtanh.f32 %v1764_v59 }
 0x7f7   : > { %v3861_v60 = vpop.eup %3860 }
 0x7f8   : > { %v3863_v62 = vpop.eup %3862  ;;  %v1757_v1 = vmul.f32 0.5, %v3861_v60 }
 0x7f9   : > { %v1761_v11 = vmul.f32 0.5, %v3863_v62  ;;  %v3865_v17 = vpop.eup %3864 }
 0x7fa   : > { %v1758_v15 = vadd.f32 0.5, %v1757_v1  ;;  %v3867_v54 = vpop.eup %3866 }
 0x7fb   : > { %v1762_v25 = vadd.f32 0.5, %v1761_v11  ;;  %v1766_v58 = vmul.f32 0.5, %v3867_v54 }
 0x7fc   : > { %v1769_v33 = vmul.f32 %v3865_v17, %v1758_v15 }
 0x7fd   : > { %v1768_v39 = vmul.f32 %v1762_v25, %v4856_v37  ;;  %v1767_v56 = vadd.f32 0.5, %v1766_v58 }
 0x7ff   : > { %v1770_v44 = vadd.f32 %v1769_v33, %v1768_v39 }
 0x801   : > { %3868 = vtanh.f32 %v1770_v44  ;;  %v1782_v52 = vsel %vm1780_vm15, %v1770_v44, %v4856_v37 }
 0x802   : > { %1788 = vst [vmem:[#allocation3] sm:$0xff] %v1782_v52  ;;  %v2796_v55 = vcombine.high %v1782_v52, %v1782_v52  ;;  %v2803_v63 = vrot.slane %v1782_v52, %v4345_v7 }
 0x804   : > { %v2810_v40 = vrot.slane %v2796_v55, %v4345_v7  ;;  %v2811_v43 = vcombine.high %v2803_v63, %v2803_v63  ;;  %v2819_v47 = vrot.slane %v2803_v63, %v4345_v7  ;;  %3221 = vst.sshfl [vmem:[%s3988_s9 + $0x7] sm:$0x1 pattern:$0x73625140] %v2803_v63 }
 0x806   : > { %v2812_v13 = vcombine.high %v2810_v40, %v2810_v40  ;;  %v2826_v37 = vrot.slane %v2810_v40, %v4345_v7  ;;  %v2833_v61 = vrot.slane %v2811_v43, %v4345_v7  ;;  %v2841_v42 = vcombine.high %v2819_v47, %v2819_v47  ;;  %3222 = vst.sshfl [vmem:[%s3988_s9 + $0xf] sm:$0x1 pattern:$0x73625140] %v2811_v43 }
 0x807   : > { %3223 = vst.sshfl [vmem:[%s3988_s9 + $0x27] sm:$0x1 pattern:$0x73625140] %v2810_v40 }
 0x808   : > { %v2840_v51 = vrot.slane %v2812_v13, %v4345_v7  ;;  %v2842_v2 = vcombine.high %v2826_v37, %v2826_v37  ;;  %v2843_v45 = vcombine.high %v2833_v61, %v2833_v61  ;;  %2855 = vst [vmem:[%s3988_s9 + $0x17] sm:$0x1] %v2841_v42  ;;  %3224 = vst.sshfl [vmem:[%s3988_s9 + $0x2f] sm:$0x1 pattern:$0x73625140] %v2812_v13 }
 0x80a   : > { %v2844_v0 = vcombine.high %v2840_v51, %v2840_v51  ;;  %2856 = vst [vmem:[%s3988_s9 + $0x1f] sm:$0x1] %v2843_v45  ;;  %2859 = vst [vmem:[%s3988_s9 + $0x37] sm:$0x1] %v2842_v2 }
 0x80b   : > { %v3869_v49 = vpop.eup %3868 }
 0x80c   : > { %2860 = vst [vmem:[%s3988_s9 + $0x3f] sm:$0x1] %v2844_v0  ;;  %v1772_v3 = vmul.f32 %v3869_v49, %v1767_v56 }
 0x80e   : > { %v1781_v5 = vsel %vm1780_vm15, %v1772_v3, %v4877_v16 }
 0x80f   : > { %1787 = vst [vmem:[#allocation2] sm:$0xff] %v1781_v5  ;;  %v2729_v6 = vcombine.high %v1781_v5, %v1781_v5  ;;  %v2736_v12 = vrot.slane %v1781_v5, %v4345_v7 }
 0x811   : > { %v2743_v29 = vrot.slane %v2729_v6, %v4345_v7  ;;  %v2744_v14 = vcombine.high %v2736_v12, %v2736_v12  ;;  %v2752_v22 = vrot.slane %v2736_v12, %v4345_v7  ;;  %3217 = vst.sshfl [vmem:[%s3986_s8 + $0x7] sm:$0x1 pattern:$0x73625140] %v2736_v12 }
 0x813   : > { %v2745_v26 = vcombine.high %v2743_v29, %v2743_v29  ;;  %v2759_v27 = vrot.slane %v2743_v29, %v4345_v7  ;;  %v2766_v16 = vrot.slane %v2744_v14, %v4345_v7  ;;  %v2774_v4 = vcombine.high %v2752_v22, %v2752_v22  ;;  %3218 = vst.sshfl [vmem:[%s3986_s8 + $0xf] sm:$0x1 pattern:$0x73625140] %v2744_v14  ;;  %2871 = sbr.rel (!%p3966_p3) target bundleno = 2082 (0x822), region = 40 }
 0x814   : > { %3219 = vst.sshfl [vmem:[%s3986_s8 + $0x27] sm:$0x1 pattern:$0x73625140] %v2743_v29 }
 0x815   : > { %v2773_v19 = vrot.slane %v2745_v26, %v4345_v7  ;;  %v2775_v30 = vcombine.high %v2759_v27, %v2759_v27  ;;  %v2776_v21 = vcombine.high %v2766_v16, %v2766_v16  ;;  %2788 = vst [vmem:[%s3986_s8 + $0x17] sm:$0x1] %v2774_v4  ;;  %3220 = vst.sshfl [vmem:[%s3986_s8 + $0x2f] sm:$0x1 pattern:$0x73625140] %v2745_v26 }
 0x817   : > { %v2777_v23 = vcombine.high %v2773_v19, %v2773_v19  ;;  %2789 = vst [vmem:[%s3986_s8 + $0x1f] sm:$0x1] %v2776_v21  ;;  %2792 = vst [vmem:[%s3986_s8 + $0x37] sm:$0x1] %v2775_v30 }
 0x818   : > { %v2918_v7 = vld [vmem:[%s3986_s8] sm:$0xff] (%p3966_p3) }
 0x819   : > { %2793 = vst [vmem:[%s3986_s8 + $0x3f] sm:$0x1] %v2777_v23  ;;  %2919 = vst [vmem:[%s2876_s26] sm:$0xff] (%p3966_p3), %v2918_v7 }
 0x81a   : > { %v2920_v31 = vld [vmem:[%s3986_s8 + $0x8] sm:$0xff] }
 0x81b   : > { %2921 = vst [vmem:[%s2876_s26 + $0x10] sm:$0xff] %v2920_v31  ;;  %v2926_v57 = vld [vmem:[%s3986_s8 + $0x20] sm:$0xff] }
 0x81c   : > { %v2922_v9 = vld [vmem:[%s3986_s8 + $0x10] sm:$0xff]  ;;  %v2928_v10 = vld [vmem:[%s3986_s8 + $0x28] sm:$0xff]  ;;  %2927 = vst [vmem:[%s2876_s26 + $0x40] sm:$0xff] %v2926_v57 }
 0x81d   : > { %2923 = vst [vmem:[%s2876_s26 + $0x20] sm:$0xff] %v2922_v9  ;;  %2929 = vst [vmem:[%s2876_s26 + $0x50] sm:$0xff] %v2928_v10 }
 0x81e   : > { %v2924_v20 = vld [vmem:[%s3986_s8 + $0x18] sm:$0xff]  ;;  %v2930_v28 = vld [vmem:[%s3986_s8 + $0x30] sm:$0xff] }
 0x81f   : > { %2925 = vst [vmem:[%s2876_s26 + $0x30] sm:$0xff] %v2924_v20  ;;  %2931 = vst [vmem:[%s2876_s26 + $0x60] sm:$0xff] %v2930_v28 }
 0x820   : > { %v2932_v35 = vld [vmem:[%s3986_s8 + $0x38] sm:$0xff] }
 0x821   : > { %2933 = vst [vmem:[%s2876_s26 + $0x70] sm:$0xff] %v2932_v35 }
 0x822 PF: > { %2939 = sbr.rel (!%p3966_p3) target bundleno = 2089 (0x829), region = 78  ;;  %s2944_s5 = scalar_lea.vmem (%p3966_p3), %s4982_s4, %s3977_s27  ;;  %v2986_v8 = vld [vmem:[%s3988_s9] sm:$0xff] (%p3966_p3)  ;;  %v2988_v18 = vld [vmem:[%s3988_s9 + $0x8] sm:$0xff] (%p3966_p3)  ;;  %v2990_v24 = vld [vmem:[%s3988_s9 + $0x10] sm:$0xff] (%p3966_p3) }
 0x823   : > { %2987 = vst [vmem:[%s2944_s5] sm:$0xff] (%p3966_p3), %v2986_v8  ;;  %2989 = vst [vmem:[%s2944_s5 + $0x10] sm:$0xff] (%p3966_p3), %v2988_v18  ;;  %v2992_v32 = vld [vmem:[%s3988_s9 + $0x18] sm:$0xff] (%p3966_p3)  ;;  %v2994_v34 = vld [vmem:[%s3988_s9 + $0x20] sm:$0xff] (%p3966_p3) }
 0x824   : > { %2991 = vst [vmem:[%s2944_s5 + $0x20] sm:$0xff] (%p3966_p3), %v2990_v24  ;;  %v2996_v38 = vld [vmem:[%s3988_s9 + $0x28] sm:$0xff] (%p3966_p3)  ;;  %2993 = vst [vmem:[%s2944_s5 + $0x30] sm:$0xff] (%p3966_p3), %v2992_v32  ;;  %v2998_v41 = vld [vmem:[%s3988_s9 + $0x30] sm:$0xff] (%p3966_p3) }
 0x825   : > { %2995 = vst [vmem:[%s2944_s5 + $0x40] sm:$0xff] (%p3966_p3), %v2994_v34  ;;  %2997 = vst [vmem:[%s2944_s5 + $0x50] sm:$0xff] (%p3966_p3), %v2996_v38  ;;  %v3000_v46 = vld [vmem:[%s3988_s9 + $0x38] sm:$0xff] (%p3966_p3) }
 0x826   : > { %2999 = vst [vmem:[%s2944_s5 + $0x60] sm:$0xff] (%p3966_p3), %v2998_v41  ;;  %3001 = vst [vmem:[%s2944_s5 + $0x70] sm:$0xff] (%p3966_p3), %v3000_v46 }
 0x829 PF: > { %s15_s19 = sadd.s32 1, %s3908_s19   ;;  %s4984_s15 = smov %s3896_s16 }
 0x82a   : > { %p12_p10 = scmp.ge.s32.totalorder %s15_s19, 4   ;;  %s4985_s16 = smov %s3975_s25 }
 0x82b   : > { %s4986_s17 = smov %s3904_s18  ;;  %s4987_s18 = smov %s4989_s21 }
 0x82c   :  { %14 = sbr.rel (!%p12_p10) target bundleno = 3 (0x3), region = 178 }

</bundles_post_ra>
